<compile_context>
chip_gen: v6e
topology: v6e:2x2x1
jax: 0.10.0
libtpu: 0.0.40
codegen_flags: <defaults>
</compile_context>

<pallas_src>
import numpy as np
import jax
import jax.numpy as jnp
from jax.experimental import pallas as pl
from jax.experimental.pallas import tpu as pltpu


OUT_LANES = 128          # lane-dense output width (>= 16, multiple of 128)
BLOCKS = ["ctx1", "ctx2", "tow1", "tow2", "uv1", "uv2"]


# -----------------------------------------------------------------------------
# Packed-parameter layout (shared by glue, kernel and reference)
# -----------------------------------------------------------------------------
def layout(D, C, out_lanes):
    """name -> (row_offset, K rows, N cols) inside the packed weight slab."""
    dims = {
        "ctx1": (C * D, C * D),      # blockdiag_C(w_r1.T)
        "ctx2": (C * D, D),          # linear2.T
        "tow1": (5 * D, 3 * D),      # blockdiag(w_ur1.T, w_vr1.T, w_uc1.T)
        "tow2": (3 * D, 3 * D),      # blockdiag(w_ur2.T, w_vr2.T, w_uc2.T)
        "uv1":  (3 * D, D),          # w_uv1.T
        "uv2":  (D, out_lanes),      # w_uv2.T padded to out_lanes
    }
    offs, r = {}, 0
    for n in BLOCKS:
        k, nw = dims[n]
        offs[n] = (r, k, nw)
        r += k
    return offs, r


# -----------------------------------------------------------------------------
# Pallas kernel: fused DCGNN MLP head (one batch tile per grid step)
# -----------------------------------------------------------------------------
def dcgnn_kernel(uv_ref, ce_ref, w_ref, b_ref, out_ref):
    D = uv_ref.shape[1] // 4
    C = ce_ref.shape[1] // D
    OUT = out_ref.shape[1]
    offs, _ = layout(D, C, OUT)

    def w(name):                              # bf16 (K, N) weight slice (static)
        r, k, n = offs[name]
        return w_ref[r:r + k, :n]

    def b(name):                              # f32 (1, N) bias row
        r = BLOCKS.index(name)
        n = offs[name][2]
        return b_ref[r:r + 1, :n]

    def mm(a, name):                          # bf16 x bf16 -> f32 accumulate
        return jnp.dot(a.astype(jnp.bfloat16), w(name),
                       preferred_element_type=jnp.float32)

    relu = lambda x: jnp.maximum(x, 0.0)

    # ---- context branch: per-slot w_r1 as one block-diag matmul, then linear2
    z = relu(mm(ce_ref[...], "ctx1") + b("ctx1"))                 # (TB, C*D) f32
    embed_c = relu(mm(z, "ctx2") + b("ctx2"))                     # (TB, D)

    # ---- towers, layer 1: block-diag over (u, v, c); K split so no lane concat
    r1, k1, n1 = offs["tow1"]
    t1 = (jnp.dot(uv_ref[...], w_ref[r1:r1 + 4 * D, :n1],
                  preferred_element_type=jnp.float32)
          + jnp.dot(embed_c.astype(jnp.bfloat16),
                    w_ref[r1 + 4 * D:r1 + k1, :n1],
                    preferred_element_type=jnp.float32)
          + b("tow1"))
    t1 = relu(t1)                                                 # (TB, 3D)

    # ---- towers, layer 2: block-diag -> directly the fusion operand (no concat)
    fused = mm(t1, "tow2") + b("tow2")                            # (TB, 3D)

    # ---- fusion head (bn3/bn4 folded); h2 columns >= 16 are exactly zero ----
    h = relu(mm(fused, "uv1") + b("uv1"))                         # (TB, D)
    h2 = relu(mm(h, "uv2") + b("uv2"))                            # (TB, OUT)
    out_ref[...] = h2                                             # lane-dense store


# -----------------------------------------------------------------------------
# Parameter setup (PyTorch-style Linear init, eval-mode BN fold, slab packing)
# -----------------------------------------------------------------------------
def make_linear(key, in_f, out_f):
    k1, k2 = jax.random.split(key)
    bound = 1.0 / np.sqrt(in_f)
    w = jax.random.uniform(k1, (out_f, in_f), jnp.float32, -bound, bound)
    b = jax.random.uniform(k2, (out_f,), jnp.float32, -bound, bound)
    return w, b


def fold_bn(w, b, num_feat, eps=1e-5):
    # PyTorch BatchNorm1d defaults (eval mode): gamma=1, beta=0, mean=0, var=1.
    gamma = jnp.ones((num_feat,), jnp.float32)
    beta = jnp.zeros((num_feat,), jnp.float32)
    mean = jnp.zeros((num_feat,), jnp.float32)
    var = jnp.ones((num_feat,), jnp.float32)
    s = gamma / jnp.sqrt(var + eps)
    return w * s[:, None], b * s + (beta - mean * s)


def _blockdiag(mats):
    K = sum(m.shape[0] for m in mats)
    N = sum(m.shape[1] for m in mats)
    out = jnp.zeros((K, N), jnp.float32)
    r = c = 0
    for m in mats:
        out = out.at[r:r + m.shape[0], c:c + m.shape[1]].set(m)
        r += m.shape[0]
        c += m.shape[1]
    return out


def build_params(key, D, C):
    assert OUT_LANES >= 16
    keys = jax.random.split(key, 11)
    w_r1, b_r1 = make_linear(keys[0], D, D)
    lin2_w, lin2_b = make_linear(keys[1], D * C, D)
    w_ur1, b_ur1 = make_linear(keys[2], 2 * D, D)
    w_ur2, b_ur2 = make_linear(keys[3], D, D)
    w_vr1, b_vr1 = make_linear(keys[4], 2 * D, D)
    w_vr2, b_vr2 = make_linear(keys[5], D, D)
    w_uc1, b_uc1 = make_linear(keys[6], D, D)
    w_uc2, b_uc2 = make_linear(keys[7], D, D)
    w_uv1, b_uv1 = make_linear(keys[8], 3 * D, D)
    w_uv2, b_uv2 = make_linear(keys[9], D, 16)
    w_uv3, b_uv3 = make_linear(keys[10], 16, 1)

    # Fold eval-mode BatchNorm into the Linear that feeds it.
    w_ur1, b_ur1 = fold_bn(w_ur1, b_ur1, D)      # bn1
    w_uc1, b_uc1 = fold_bn(w_uc1, b_uc1, D)      # bn1 (reused in the module)
    w_vr1, b_vr1 = fold_bn(w_vr1, b_vr1, D)      # bn2
    w_uv1, b_uv1 = fold_bn(w_uv1, b_uv1, D)      # bn3
    w_uv2, b_uv2 = fold_bn(w_uv2, b_uv2, 16)     # bn4

    blocks_w = {
        "ctx1": _blockdiag([w_r1.T] * C),                         # (C*D, C*D)
        "ctx2": lin2_w.T,                                         # (C*D, D)
        "tow1": _blockdiag([w_ur1.T, w_vr1.T, w_uc1.T]),          # (5D, 3D)
        "tow2": _blockdiag([w_ur2.T, w_vr2.T, w_uc2.T]),          # (3D, 3D)
        "uv1":  w_uv1.T,                                          # (3D, D)
        "uv2":  jnp.zeros((D, OUT_LANES), jnp.float32).at[:, :16].set(w_uv2.T),
    }
    blocks_b = {
        "ctx1": jnp.tile(b_r1, C),
        "ctx2": lin2_b,
        "tow1": jnp.concatenate([b_ur1, b_vr1, b_uc1]),
        "tow2": jnp.concatenate([b_ur2, b_vr2, b_uc2]),
        "uv1":  b_uv1,
        "uv2":  jnp.zeros((OUT_LANES,), jnp.float32).at[:16].set(b_uv2),
    }

    offs, total_rows = layout(D, C, OUT_LANES)
    wmax = max(offs[n][2] for n in BLOCKS)
    w_slab = jnp.concatenate(
        [jnp.pad(blocks_w[n], ((0, 0), (0, wmax - blocks_w[n].shape[1])))
         for n in BLOCKS], axis=0).astype(jnp.bfloat16)            # (total, wmax) bf16
    assert w_slab.shape[0] == total_rows
    b_slab = jnp.stack(
        [jnp.pad(blocks_b[n], (0, wmax - blocks_b[n].shape[0]))
         for n in BLOCKS], axis=0)                                 # (6, wmax) f32

    return w_slab, b_slab, w_uv3.T, b_uv3     # final 16->1 scorer stays in wrapper


# -----------------------------------------------------------------------------
# Wrapper around pallas_call
# -----------------------------------------------------------------------------
def dcgnn_forward(eu, esu, ev, esv, ce_rep, params, *, tb=256):
    w_slab, b_slab, wuv3t, buv3 = params
    B, D = eu.shape
    C = ce_rep.shape[1]

    # Batch tile: multiple of 16 (bf16 sublane packing); tiny B -> one tile.
    tb = max(16, (tb // 16) * 16)
    tb = min(tb, int(pl.cdiv(B, 16)) * 16)
    nb = int(pl.cdiv(B, tb))
    Bp = nb * tb
    pad = Bp - B
    if pad:
        eu, esu, ev, esv = (jnp.pad(x, ((0, pad), (0, 0))) for x in (eu, esu, ev, esv))
        ce_rep = jnp.pad(ce_rep, ((0, pad), (0, 0), (0, 0)))

    # Pre-concatenated tower input (Bp, 4D) and batch-major context slab (Bp, C*D);
    # bf16 at the boundary (only the MXU sees bf16, all VPU math stays f32).
    uv_cat = jnp.concatenate([eu, esu, ev, esv], axis=1).astype(jnp.bfloat16)
    ce_flat = ce_rep.reshape(Bp, C * D).astype(jnp.bfloat16)

    # Right-sized VMEM limit from actual buffer sizes (generous 2x headroom).
    w_rows, wmax = w_slab.shape
    act_in = 2 * tb * (4 * D + C * D) * 2               # double-buffered bf16 inputs
    act_out = 2 * tb * OUT_LANES * 4                    # double-buffered f32 output
    par = 2 * (w_rows * wmax * 2 + b_slab.shape[0] * wmax * 4)
    interm = tb * (2 * C * D + 8 * D + 2 * OUT_LANES) * 4
    vmem_limit = int(min(32 << 20, max(8 << 20, 2 * (act_in + act_out + par + interm))))

    def _param_spec(shape, single_buffer):
        idx = lambda i: (0,) * len(shape)
        if single_buffer:
            # Grid-invariant params: single-buffer instead of default double.
            return pl.BlockSpec(shape, idx, pipeline_mode=pl.Buffered(1))
        return pl.BlockSpec(shape, idx)

    def _run(single_buffer_params):
        grid_spec = pltpu.PrefetchScalarGridSpec(
            num_scalar_prefetch=0,
            grid=(nb,),
            in_specs=[
                pl.BlockSpec((tb, 4 * D), lambda i: (i, 0)),
                pl.BlockSpec((tb, C * D), lambda i: (i, 0)),
                _param_spec(w_slab.shape, single_buffer_params),
                _param_spec(b_slab.shape, single_buffer_params),
            ],
            out_specs=pl.BlockSpec((tb, OUT_LANES), lambda i: (i, 0)),
        )
        return pl.pallas_call(
            dcgnn_kernel,
            out_shape=jax.ShapeDtypeStruct((Bp, OUT_LANES), jnp.float32),
            grid_spec=grid_spec,
            compiler_params=pltpu.CompilerParams(
                dimension_semantics=("parallel",),       # v7x: split batch over 2 TCs
                vmem_limit_bytes=vmem_limit,
            ),
        )(uv_cat, ce_flat, w_slab, b_slab)

    try:
        h2 = _run(True)
    except Exception:
        # TODO(synk): pl.Buffered(1) single-buffering not supported on this JAX
        # version; fall back to default double-buffering of the weight slabs.
        h2 = _run(False)

    # Final 16->1 scorer + squeeze in plain JAX (keeps the kernel store lane-dense).
    scores = h2[:B, :16] @ wuv3t + buv3
    return scores[:, 0]


# -----------------------------------------------------------------------------
# Pure-JAX reference mirroring the module structure (same bf16-in / f32-acc math)
# -----------------------------------------------------------------------------
def dcgnn_reference(eu, esu, ev, esv, ce_rep, params):
    w_slab, b_slab, wuv3t, buv3 = params
    B, D = eu.shape
    C = ce_rep.shape[1]
    offs, _ = layout(D, C, OUT_LANES)

    def w(name):
        r, k, n = offs[name]
        return w_slab[r:r + k, :n]

    def b(name):
        r = BLOCKS.index(name)
        n = offs[name][2]
        return b_slab[r:r + 1, :n]

    dotf = lambda a, ww: jnp.dot(a.astype(jnp.bfloat16), ww,
                                 preferred_element_type=jnp.float32)
    relu = lambda x: jnp.maximum(x, 0.0)

    # Context branch: per-slot w_r1 (the module's python loop), then linear2.
    w_r1_t, b_r1 = w("ctx1")[:D, :D], b("ctx1")[:, :D]
    chunks = [relu(dotf(ce_rep[:, c, :], w_r1_t) + b_r1) for c in range(C)]
    embed_c = relu(dotf(jnp.concatenate(chunks, axis=1), w("ctx2")) + b("ctx2"))

    t1w, t2w, t1b, t2b = w("tow1"), w("tow2"), b("tow1"), b("tow2")
    xu = relu(dotf(jnp.concatenate([eu, esu], 1), t1w[:2 * D, :D]) + t1b[:, :D])
    xu = dotf(xu, t2w[:D, :D]) + t2b[:, :D]
    xv = relu(dotf(jnp.concatenate([ev, esv], 1), t1w[2 * D:4 * D, D:2 * D])
              + t1b[:, D:2 * D])
    xv = dotf(xv, t2w[D:2 * D, D:2 * D]) + t2b[:, D:2 * D]
    xc = relu(dotf(embed_c, t1w[4 * D:, 2 * D:]) + t1b[:, 2 * D:])
    xc = dotf(xc, t2w[2 * D:, 2 * D:]) + t2b[:, 2 * D:]

    h = relu(dotf(jnp.concatenate([xu, xv, xc], 1), w("uv1")) + b("uv1"))
    h2 = relu(dotf(h, w("uv2")) + b("uv2"))
    scores = h2[:, :16] @ wuv3t + buv3
    return scores[:, 0]


if __name__ == "__main__":
    B, D, C = 512, 32, 3           # batch, embed_dim, num_context
    TB = 256                       # batch tile -> grid=(2,), one tile per v7x TC
    NUM_USERS, NUM_ITEMS, CTX_VOCAB = 50, 50, 10

    root = jax.random.PRNGKey(0)
    (k_param, k_eu, k_esu, k_ev, k_esv,
     k_c2e, k_nu, k_nv, k_ctx) = jax.random.split(root, 9)

    params = build_params(k_param, D, C)

    # TODO(synk): the real enc_u / enc_su / enc_v_history / enc_sv are external
    # graph-aggregation encoders; they are modeled here as embedding lookups.
    enc_u_tab = jax.random.normal(k_eu, (NUM_USERS, D), jnp.float32) * 0.1
    enc_su_tab = jax.random.normal(k_esu, (NUM_USERS, D), jnp.float32) * 0.1
    enc_v_tab = jax.random.normal(k_ev, (NUM_ITEMS, D), jnp.float32) * 0.1
    enc_sv_tab = jax.random.normal(k_esv, (NUM_ITEMS, D), jnp.float32) * 0.1
    c2e_weight = jax.random.normal(k_c2e, (CTX_VOCAB, D), jnp.float32) * 0.1

    nodes_u = jax.random.randint(k_nu, (B,), 0, NUM_USERS)
    nodes_v = jax.random.randint(k_nv, (B,), 0, NUM_ITEMS)
    context = jax.random.randint(k_ctx, (B, C), 0, CTX_VOCAB)

    # Glue: embedding lookups (gather) in plain JAX; ce stays batch-major (B,C,D).
    embeds_u = jnp.take(enc_u_tab, nodes_u, axis=0)       # (B, D)
    emb_s_u = jnp.take(enc_su_tab, nodes_u, axis=0)       # (B, D)
    embeds_v = jnp.take(enc_v_tab, nodes_v, axis=0)       # (B, D)
    emb_s_v = jnp.take(enc_sv_tab, nodes_v, axis=0)       # (B, D)
    ce_rep = jnp.take(c2e_weight, context, axis=0)        # (B, C, D)

    # TODO(synk): F.dropout is stochastic in training mode; this kernel
    # implements inference semantics (dropout = identity, BatchNorm = running
    # stats affine folded into the weights).
    scores = dcgnn_forward(embeds_u, emb_s_u, embeds_v, emb_s_v, ce_rep,
                           params, tb=TB)
    scores = jax.block_until_ready(scores)

    ref = dcgnn_reference(embeds_u, emb_s_u, embeds_v, emb_s_v, ce_rep, params)
    np.testing.assert_allclose(np.asarray(scores), np.asarray(ref),
                               rtol=1e-2, atol=1e-2)

    print("KERNEL_OK")
</pallas_src>

<mosaic_0001>
module attributes {stable_mosaic.version = 11 : i64} {
  func.func @dcgnn_kernel(%arg0: i32, %arg1: memref<256x128xbf16, #tpu.memory_space<vmem>>, %arg2: memref<256x96xbf16, #tpu.memory_space<vmem>>, %arg3: memref<576x128xbf16, #tpu.memory_space<vmem>>, %arg4: memref<6x128xf32, #tpu.memory_space<vmem>>, %arg5: memref<256x128xf32, #tpu.memory_space<vmem>>) attributes {dimension_semantics = [#tpu.dimension_semantics<parallel>], iteration_bounds = array<i64: 2>, scalar_prefetch = 0 : i64, scratch_operands = 0 : i64, tpu.core_type = #tpu.core_type<tc>, window_params = [{transform_indices = @transform_0, window_bounds = array<i64: 256, 128>}, {transform_indices = @transform_1, window_bounds = array<i64: 256, 96>}, {pipeline_mode = #tpu.pipeline_mode<synchronous>, transform_indices = @transform_2, window_bounds = array<i64: 576, 128>}, {pipeline_mode = #tpu.pipeline_mode<synchronous>, transform_indices = @transform_3, window_bounds = array<i64: 6, 128>}, {transform_indices = @transform_4, window_bounds = array<i64: 256, 128>}]} {
    %c0 = arith.constant 0 : index
    %c0_0 = arith.constant 0 : index
    %0 = vector.load %arg2[%c0, %c0_0] : memref<256x96xbf16, #tpu.memory_space<vmem>>, vector<256x96xbf16>
    %c0_1 = arith.constant 0 : index
    %c0_2 = arith.constant 0 : index
    %1 = vector.load %arg3[%c0_1, %c0_2] : memref<576x128xbf16, #tpu.memory_space<vmem>>, vector<96x96xbf16>
    %cst = arith.constant dense<0.000000e+00> : vector<256x96xf32>
    %2 = tpu.matmul %0, %1, %cst {dimension_numbers = #tpu.dot_dimension_numbers<[1], [0], [0], [1], [0, 0, 1, 1], [], []>} : vector<256x96xbf16>, vector<96x96xbf16>, vector<256x96xf32> -> vector<256x96xf32>
    %c0_3 = arith.constant 0 : index
    %c0_4 = arith.constant 0 : index
    %3 = vector.load %arg4[%c0_3, %c0_4] : memref<6x128xf32, #tpu.memory_space<vmem>>, vector<1x96xf32>
    %4 = vector.broadcast %3 : vector<1x96xf32> to vector<256x96xf32>
    %5 = arith.addf %2, %4 : vector<256x96xf32>
    %cst_5 = arith.constant 0.000000e+00 : f32
    %6 = vector.broadcast %cst_5 : f32 to vector<256x96xf32>
    %7 = arith.maximumf %5, %6 : vector<256x96xf32>
    %8 = arith.truncf %7 : vector<256x96xf32> to vector<256x96xbf16>
    %c96 = arith.constant 96 : index
    %c0_6 = arith.constant 0 : index
    %9 = vector.load %arg3[%c96, %c0_6] : memref<576x128xbf16, #tpu.memory_space<vmem>>, vector<96x32xbf16>
    %cst_7 = arith.constant dense<0.000000e+00> : vector<256x32xf32>
    %10 = tpu.matmul %8, %9, %cst_7 {dimension_numbers = #tpu.dot_dimension_numbers<[1], [0], [0], [1], [0, 0, 1, 1], [], []>} : vector<256x96xbf16>, vector<96x32xbf16>, vector<256x32xf32> -> vector<256x32xf32>
    %c1 = arith.constant 1 : index
    %c0_8 = arith.constant 0 : index
    %11 = vector.load %arg4[%c1, %c0_8] : memref<6x128xf32, #tpu.memory_space<vmem>>, vector<1x32xf32>
    %12 = vector.broadcast %11 : vector<1x32xf32> to vector<256x32xf32>
    %13 = arith.addf %10, %12 : vector<256x32xf32>
    %cst_9 = arith.constant 0.000000e+00 : f32
    %14 = vector.broadcast %cst_9 : f32 to vector<256x32xf32>
    %15 = arith.maximumf %13, %14 : vector<256x32xf32>
    %c0_10 = arith.constant 0 : index
    %c0_11 = arith.constant 0 : index
    %16 = vector.load %arg1[%c0_10, %c0_11] : memref<256x128xbf16, #tpu.memory_space<vmem>>, vector<256x128xbf16>
    %c192 = arith.constant 192 : index
    %c0_12 = arith.constant 0 : index
    %17 = vector.load %arg3[%c192, %c0_12] : memref<576x128xbf16, #tpu.memory_space<vmem>>, vector<128x96xbf16>
    %cst_13 = arith.constant dense<0.000000e+00> : vector<256x96xf32>
    %18 = tpu.matmul %16, %17, %cst_13 {dimension_numbers = #tpu.dot_dimension_numbers<[1], [0], [0], [1], [0, 0, 1, 1], [], []>} : vector<256x128xbf16>, vector<128x96xbf16>, vector<256x96xf32> -> vector<256x96xf32>
    %19 = arith.truncf %15 : vector<256x32xf32> to vector<256x32xbf16>
    %c320 = arith.constant 320 : index
    %c0_14 = arith.constant 0 : index
    %20 = vector.load %arg3[%c320, %c0_14] : memref<576x128xbf16, #tpu.memory_space<vmem>>, vector<32x96xbf16>
    %cst_15 = arith.constant dense<0.000000e+00> : vector<256x96xf32>
    %21 = tpu.matmul %19, %20, %cst_15 {dimension_numbers = #tpu.dot_dimension_numbers<[1], [0], [0], [1], [0, 0, 1, 1], [], []>} : vector<256x32xbf16>, vector<32x96xbf16>, vector<256x96xf32> -> vector<256x96xf32>
    %22 = arith.addf %18, %21 : vector<256x96xf32>
    %c2 = arith.constant 2 : index
    %c0_16 = arith.constant 0 : index
    %23 = vector.load %arg4[%c2, %c0_16] : memref<6x128xf32, #tpu.memory_space<vmem>>, vector<1x96xf32>
    %24 = vector.broadcast %23 : vector<1x96xf32> to vector<256x96xf32>
    %25 = arith.addf %22, %24 : vector<256x96xf32>
    %cst_17 = arith.constant 0.000000e+00 : f32
    %26 = vector.broadcast %cst_17 : f32 to vector<256x96xf32>
    %27 = arith.maximumf %25, %26 : vector<256x96xf32>
    %28 = arith.truncf %27 : vector<256x96xf32> to vector<256x96xbf16>
    %c352 = arith.constant 352 : index
    %c0_18 = arith.constant 0 : index
    %29 = vector.load %arg3[%c352, %c0_18] : memref<576x128xbf16, #tpu.memory_space<vmem>>, vector<96x96xbf16>
    %cst_19 = arith.constant dense<0.000000e+00> : vector<256x96xf32>
    %30 = tpu.matmul %28, %29, %cst_19 {dimension_numbers = #tpu.dot_dimension_numbers<[1], [0], [0], [1], [0, 0, 1, 1], [], []>} : vector<256x96xbf16>, vector<96x96xbf16>, vector<256x96xf32> -> vector<256x96xf32>
    %c3 = arith.constant 3 : index
    %c0_20 = arith.constant 0 : index
    %31 = vector.load %arg4[%c3, %c0_20] : memref<6x128xf32, #tpu.memory_space<vmem>>, vector<1x96xf32>
    %32 = vector.broadcast %31 : vector<1x96xf32> to vector<256x96xf32>
    %33 = arith.addf %30, %32 : vector<256x96xf32>
    %34 = arith.truncf %33 : vector<256x96xf32> to vector<256x96xbf16>
    %c448 = arith.constant 448 : index
    %c0_21 = arith.constant 0 : index
    %35 = vector.load %arg3[%c448, %c0_21] : memref<576x128xbf16, #tpu.memory_space<vmem>>, vector<96x32xbf16>
    %cst_22 = arith.constant dense<0.000000e+00> : vector<256x32xf32>
    %36 = tpu.matmul %34, %35, %cst_22 {dimension_numbers = #tpu.dot_dimension_numbers<[1], [0], [0], [1], [0, 0, 1, 1], [], []>} : vector<256x96xbf16>, vector<96x32xbf16>, vector<256x32xf32> -> vector<256x32xf32>
    %c4 = arith.constant 4 : index
    %c0_23 = arith.constant 0 : index
    %37 = vector.load %arg4[%c4, %c0_23] : memref<6x128xf32, #tpu.memory_space<vmem>>, vector<1x32xf32>
    %38 = vector.broadcast %37 : vector<1x32xf32> to vector<256x32xf32>
    %39 = arith.addf %36, %38 : vector<256x32xf32>
    %cst_24 = arith.constant 0.000000e+00 : f32
    %40 = vector.broadcast %cst_24 : f32 to vector<256x32xf32>
    %41 = arith.maximumf %39, %40 : vector<256x32xf32>
    %42 = arith.truncf %41 : vector<256x32xf32> to vector<256x32xbf16>
    %c544 = arith.constant 544 : index
    %c0_25 = arith.constant 0 : index
    %43 = vector.load %arg3[%c544, %c0_25] : memref<576x128xbf16, #tpu.memory_space<vmem>>, vector<32x128xbf16>
    %cst_26 = arith.constant dense<0.000000e+00> : vector<256x128xf32>
    %44 = tpu.matmul %42, %43, %cst_26 {dimension_numbers = #tpu.dot_dimension_numbers<[1], [0], [0], [1], [0, 0, 1, 1], [], []>} : vector<256x32xbf16>, vector<32x128xbf16>, vector<256x128xf32> -> vector<256x128xf32>
    %c5 = arith.constant 5 : index
    %c0_27 = arith.constant 0 : index
    %45 = vector.load %arg4[%c5, %c0_27] : memref<6x128xf32, #tpu.memory_space<vmem>>, vector<1x128xf32>
    %46 = vector.broadcast %45 : vector<1x128xf32> to vector<256x128xf32>
    %47 = arith.addf %44, %46 : vector<256x128xf32>
    %cst_28 = arith.constant 0.000000e+00 : f32
    %48 = vector.broadcast %cst_28 : f32 to vector<256x128xf32>
    %49 = arith.maximumf %47, %48 : vector<256x128xf32>
    %c0_29 = arith.constant 0 : index
    %c0_30 = arith.constant 0 : index
    %50 = vector.load %arg5[%c0_29, %c0_30] : memref<256x128xf32, #tpu.memory_space<vmem>>, vector<256x128xf32>
    tpu.vector_store %arg5[%c0_29, %c0_30], %49 {strides = array<i32>} : memref<256x128xf32, #tpu.memory_space<vmem>>, vector<256x128xf32>,
    return
  }
  func.func @transform_0(%arg0: i32) -> (i32, i32) {
    %c0_i32 = arith.constant 0 : i32
    %c0_i32_0 = arith.constant 0 : i32
    return %arg0, %c0_i32 : i32, i32
  }
  func.func @transform_1(%arg0: i32) -> (i32, i32) {
    %c0_i32 = arith.constant 0 : i32
    %c0_i32_0 = arith.constant 0 : i32
    return %arg0, %c0_i32 : i32, i32
  }
  func.func @transform_2(%arg0: i32) -> (i32, i32) {
    %c0_i32 = arith.constant 0 : i32
    %c0_i32_0 = arith.constant 0 : i32
    %c0_i32_1 = arith.constant 0 : i32
    return %c0_i32, %c0_i32_0 : i32, i32
  }
  func.func @transform_3(%arg0: i32) -> (i32, i32) {
    %c0_i32 = arith.constant 0 : i32
    %c0_i32_0 = arith.constant 0 : i32
    %c0_i32_1 = arith.constant 0 : i32
    return %c0_i32, %c0_i32_0 : i32, i32
  }
  func.func @transform_4(%arg0: i32) -> (i32, i32) {
    %c0_i32 = arith.constant 0 : i32
    %c0_i32_0 = arith.constant 0 : i32
    return %arg0, %c0_i32 : i32, i32
  }
}

module attributes {stable_mosaic.version = 11 : i64} {
  func.func @dcgnn_kernel(%arg0: i32, %arg1: memref<256x128xbf16, #tpu.memory_space<vmem>>, %arg2: memref<256x96xbf16, #tpu.memory_space<vmem>>, %arg3: memref<576x128xbf16, #tpu.memory_space<vmem>>, %arg4: memref<6x128xf32, #tpu.memory_space<vmem>>, %arg5: memref<256x128xf32, #tpu.memory_space<vmem>>) attributes {dimension_semantics = [#tpu.dimension_semantics<parallel>], iteration_bounds = array<i64: 2>, scalar_prefetch = 0 : i64, scratch_operands = 0 : i64, tpu.core_type = #tpu.core_type<tc>, window_params = [{transform_indices = @transform_0, window_bounds = array<i64: 256, 128>}, {transform_indices = @transform_1, window_bounds = array<i64: 256, 96>}, {pipeline_mode = #tpu.pipeline_mode<synchronous>, transform_indices = @transform_2, window_bounds = array<i64: 576, 128>}, {pipeline_mode = #tpu.pipeline_mode<synchronous>, transform_indices = @transform_3, window_bounds = array<i64: 6, 128>}, {transform_indices = @transform_4, window_bounds = array<i64: 256, 128>}]} {
    %c0 = arith.constant 0 : index
    %c0_0 = arith.constant 0 : index
    %0 = vector.load %arg2[%c0, %c0_0] : memref<256x96xbf16, #tpu.memory_space<vmem>>, vector<256x96xbf16>
    %c0_1 = arith.constant 0 : index
    %c0_2 = arith.constant 0 : index
    %1 = vector.load %arg3[%c0_1, %c0_2] : memref<576x128xbf16, #tpu.memory_space<vmem>>, vector<96x96xbf16>
    %cst = arith.constant dense<0.000000e+00> : vector<256x96xf32>
    %2 = tpu.matmul %0, %1, %cst {dimension_numbers = #tpu.dot_dimension_numbers<[1], [0], [0], [1], [0, 0, 1, 1], [], []>} : vector<256x96xbf16>, vector<96x96xbf16>, vector<256x96xf32> -> vector<256x96xf32>
    %c0_3 = arith.constant 0 : index
    %c0_4 = arith.constant 0 : index
    %3 = vector.load %arg4[%c0_3, %c0_4] : memref<6x128xf32, #tpu.memory_space<vmem>>, vector<1x96xf32>
    %4 = vector.broadcast %3 : vector<1x96xf32> to vector<256x96xf32>
    %5 = arith.addf %2, %4 : vector<256x96xf32>
    %cst_5 = arith.constant 0.000000e+00 : f32
    %6 = vector.broadcast %cst_5 : f32 to vector<256x96xf32>
    %7 = arith.maximumf %5, %6 : vector<256x96xf32>
    %8 = arith.truncf %7 : vector<256x96xf32> to vector<256x96xbf16>
    %c96 = arith.constant 96 : index
    %c0_6 = arith.constant 0 : index
    %9 = vector.load %arg3[%c96, %c0_6] : memref<576x128xbf16, #tpu.memory_space<vmem>>, vector<96x32xbf16>
    %cst_7 = arith.constant dense<0.000000e+00> : vector<256x32xf32>
    %10 = tpu.matmul %8, %9, %cst_7 {dimension_numbers = #tpu.dot_dimension_numbers<[1], [0], [0], [1], [0, 0, 1, 1], [], []>} : vector<256x96xbf16>, vector<96x32xbf16>, vector<256x32xf32> -> vector<256x32xf32>
    %c1 = arith.constant 1 : index
    %c0_8 = arith.constant 0 : index
    %11 = vector.load %arg4[%c1, %c0_8] : memref<6x128xf32, #tpu.memory_space<vmem>>, vector<1x32xf32>
    %12 = vector.broadcast %11 : vector<1x32xf32> to vector<256x32xf32>
    %13 = arith.addf %10, %12 : vector<256x32xf32>
    %cst_9 = arith.constant 0.000000e+00 : f32
    %14 = vector.broadcast %cst_9 : f32 to vector<256x32xf32>
    %15 = arith.maximumf %13, %14 : vector<256x32xf32>
    %c0_10 = arith.constant 0 : index
    %c0_11 = arith.constant 0 : index
    %16 = vector.load %arg1[%c0_10, %c0_11] : memref<256x128xbf16, #tpu.memory_space<vmem>>, vector<256x128xbf16>
    %c192 = arith.constant 192 : index
    %c0_12 = arith.constant 0 : index
    %17 = vector.load %arg3[%c192, %c0_12] : memref<576x128xbf16, #tpu.memory_space<vmem>>, vector<128x96xbf16>
    %cst_13 = arith.constant dense<0.000000e+00> : vector<256x96xf32>
    %18 = tpu.matmul %16, %17, %cst_13 {dimension_numbers = #tpu.dot_dimension_numbers<[1], [0], [0], [1], [0, 0, 1, 1], [], []>} : vector<256x128xbf16>, vector<128x96xbf16>, vector<256x96xf32> -> vector<256x96xf32>
    %19 = arith.truncf %15 : vector<256x32xf32> to vector<256x32xbf16>
    %c320 = arith.constant 320 : index
    %c0_14 = arith.constant 0 : index
    %20 = vector.load %arg3[%c320, %c0_14] : memref<576x128xbf16, #tpu.memory_space<vmem>>, vector<32x96xbf16>
    %cst_15 = arith.constant dense<0.000000e+00> : vector<256x96xf32>
    %21 = tpu.matmul %19, %20, %cst_15 {dimension_numbers = #tpu.dot_dimension_numbers<[1], [0], [0], [1], [0, 0, 1, 1], [], []>} : vector<256x32xbf16>, vector<32x96xbf16>, vector<256x96xf32> -> vector<256x96xf32>
    %22 = arith.addf %18, %21 : vector<256x96xf32>
    %c2 = arith.constant 2 : index
    %c0_16 = arith.constant 0 : index
    %23 = vector.load %arg4[%c2, %c0_16] : memref<6x128xf32, #tpu.memory_space<vmem>>, vector<1x96xf32>
    %24 = vector.broadcast %23 : vector<1x96xf32> to vector<256x96xf32>
    %25 = arith.addf %22, %24 : vector<256x96xf32>
    %cst_17 = arith.constant 0.000000e+00 : f32
    %26 = vector.broadcast %cst_17 : f32 to vector<256x96xf32>
    %27 = arith.maximumf %25, %26 : vector<256x96xf32>
    %28 = arith.truncf %27 : vector<256x96xf32> to vector<256x96xbf16>
    %c352 = arith.constant 352 : index
    %c0_18 = arith.constant 0 : index
    %29 = vector.load %arg3[%c352, %c0_18] : memref<576x128xbf16, #tpu.memory_space<vmem>>, vector<96x96xbf16>
    %cst_19 = arith.constant dense<0.000000e+00> : vector<256x96xf32>
    %30 = tpu.matmul %28, %29, %cst_19 {dimension_numbers = #tpu.dot_dimension_numbers<[1], [0], [0], [1], [0, 0, 1, 1], [], []>} : vector<256x96xbf16>, vector<96x96xbf16>, vector<256x96xf32> -> vector<256x96xf32>
    %c3 = arith.constant 3 : index
    %c0_20 = arith.constant 0 : index
    %31 = vector.load %arg4[%c3, %c0_20] : memref<6x128xf32, #tpu.memory_space<vmem>>, vector<1x96xf32>
    %32 = vector.broadcast %31 : vector<1x96xf32> to vector<256x96xf32>
    %33 = arith.addf %30, %32 : vector<256x96xf32>
    %34 = arith.truncf %33 : vector<256x96xf32> to vector<256x96xbf16>
    %c448 = arith.constant 448 : index
    %c0_21 = arith.constant 0 : index
    %35 = vector.load %arg3[%c448, %c0_21] : memref<576x128xbf16, #tpu.memory_space<vmem>>, vector<96x32xbf16>
    %cst_22 = arith.constant dense<0.000000e+00> : vector<256x32xf32>
    %36 = tpu.matmul %34, %35, %cst_22 {dimension_numbers = #tpu.dot_dimension_numbers<[1], [0], [0], [1], [0, 0, 1, 1], [], []>} : vector<256x96xbf16>, vector<96x32xbf16>, vector<256x32xf32> -> vector<256x32xf32>
    %c4 = arith.constant 4 : index
    %c0_23 = arith.constant 0 : index
    %37 = vector.load %arg4[%c4, %c0_23] : memref<6x128xf32, #tpu.memory_space<vmem>>, vector<1x32xf32>
    %38 = vector.broadcast %37 : vector<1x32xf32> to vector<256x32xf32>
    %39 = arith.addf %36, %38 : vector<256x32xf32>
    %cst_24 = arith.constant 0.000000e+00 : f32
    %40 = vector.broadcast %cst_24 : f32 to vector<256x32xf32>
    %41 = arith.maximumf %39, %40 : vector<256x32xf32>
    %42 = arith.truncf %41 : vector<256x32xf32> to vector<256x32xbf16>
    %c544 = arith.constant 544 : index
    %c0_25 = arith.constant 0 : index
    %43 = vector.load %arg3[%c544, %c0_25] : memref<576x128xbf16, #tpu.memory_space<vmem>>, vector<32x128xbf16>
    %cst_26 = arith.constant dense<0.000000e+00> : vector<256x128xf32>
    %44 = tpu.matmul %42, %43, %cst_26 {dimension_numbers = #tpu.dot_dimension_numbers<[1], [0], [0], [1], [0, 0, 1, 1], [], []>} : vector<256x32xbf16>, vector<32x128xbf16>, vector<256x128xf32> -> vector<256x128xf32>
    %c5 = arith.constant 5 : index
    %c0_27 = arith.constant 0 : index
    %45 = vector.load %arg4[%c5, %c0_27] : memref<6x128xf32, #tpu.memory_space<vmem>>, vector<1x128xf32>
    %46 = vector.broadcast %45 : vector<1x128xf32> to vector<256x128xf32>
    %47 = arith.addf %44, %46 : vector<256x128xf32>
    %cst_28 = arith.constant 0.000000e+00 : f32
    %48 = vector.broadcast %cst_28 : f32 to vector<256x128xf32>
    %49 = arith.maximumf %47, %48 : vector<256x128xf32>
    %c0_29 = arith.constant 0 : index
    %c0_30 = arith.constant 0 : index
    %50 = vector.load %arg5[%c0_29, %c0_30] : memref<256x128xf32, #tpu.memory_space<vmem>>, vector<256x128xf32>
    tpu.vector_store %arg5[%c0_29, %c0_30], %49 {strides = array<i32>} : memref<256x128xf32, #tpu.memory_space<vmem>>, vector<256x128xf32>,
    return
  }
  func.func @transform_0(%arg0: i32) -> (i32, i32) {
    %c0_i32 = arith.constant 0 : i32
    %c0_i32_0 = arith.constant 0 : i32
    return %arg0, %c0_i32 : i32, i32
  }
  func.func @transform_1(%arg0: i32) -> (i32, i32) {
    %c0_i32 = arith.constant 0 : i32
    %c0_i32_0 = arith.constant 0 : i32
    return %arg0, %c0_i32 : i32, i32
  }
  func.func @transform_2(%arg0: i32) -> (i32, i32) {
    %c0_i32 = arith.constant 0 : i32
    %c0_i32_0 = arith.constant 0 : i32
    %c0_i32_1 = arith.constant 0 : i32
    return %c0_i32, %c0_i32_0 : i32, i32
  }
  func.func @transform_3(%arg0: i32) -> (i32, i32) {
    %c0_i32 = arith.constant 0 : i32
    %c0_i32_0 = arith.constant 0 : i32
    %c0_i32_1 = arith.constant 0 : i32
    return %c0_i32, %c0_i32_0 : i32, i32
  }
  func.func @transform_4(%arg0: i32) -> (i32, i32) {
    %c0_i32 = arith.constant 0 : i32
    %c0_i32_0 = arith.constant 0 : i32
    return %arg0, %c0_i32 : i32, i32
  }
}

</mosaic_0001>

<bundles_post_ra>
// kernel: tpu_custom_call.1
= control target key start
LH: loop header
LB: loop body
LE: loop exit
PB: predicated region body
PF: predicated region fallthrough
CT: control target
= control target key end

     0   :  { %9 = vsyncpa [#allocation3], 0  ;;  %s4210_s0 = inlined_call_operand.hbm [shape: bf16[512,128], index: 0, kind: input, shape index: {}]   ;;  %s4211_s1 = inlined_call_operand.vmem [shape: bf16[512,96], index: 1, kind: input, shape index: {}]   ;;  %s4212_s2 = inlined_call_operand.vmem [shape: bf16[576,128], index: 2, kind: input, shape index: {}]   ;;  %s4213_s3 = inlined_call_operand.vmem [shape: f32[6,128], index: 3, kind: input, shape index: {}]   ;;  %s4214_s4 = inlined_call_operand.hbm [shape: f32[512,128], index: 4, kind: output, shape index: {}]  }
   0x1   :  { %11 = vsyncpa [#allocation3 + $0x1], 0 }
   0x2   :  { %12 = vsyncpa [#allocation4], 0 }
   0x3   :  { %14 = vsyncpa [#allocation4 + $0x1], 0  ;;  %s3506_s15 = smov 0   ;;  %s3508_s16 = smov 0  }
   0x4   :  { %s3510_s17 = smov 0   ;;  %s3512_s18 = smov 0  }
   0x5 LB: > { %s3527_s19 = sadd.s32 4294967295, %s3473_s18   ;;  %s2619_s20 = sadd.s32 4294967294, %s3473_s18   ;;  %s3473_s18 = sphi %s3512_s18, %s4229_s18   ;;  %s3469_s17 = sphi %s3510_s17, %s4228_s17   ;;  %s3465_s16 = sphi %s3508_s16, %s4227_s16   ;;  %s3461_s15 = sphi %s3506_s15, %s4226_s15  }
   0x6   : > { %s3531_s21 = sadd.s32 1, %s3473_s18   ;;  %s27_s22 = sadd.s32 1, %s3469_s17 }
   0x7   : > { %s24_s23 = ssub.s32 %s3473_s18, %s3531_s21  ;;  %p34_p0 = scmp.ne.s32.totalorder %s3469_s17, %s3465_s16 }
   0x8   : > { %p25_p1 = scmp.eq.s32.totalorder %s24_s23, 0  ;;  %p35_p2 = scmp.eq.s32.totalorder %s3473_s18, 0 }
   0x9   : > { %p40_p3 = scmp.ne.s32.totalorder %s3465_s16, %s3461_s15  ;;  %p41_p4 = scmp.eq.s32.totalorder %s3527_s19, 0 }
   0xa   : > { %s3543_s24 = scalar_select %p25_p1, %s3469_s17, %s27_s22  }
   0xb   : > { %p3545_p5 = por %p35_p2, %p34_p0  ;;  %p3549_p6 = por %p41_p4, %p40_p3 }
   0xc   : > { %p132_p7 = scmp.eq.s32.totalorder %s3527_s19, 1  ;;  %p138_p8 = scmp.eq.s32.totalorder %s2619_s20, 1 }
   0xd   : > { %s4218_s26 = scalar_select %p3549_p6, 1, 0 }
   0xe   : > { %p3275_p10 = scmp.lt.s32.totalorder %s3473_s18, 2  ;;  %p3556_p11 = por %p132_p7, %p34_p0 }
   0xf   : > { %p3560_p12 = por %p138_p8, %p40_p3  ;;  %s164_s29 = sand.u32 1, %s3469_s17  }
  0x10   : > { %s4219_s27 = scalar_select %p3556_p11, 1, 0 }
  0x11   : > { %s4220_s28 = scalar_select %p3560_p12, 1, 0 }
  0x12   : > { %s2805_s30 = sshll.u32 %s3473_s18, 11  ;;  %s2622_s5 = sshll.u32 %s164_s29, 7 }
  0x13   : > { %s3569_s8 = scalar_lea.hbm %s4210_s0, %s2805_s30  ;;  %s168_s9 = scalar_lea.vmem [#allocation2], %s2622_s5 }
  0x14   : > { %s175_s10 = sshll.u32 %s168_s9, 4  ;;  %p3573_p13 = pnand %p3275_p10, %p3545_p5  ;;  %s3577_s10 = int_to_ptr.vmem [resolvable:$true] %s175_s10 }
  0x15   : > { %s3579_s12 = scalar_lea.sflag [#allocation3], %s164_s29  ;;  %s3381_s13 = scalar_lea.hbm %s3569_s8, 2048 }
  0x16   : > { %p3382_p0 = scmp.ne.s32.totalorder %s3569_s8, %s3381_s13  ;;  %p3383_p1 = pneg %p3573_p13 }
  0x17   : > { %s3386_s22 = scalar_lea.hbm %s4210_s0, 4096  ;;  %p3387_p4 = scmp.lt.s32.totalorder %s3569_s8, %s4210_s0 }
  0x18   : > { %p3384_p2 = pnand %p3383_p1, %p3382_p0  ;;  %p3388_p5 = scmp.lt.s32.totalorder %s3386_s22, %s3381_s13 }
  0x1a   : > { %p3385_p3 = pneg %p3384_p2  ;;  %p3389_p7 = por %p3388_p5, %p3387_p4 }
  0x1c   : > { %p3390_p8 = pnand %p3389_p7, %p3385_p3 }
  0x1e   : > { %3393 = shalt.err (!%p3390_p8)
}
  0x1f   : > { %s3394_s29 = scalar_lea.vmem %s3577_s10, 2048  ;;  %s3475_s30 = smov [#allocation2]  }
  0x20   : > { %p3395_p10 = scmp.ne.s32.totalorder %s3577_s10, %s3394_s29  ;;  %s3399_s5 = sshll.u32 %s3475_s30, 4  ;;  %s3400_s5 = int_to_ptr.vmem [resolvable:$false] %s3399_s5 }
  0x21   : > { %s3401_s6 = scalar_lea.vmem %s3400_s5, 4096  ;;  %p3402_p2 = scmp.lt.s32.totalorder %s3577_s10, %s3400_s5 }
  0x22   : > { %p3397_p9 = pnand %p3395_p10, %p3383_p1  ;;  %p3403_p12 = scmp.lt.s32.totalorder %s3401_s6, %s3394_s29 }
  0x24   : > { %p3398_p0 = pneg %p3397_p9  ;;  %p3404_p11 = por %p3403_p12, %p3402_p2 }
  0x26   : > { %p3405_p6 = pnand %p3404_p11, %p3398_p0 }
  0x28   : > { %3408 = shalt.err (!%p3405_p6)
}
  0x29   : > { %s3476_s7 = smov 64   ;;  %s3477_s9 = smov 4  }
  0x2a   : > { %3270 = dma.hbm_to_vmem [thread:$0]  (!%p3573_p13), %s3569_s8, 2048, %s3577_s10, %s3579_s12, %s3476_s7, %s3476_s7, %s3477_s9  }
  0x2b   : > { %p2625_p9 = scmp.ge.s32.totalorder %s3473_s18, 1  ;;  %p192_p1 = scmp.lt.s32.totalorder %s3473_s18, 3 }
  0x2d   : > { %p193_p3 = pnand %p2625_p9, %p192_p1 }
  0x2e   : > { %s3603_s13 = sand.u32 (!%p193_p3), 1, %s3465_s16   ;;  %p4222_p6 = scmp.ne.s32.totalorder (!%p193_p3), %s4218_s26, 0 }
  0x2f   : > { %196 = sbr.rel (%p193_p3) target bundleno = 1381 (0x565), region = 36  ;;  %s2626_s14 = sshll.u32 (!%p193_p3), %s3603_s13, 7 }
  0x30   : > { %s199_s20 = scalar_lea.sflag (!%p193_p3), [#allocation3], %s3603_s13  ;;  %s3607_s22 = scalar_lea.vmem (!%p193_p3), [#allocation2], %s2626_s14 }
  0x34   : > { %3452 = dma.done.wait (%p4222_p6), %s199_s20, 2048  }
  0x35   : > { %3454 = vsyncadd (%p4222_p6), %s199_s20, 4294965248  ;;  %s2628_s8 = sshll.u32 %s3527_s19, 5  ;;  %v3313_v0 = vld [vmem:[%s4212_s2 + $0x28] sm:$0xff]   ;;  %v3314_v1 = vld [vmem:[%s4212_s2 + $0x20] sm:$0xff]   ;;  %vm406_vm0 = vcmask 785408   ;;  %vm1038_vm1 = vcmask 261120  }
  0x36   : > { %p234_p11 = scmp.lt.s32.totalorder %s2628_s8, 63  ;;  %2955 = vmatprep.subr.bf16.mxu0 %v3313_v0  ;;  %3251 = vmatprep.subr.bf16.mxu1 %v3313_v0  ;;  %v3315_v2 = vld [vmem:[%s4212_s2 + $0x18] sm:$0xff]   ;;  %v3316_v4 = vld [vmem:[%s4212_s2 + $0x10] sm:$0xff]   ;;  %v3317_v5 = vld [vmem:[%s4212_s2 + $0x8] sm:$0xff]   ;;  %s2627_s9 = sshll.u32 %s3603_s13, 8 }
  0x37   : > { %2956 = vmatpush3.bf16.msra.mxu0 %v3313_v0  ;;  %3257 = vmatpush3.bf16.msra.mxu1 %v3313_v0  ;;  %v3318_v7 = vld [vmem:[%s4212_s2] sm:$0xff]   ;;  %v3335_v11 = vld [vmem:[%s4212_s2 + $0x58] sm:$0xff]   ;;  %v3336_v13 = vld [vmem:[%s4212_s2 + $0x50] sm:$0xff]   ;;  %s4096_s14 = scalar_lea.vmem [#allocation5], %s2627_s9  ;;  %s2806_s20 = sshll.u32 %s3527_s19, 12 }
  0x38   : > { %s4231_s8 = smov (!%p234_p11, %s2628_s8), 63  ;;  %2957 = vmatprep.subr.bf16.mxu0 %v3314_v1  ;;  %3252 = vmatprep.subr.bf16.mxu1 %v3314_v1  ;;  %v3337_v14 = vld [vmem:[%s4212_s2 + $0x48] sm:$0xff]   ;;  %v3338_v19 = vld [vmem:[%s4212_s2 + $0x40] sm:$0xff]   ;;  %v3339_v26 = vld [vmem:[%s4212_s2 + $0x38] sm:$0xff]   ;;  %s4163_s11 = scalar_lea.hbm %s4214_s4, %s2806_s20 }
  0x39   : > { %s2629_s12 = sshll.u32 %s4231_s8, 2  ;;  %v3340_v27 = vld [vmem:[%s4212_s2 + $0x30] sm:$0xff]   ;;  %v3341_v28 = vld [vmem:[%s4212_s2 + $0x98] sm:$0xff]   ;;  %v3345_v29 = vld [vmem:[%s4212_s2 + $0xa8] sm:$0xff]   ;;  %s2534_s8 = sshll.u32 %s4096_s14, 4  ;;  %s4165_s8 = int_to_ptr.vmem [resolvable:$true] %s2534_s8 }
  0x3a   : > { %s3623_s26 = scalar_lea.vmem %s4211_s1, %s2629_s12  ;;  %v3348_v30 = vld [vmem:[%s4212_s2 + $0xa0] sm:$0xff]   ;;  %v3342_v56 = vld [vmem:[%s4212_s2 + $0x90] sm:$0xff]   ;;  %s2521_s19 = scalar_lea.sflag [#allocation4], %s3603_s13 }
  0x3b   : > { %v3319_v3 = vld [vmem:[%s3623_s26] sm:$0xff]   ;;  %2958 = vmatpush3.bf16.msra.mxu0 %v3314_v1  ;;  %3258 = vmatpush3.bf16.msra.mxu1 %v3314_v1  ;;  %v3320_v8 = vld [vmem:[%s3623_s26 + $0x8] sm:$0xff]   ;;  %v3321_v9 = vld [vmem:[%s3623_s26 + $0x10] sm:$0xff]   ;;  %s3409_s12 = scalar_lea.vmem %s4165_s8, 4096  ;;  %p4223_p13 = scmp.ne.s32.totalorder %s4219_s27, 0 }
  0x3c   : > { %2959 = vmatprep.subr.bf16.mxu0 %v3315_v2  ;;  %2967 = vmatprep.mubr.msk.bf16.mxu0 %vm406_vm0, %v3319_v3  ;;  %v3327_v6 = vld [vmem:[%s3623_s26 + $0x40] sm:$0xff]   ;;  %v3328_v10 = vld [vmem:[%s3623_s26 + $0x48] sm:$0xff]   ;;  %v3329_v12 = vld [vmem:[%s3623_s26 + $0x50] sm:$0xff]   ;;  %p3410_p12 = scmp.ne.s32.totalorder %s4165_s8, %s3409_s12  ;;  %s3478_s23 = smov [#allocation5]  }
  0x3d   : > { %3253 = vmatprep.subr.bf16.mxu1 %v3315_v2  ;;  %2983 = vmatprep.mubr.msk.bf16.mxu1 %vm406_vm0, %v3327_v6  ;;  %v3322_v15 = vld [vmem:[%s3623_s26 + $0x18] sm:$0xff]   ;;  %v3323_v17 = vld [vmem:[%s3623_s26 + $0x20] sm:$0xff]   ;;  %v3324_v20 = vld [vmem:[%s3623_s26 + $0x28] sm:$0xff]   ;;  %s3413_s25 = sshll.u32 %s3478_s23, 4  ;;  %s3414_s25 = int_to_ptr.vmem [resolvable:$false] %s3413_s25 }
  0x3e   : > { %v3330_v16 = vld [vmem:[%s3623_s26 + $0x58] sm:$0xff]   ;;  %v3331_v18 = vld [vmem:[%s3623_s26 + $0x60] sm:$0xff]   ;;  %v3332_v21 = vld [vmem:[%s3623_s26 + $0x68] sm:$0xff]   ;;  %p3411_p4 = pnand %p3410_p12, %p4223_p13  ;;  %s3415_s29 = scalar_lea.vmem %s3414_s25, 8192 }
  0x3f   : > { %2960 = vmatpush3.bf16.msra.mxu0 %v3315_v2  ;;  %3259 = vmatpush3.bf16.msra.mxu1 %v3315_v2  ;;  %v3325_v22 = vld [vmem:[%s3623_s26 + $0x30] sm:$0xff]   ;;  %v3326_v24 = vld [vmem:[%s3623_s26 + $0x38] sm:$0xff]   ;;  %v3703_v35 = vld [vmem:[%s4213_s3] ss:$0 sm:$0xff]  ;;  %p3416_p7 = scmp.lt.s32.totalorder %s4165_s8, %s3414_s25  ;;  %p3417_p8 = scmp.lt.s32.totalorder %s3415_s29, %s3409_s12 }
  0x40   : > { %2961 = vmatprep.subr.bf16.mxu0 %v3316_v4  ;;  %3254 = vmatprep.subr.bf16.mxu1 %v3316_v4  ;;  %v3333_v23 = vld [vmem:[%s3623_s26 + $0x70] sm:$0xff]   ;;  %v3334_v25 = vld [vmem:[%s3623_s26 + $0x78] sm:$0xff]   ;;  %v3343_v1 = vld [vmem:[%s4212_s2 + $0x88] sm:$0xff]   ;;  %p3412_p5 = pneg %p3411_p4 }
  0x41   : > { %p3418_p10 = por %p3417_p8, %p3416_p7 }
  0x43   : > { %2962 = vmatpush3.bf16.msra.mxu0 %v3316_v4  ;;  %3260 = vmatpush3.bf16.msra.mxu1 %v3316_v4  ;;  %p3419_p0 = pnand %p3418_p10, %p3412_p5 }
  0x44   : > { %2963 = vmatprep.subr.bf16.mxu0 %v3317_v5  ;;  %3255 = vmatprep.subr.bf16.mxu1 %v3317_v5 }
  0x47   : > { %2964 = vmatpush3.bf16.msra.mxu0 %v3317_v5  ;;  %3261 = vmatpush3.bf16.msra.mxu1 %v3317_v5 }
  0x48   : > { %2965 = vmatprep.subr.bf16.mxu0 %v3318_v7  ;;  %3256 = vmatprep.subr.bf16.mxu1 %v3318_v7 }
  0x4b   : > { %2966 = vmatpush3.bf16.msra.mxu0 %v3318_v7  ;;  %3262 = vmatpush3.bf16.msra.mxu1 %v3318_v7 }
  0x4c   : > { %2999 = vmatprep.subr.bf16.mxu1 %v3335_v11  ;;  %3043 = vmatprep.subr.bf16.mxu0 %v3345_v29 }
  0x4e   : > { %2968 = vmatmul.mubr.msk.bf16.vlgmr.msra.gmra.mxu0 %vm406_vm0, %v3320_v8  ;;  %2984 = vmatmul.mubr.msk.bf16.vlgmr.msra.gmra.mxu1 %vm406_vm0, %v3328_v10  ;;  %v3344_v10 = vld [vmem:[%s4212_s2 + $0x80] sm:$0xff]  }
  0x4f   : > { %2971 = vmatprep.mubr.msk.bf16.mxu0 %vm406_vm0, %v3321_v9  ;;  %2987 = vmatprep.mubr.msk.bf16.mxu1 %vm406_vm0, %v3329_v12 }
  0x50   : > { %3000 = vmatpush3.bf16.msra.mxu1 %v3335_v11  ;;  %3044 = vmatpush3.bf16.msra.mxu0 %v3345_v29 }
  0x51   : > { %3001 = vmatprep.subr.bf16.mxu1 %v3336_v13  ;;  %3045 = vmatprep.subr.bf16.mxu0 %v3348_v30 }
  0x54   : > { %3002 = vmatpush3.bf16.msra.mxu1 %v3336_v13  ;;  %3046 = vmatpush3.bf16.msra.mxu0 %v3348_v30  ;;  %v3347_v30 = vld [vmem:[%s4212_s2 + $0x70] sm:$0xff]  }
  0x55   : > { %3003 = vmatprep.subr.bf16.mxu1 %v3337_v14 }
  0x56   : > { %2972 = vmatmul.mubr.msk.bf16.gmra.mxu0 %vm406_vm0, %v3322_v15  ;;  %2988 = vmatmul.mubr.msk.bf16.gmra.mxu1 %vm406_vm0, %v3330_v16 }
  0x57   : > { %2975 = vmatprep.mubr.msk.bf16.mxu0 %vm406_vm0, %v3323_v17  ;;  %2991 = vmatprep.mubr.msk.bf16.mxu1 %vm406_vm0, %v3331_v18 }
  0x58   : > { %3004 = vmatpush3.bf16.msra.mxu1 %v3337_v14 }
  0x59   : > { %3005 = vmatprep.subr.bf16.mxu1 %v3338_v19 }
  0x5c   : > { %3006 = vmatpush3.bf16.msra.mxu1 %v3338_v19  ;;  %v3346_v19 = vld [vmem:[%s4212_s2 + $0x78] sm:$0xff]  }
  0x5d   : > { %3007 = vmatprep.subr.bf16.mxu1 %v3339_v26 }
  0x5e   : > { %2976 = vmatmul.mubr.msk.bf16.gmra.mxu0 %vm406_vm0, %v3324_v20  ;;  %2992 = vmatmul.mubr.msk.bf16.gmra.mxu1 %vm406_vm0, %v3332_v21 }
  0x5f   : > { %2979 = vmatprep.mubr.msk.bf16.mxu0 %vm406_vm0, %v3325_v22  ;;  %2995 = vmatprep.mubr.msk.bf16.mxu1 %vm406_vm0, %v3333_v23 }
  0x60   : > { %3008 = vmatpush3.bf16.msra.mxu1 %v3339_v26 }
  0x61   : > { %3009 = vmatprep.subr.bf16.mxu1 %v3340_v27 }
  0x64   : > { %3010 = vmatpush3.bf16.msra.mxu1 %v3340_v27 }
  0x65   : > { %3079 = vmatprep.subr.bf16.mxu1 %v3341_v28 }
  0x66   : > { %2980 = vmatmul.mubr.msk.bf16.gmra.mxu0 %vm406_vm0, %v3326_v24  ;;  %2996 = vmatmul.mubr.msk.bf16.gmra.mxu1 %vm406_vm0, %v3334_v25 }
 0x10e   : > { %v2969_v31 = vpop.f32.mrf.mxu0  ;;  %v3696_v32 = vpop.f32.mrf.mxu1 }
 0x10f   : > { %v498_v40 = vadd.f32 %v2969_v31, %v3703_v35 }
 0x110   : > { %v489_v33 = vpop.f32.mrf.mxu0  ;;  %v3698_v34 = vpop.f32.mrf.mxu1 }
 0x111   : > { %v490_v38 = vadd.f32 %v3703_v35, %v489_v33  ;;  %v618_v49 = vmax.f32 %v498_v40, 0.0  ;;  %v554_v25 = vadd.f32 %v3703_v35, %v3698_v34 }
 0x112   : > { %v2970_v36 = vpop.f32.mrf.mxu0  ;;  %v3705_v37 = vpop.f32.mrf.mxu1 }
 0x113   : > { %v501_v39 = vadd.f32 %v2970_v36, %v3703_v35  ;;  %v616_v47 = vmax.f32 %v490_v38, 0.0  ;;  %v632_v38 = vmax.f32 %v554_v25, 0.0  ;;  %v3353_v25 = vld [vmem:[%s3607_s22 + $0x10] sm:$0xff]  }
 0x114   : > { %v492_v41 = vpop.f32.mrf.mxu0  ;;  %v556_v42 = vpop.f32.mrf.mxu1 }
 0x115   : > { %v493_v43 = vadd.f32 %v3703_v35, %v492_v41  ;;  %v619_v44 = vmax.f32 %v501_v39, 0.0  ;;  %v557_v26 = vadd.f32 %v3703_v35, %v556_v42 }
 0x116   : > { %v2973_v45 = vpop.f32.mrf.mxu0  ;;  %v3711_v46 = vpop.f32.mrf.mxu1 }
 0x117   : > { %v617_v48 = vmax.f32 %v493_v43, 0.0  ;;  %v649_v53 = vpack.c.bf16 %v619_v44, %v618_v49  ;;  %v514_v59 = vadd.f32 %v2973_v45, %v3703_v35  ;;  %v633_v40 = vmax.f32 %v557_v26, 0.0  ;;  %v3349_v43 = vld [vmem:[%s4212_s2 + $0x68] sm:$0xff]   ;;  %v3354_v26 = vld [vmem:[%s3607_s22 + $0x18] sm:$0xff]  }
 0x118   : > { %v505_v50 = vpop.f32.mrf.mxu0  ;;  %v3713_v51 = vpop.f32.mrf.mxu1 }
 0x119   : > { %v648_v52 = vpack.c.bf16 %v617_v48, %v616_v47  ;;  %v506_v57 = vadd.f32 %v3703_v35, %v505_v50  ;;  %v622_v4 = vmax.f32 %v514_v59, 0.0  ;;  %v656_v49 = vpack.c.bf16 %v633_v40, %v632_v38  ;;  %v3363_v38 = vld [vmem:[%s3607_s22 + $0x60] sm:$0xff]   ;;  %v3365_v40 = vld [vmem:[%s3607_s22 + $0x70] sm:$0xff]  }
 0x11a   : > { %v2974_v54 = vpop.f32.mrf.mxu0  ;;  %v3715_v55 = vpop.f32.mrf.mxu1  ;;  %v570_v50 = vadd.f32 %v3703_v35, %v3713_v51 }
 0x11b   : > { %v517_v58 = vadd.f32 %v2974_v54, %v3703_v35  ;;  %3011 = vmatprep.mubr.msk.bf16.mxu1 %vm406_vm0, %v648_v52  ;;  %v620_v2 = vmax.f32 %v506_v57, 0.0 }
 0x11c   : > { %v508_v60 = vpop.f32.mrf.mxu0  ;;  %3012 = vmatmul.mubr.msk.bf16.vlgmr.msra.gmra.mxu1 %vm406_vm0, %v649_v53  ;;  %v572_v0 = vpop.f32.mrf.mxu1  ;;  %v562_v53 = vadd.f32 %v3696_v32, %v3703_v35 }
 0x11d   : > { %v509_v61 = vadd.f32 %v3703_v35, %v508_v60  ;;  %3080 = vmatpush3.bf16.msra.mxu1 %v3341_v28  ;;  %v623_v62 = vmax.f32 %v517_v58, 0.0  ;;  %v573_v52 = vadd.f32 %v3703_v35, %v572_v0  ;;  %v636_v58 = vmax.f32 %v570_v50, 0.0 }
 0x11e   : > { %v2977_v63 = vpop.f32.mrf.mxu0  ;;  %3081 = vmatprep.subr.bf16.mxu1 %v3342_v56  ;;  %v3729_v9 = vpop.f32.mrf.mxu1  ;;  %v634_v59 = vmax.f32 %v562_v53, 0.0  ;;  %v578_v0 = vadd.f32 %v3711_v46, %v3703_v35 }
 0x11f   : > { %v621_v3 = vmax.f32 %v509_v61, 0.0  ;;  %v651_v7 = vpack.c.bf16 %v623_v62, %v622_v4  ;;  %v530_v13 = vadd.f32 %v2977_v63, %v3703_v35  ;;  %v637_v51 = vmax.f32 %v573_v52, 0.0 }
 0x120   : > { %v521_v5 = vpop.f32.mrf.mxu0  ;;  %v585_v18 = vpop.f32.mrf.mxu1  ;;  %v594_v46 = vadd.f32 %v3729_v9, %v3703_v35 }
 0x121   : > { %v650_v6 = vpack.c.bf16 %v621_v3, %v620_v2  ;;  %3082 = vmatpush3.bf16.msra.mxu1 %v3342_v56  ;;  %v522_v11 = vadd.f32 %v3703_v35, %v521_v5  ;;  %v626_v22 = vmax.f32 %v530_v13, 0.0  ;;  %v565_v56 = vadd.f32 %v3705_v37, %v3703_v35 }
 0x122   : > { %v2978_v8 = vpop.f32.mrf.mxu0  ;;  %3083 = vmatprep.subr.bf16.mxu1 %v3343_v1  ;;  %v2994_v29 = vpop.f32.mrf.mxu1  ;;  %v658_v62 = vpack.c.bf16 %v637_v51, %v636_v58  ;;  %v586_v32 = vadd.f32 %v3703_v35, %v585_v18  ;;  %v638_v5 = vmax.f32 %v578_v0, 0.0 }
 0x123   : > { %v533_v12 = vadd.f32 %v2978_v8, %v3703_v35  ;;  %3015 = vmatprep.mubr.msk.bf16.mxu1 %vm406_vm0, %v650_v6  ;;  %v624_v20 = vmax.f32 %v522_v11, 0.0  ;;  %v635_v60 = vmax.f32 %v565_v56, 0.0 }
 0x124   : > { %v524_v14 = vpop.f32.mrf.mxu0  ;;  %3016 = vmatmul.mubr.msk.bf16.gmra.mxu1 %vm406_vm0, %v651_v7  ;;  %v588_v42 = vpop.f32.mrf.mxu1  ;;  %v640_v3 = vmax.f32 %v586_v32, 0.0  ;;  %v3368_v32 = vld [vmem:[%s4212_s2 + $0xd0] sm:$0xff]  }
 0x125   : > { %v525_v15 = vadd.f32 %v3703_v35, %v524_v14  ;;  %3084 = vmatpush3.bf16.msra.mxu1 %v3343_v1  ;;  %v627_v16 = vmax.f32 %v533_v12, 0.0  ;;  %v589_v63 = vadd.f32 %v3703_v35, %v588_v42  ;;  %v657_v37 = vpack.c.bf16 %v635_v60, %v634_v59  ;;  %v3367_v42 = vld [vmem:[%s4212_s2 + $0xd8] sm:$0xff]  }
 0x126   : > { %v2981_v17 = vpop.f32.mrf.mxu0  ;;  %3085 = vmatprep.subr.bf16.mxu1 %v3344_v10  ;;  %v2997_v57 = vpop.f32.mrf.mxu1  ;;  %v581_v1 = vadd.f32 %v3715_v55, %v3703_v35  ;;  %v597_v55 = vadd.f32 %v2994_v29, %v3703_v35  ;;  %v3357_v29 = vld [vmem:[%s3607_s22 + $0x30] sm:$0xff]   ;;  %3127 = vmatprep.subr.bf16.mxu0 %v3367_v42 }
 0x127   : > { %v625_v21 = vmax.f32 %v525_v15, 0.0  ;;  %v653_v27 = vpack.c.bf16 %v627_v16, %v626_v22  ;;  %v546_v36 = vadd.f32 %v2981_v17, %v3703_v35  ;;  %v641_v4 = vmax.f32 %v589_v63, 0.0 }
 0x128   : > { %v537_v23 = vpop.f32.mrf.mxu0  ;;  %v601_v61 = vpop.f32.mrf.mxu1  ;;  %v639_v6 = vmax.f32 %v581_v1, 0.0  ;;  %v642_v15 = vmax.f32 %v594_v46, 0.0  ;;  %v643_v16 = vmax.f32 %v597_v55, 0.0  ;;  %v3370_v55 = vld [vmem:[%s4212_s2 + $0xc0] sm:$0xff]  }
 0x129   : > { %v652_v24 = vpack.c.bf16 %v625_v21, %v624_v20  ;;  %3086 = vmatpush3.bf16.msra.mxu1 %v3344_v10  ;;  %v538_v31 = vadd.f32 %v3703_v35, %v537_v23  ;;  %v630_v47 = vmax.f32 %v546_v36, 0.0  ;;  %v660_v8 = vpack.c.bf16 %v641_v4, %v640_v3  ;;  %v3350_v23 = vld [vmem:[%s4212_s2 + $0x60] sm:$0xff]   ;;  %v3361_v36 = vld [vmem:[%s3607_s22 + $0x50] sm:$0xff]  }
 0x12a   : > { %v2982_v28 = vpop.f32.mrf.mxu0  ;;  %3087 = vmatprep.subr.bf16.mxu1 %v3346_v19  ;;  %v2998_v2 = vpop.f32.mrf.mxu1  ;;  %v602_v10 = vadd.f32 %v3703_v35, %v601_v61  ;;  %v659_v12 = vpack.c.bf16 %v639_v6, %v638_v5  ;;  %v661_v18 = vpack.c.bf16 %v643_v16, %v642_v15  ;;  %v3369_v5 = vld [vmem:[%s4212_s2 + $0xc8] sm:$0xff]  }
 0x12b   : > { %v549_v33 = vadd.f32 %v2982_v28, %v3703_v35  ;;  %3019 = vmatprep.mubr.msk.bf16.mxu1 %vm406_vm0, %v652_v24  ;;  %v628_v44 = vmax.f32 %v538_v31, 0.0  ;;  %v613_v9 = vadd.f32 %v2998_v2, %v3703_v35  ;;  %v3352_v24 = vld [vmem:[%s3607_s22 + $0x8] sm:$0xff]   ;;  %v3359_v31 = vld [vmem:[%s3607_s22 + $0x40] sm:$0xff]  }
 0x12c   : > { %v540_v34 = vpop.f32.mrf.mxu0  ;;  %3020 = vmatmul.mubr.msk.bf16.gmra.mxu1 %vm406_vm0, %v653_v27  ;;  %v604_v7 = vpop.f32.mrf.mxu1  ;;  %v644_v13 = vmax.f32 %v602_v10, 0.0  ;;  %v3355_v27 = vld [vmem:[%s3607_s22 + $0x20] sm:$0xff]   ;;  %v3356_v28 = vld [vmem:[%s3607_s22 + $0x28] sm:$0xff]  }
 0x12d   : > { %v541_v39 = vadd.f32 %v3703_v35, %v540_v34  ;;  %3088 = vmatpush3.bf16.msra.mxu1 %v3346_v19  ;;  %v631_v41 = vmax.f32 %v549_v33, 0.0  ;;  %v605_v11 = vadd.f32 %v3703_v35, %v604_v7  ;;  %v610_v19 = vadd.f32 %v2997_v57, %v3703_v35  ;;  %v3351_v35 = vld [vmem:[%s3607_s22] sm:$0xff]   ;;  %v3360_v33 = vld [vmem:[%s3607_s22 + $0x48] sm:$0xff]   ;;  %v3362_v34 = vld [vmem:[%s3607_s22 + $0x58] sm:$0xff]  }
 0x12e   : > { %3089 = vmatprep.subr.bf16.mxu1 %v3347_v30  ;;  %v647_v21 = vmax.f32 %v613_v9, 0.0  ;;  %v3371_v9 = vld [vmem:[%s4212_s2 + $0xb8] sm:$0xff]  }
 0x12f   : > { %v629_v45 = vmax.f32 %v541_v39, 0.0  ;;  %v655_v54 = vpack.c.bf16 %v631_v41, %v630_v47  ;;  %v645_v14 = vmax.f32 %v605_v11, 0.0  ;;  %v646_v20 = vmax.f32 %v610_v19, 0.0  ;;  %v3364_v39 = vld [vmem:[%s3607_s22 + $0x68] sm:$0xff]   ;;  %v3366_v41 = vld [vmem:[%s3607_s22 + $0x78] sm:$0xff]  }
 0x131   : > { %v654_v48 = vpack.c.bf16 %v629_v45, %v628_v44  ;;  %3090 = vmatpush3.bf16.msra.mxu1 %v3347_v30  ;;  %v662_v17 = vpack.c.bf16 %v645_v14, %v644_v13  ;;  %v663_v22 = vpack.c.bf16 %v647_v21, %v646_v20  ;;  %v3358_v30 = vld [vmem:[%s3607_s22 + $0x38] sm:$0xff]   ;;  %v3813_v45 = vld [vmem:[%s4213_s3 + $0x1] ss:$0 sm:$0xff] }
 0x132   : > { %3091 = vmatprep.subr.bf16.mxu1 %v3349_v43 }
 0x133   : > { %3023 = vmatprep.mubr.msk.bf16.mxu1 %vm406_vm0, %v654_v48 }
 0x134   : > { %3024 = vmatmul.mubr.msk.bf16.gmra.mxu1 %vm406_vm0, %v655_v54 }
 0x135   : > { %3027 = vmatprep.mubr.msk.bf16.mxu1 %vm406_vm0, %v656_v49  ;;  %3092 = vmatpush3.bf16.msra.mxu1 %v3349_v43 }
 0x136   : > { %3093 = vmatprep.subr.bf16.mxu1 %v3350_v23 }
 0x139   : > { %3094 = vmatpush3.bf16.msra.mxu1 %v3350_v23 }
 0x13c   : > { %3028 = vmatmul.mubr.msk.bf16.gmra.mxu1 %vm406_vm0, %v657_v37 }
 0x13d   : > { %3031 = vmatprep.mubr.msk.bf16.mxu1 %vm406_vm0, %v658_v62 }
 0x144   : > { %3032 = vmatmul.mubr.msk.bf16.gmra.mxu1 %vm406_vm0, %v659_v12 }
 0x145   : > { %3035 = vmatprep.mubr.msk.bf16.mxu1 %vm406_vm0, %v660_v8 }
 0x14c   : > { %3036 = vmatmul.mubr.msk.bf16.gmra.mxu1 %vm406_vm0, %v661_v18 }
 0x14d   : > { %3039 = vmatprep.mubr.msk.bf16.mxu1 %vm406_vm0, %v662_v17 }
 0x154   : > { %3040 = vmatmul.mubr.msk.bf16.gmra.mxu1 %vm406_vm0, %v663_v22 }
 0x155   : > { %3095 = vmatprep.mubr.bf16.mxu1 %v3351_v35 }
 0x15c   : > { %3096 = vmatmul.mubr.bf16.vlgmr.msra.gmra.mxu1 %v3352_v24 }
 0x15d   : > { %3099 = vmatprep.mubr.bf16.mxu1 %v3353_v25 }
 0x164   : > { %3100 = vmatmul.mubr.bf16.gmra.mxu1 %v3354_v26 }
 0x165   : > { %3103 = vmatprep.mubr.bf16.mxu1 %v3355_v27 }
 0x16c   : > { %3104 = vmatmul.mubr.bf16.gmra.mxu1 %v3356_v28 }
 0x16d   : > { %3107 = vmatprep.mubr.bf16.mxu1 %v3357_v29 }
 0x174   : > { %3108 = vmatmul.mubr.bf16.gmra.mxu1 %v3358_v30 }
 0x175   : > { %3111 = vmatprep.mubr.bf16.mxu1 %v3359_v31 }
 0x17c   : > { %3112 = vmatmul.mubr.bf16.gmra.mxu1 %v3360_v33 }
 0x17d   : > { %3115 = vmatprep.mubr.bf16.mxu1 %v3361_v36 }
 0x184   : > { %3116 = vmatmul.mubr.bf16.gmra.mxu1 %v3362_v34 }
 0x185   : > { %3119 = vmatprep.mubr.bf16.mxu1 %v3363_v38 }
 0x18c   : > { %3120 = vmatmul.mubr.bf16.gmra.mxu1 %v3364_v39 }
 0x18d   : > { %3123 = vmatprep.mubr.bf16.mxu1 %v3365_v40 }
 0x194   : > { %3124 = vmatmul.mubr.bf16.gmra.mxu1 %v3366_v41 }
 0x1dc   : > { %v3013_v43 = vpop.f32.mrf.mxu1 }
 0x1dd   : > { %v808_v50 = vadd.f32 %v3013_v43, %v3813_v45 }
 0x1de   : > { %v799_v44 = vpop.f32.mrf.mxu1 }
 0x1df   : > { %v800_v48 = vadd.f32 %v3813_v45, %v799_v44  ;;  %v928_v51 = vmax.f32 %v808_v50, 0.0 }
 0x1e0   : > { %v3014_v47 = vpop.f32.mrf.mxu1 }
 0x1e1   : > { %v811_v49 = vadd.f32 %v3014_v47, %v3813_v45  ;;  %v926_v57 = vmax.f32 %v800_v48, 0.0 }
 0x1e2   : > { %v802_v52 = vpop.f32.mrf.mxu1 }
 0x1e3   : > { %v803_v53 = vadd.f32 %v3813_v45, %v802_v52  ;;  %v929_v54 = vmax.f32 %v811_v49, 0.0 }
 0x1e4   : > { %v3017_v56 = vpop.f32.mrf.mxu1 }
 0x1e5   : > { %v927_v58 = vmax.f32 %v803_v53, 0.0  ;;  %v1007_v61 = vpack.c.bf16 %v929_v54, %v928_v51  ;;  %v824_v0 = vadd.f32 %v3017_v56, %v3813_v45 }
 0x1e6   : > { %v815_v59 = vpop.f32.mrf.mxu1 }
 0x1e7   : > { %v1006_v60 = vpack.c.bf16 %v927_v58, %v926_v57  ;;  %v816_v63 = vadd.f32 %v3813_v45, %v815_v59  ;;  %v932_v8 = vmax.f32 %v824_v0, 0.0 }
 0x1e8   : > { %v3018_v62 = vpop.f32.mrf.mxu1 }
 0x1e9   : > { %v827_v37 = vadd.f32 %v3018_v62, %v3813_v45  ;;  %3047 = vmatprep.mubr.msk.bf16.mxu0 %vm1038_vm1, %v1006_v60  ;;  %v930_v6 = vmax.f32 %v816_v63, 0.0 }
 0x1ea   : > { %v818_v1 = vpop.f32.mrf.mxu1  ;;  %3048 = vmatmul.mubr.msk.bf16.vlgmr.msra.gmra.mxu0 %vm1038_vm1, %v1007_v61 }
 0x1eb   : > { %v819_v2 = vadd.f32 %v3813_v45, %v818_v1  ;;  %3128 = vmatpush3.bf16.msra.mxu0 %v3367_v42  ;;  %v933_v3 = vmax.f32 %v827_v37, 0.0 }
 0x1ec   : > { %v3021_v4 = vpop.f32.mrf.mxu1  ;;  %3129 = vmatprep.subr.bf16.mxu0 %v3368_v32 }
 0x1ed   : > { %v931_v7 = vmax.f32 %v819_v2, 0.0  ;;  %v1009_v12 = vpack.c.bf16 %v933_v3, %v932_v8  ;;  %v840_v15 = vadd.f32 %v3021_v4, %v3813_v45 }
 0x1ee   : > { %v831_v10 = vpop.f32.mrf.mxu1 }
 0x1ef   : > { %v1008_v11 = vpack.c.bf16 %v931_v7, %v930_v6  ;;  %3130 = vmatpush3.bf16.msra.mxu0 %v3368_v32  ;;  %v832_v13 = vadd.f32 %v3813_v45, %v831_v10  ;;  %v936_v22 = vmax.f32 %v840_v15, 0.0 }
 0x1f0   : > { %v3022_v46 = vpop.f32.mrf.mxu1  ;;  %3131 = vmatprep.subr.bf16.mxu0 %v3369_v5 }
 0x1f1   : > { %v843_v14 = vadd.f32 %v3022_v46, %v3813_v45  ;;  %3051 = vmatprep.mubr.msk.bf16.mxu0 %vm1038_vm1, %v1008_v11  ;;  %v934_v20 = vmax.f32 %v832_v13, 0.0 }
 0x1f2   : > { %v834_v16 = vpop.f32.mrf.mxu1  ;;  %3052 = vmatmul.mubr.msk.bf16.gmra.mxu0 %vm1038_vm1, %v1009_v12 }
 0x1f3   : > { %v835_v17 = vadd.f32 %v3813_v45, %v834_v16  ;;  %3132 = vmatpush3.bf16.msra.mxu0 %v3369_v5  ;;  %v937_v18 = vmax.f32 %v843_v14, 0.0 }
 0x1f4   : > { %v3025_v19 = vpop.f32.mrf.mxu1  ;;  %3133 = vmatprep.subr.bf16.mxu0 %v3370_v55 }
 0x1f5   : > { %v935_v21 = vmax.f32 %v835_v17, 0.0  ;;  %v1011_v24 = vpack.c.bf16 %v937_v18, %v936_v22  ;;  %v856_v28 = vadd.f32 %v3025_v19, %v3813_v45 }
 0x1f6   : > { %v847_v23 = vpop.f32.mrf.mxu1 }
 0x1f7   : > { %v1010_v35 = vpack.c.bf16 %v935_v21, %v934_v20  ;;  %3134 = vmatpush3.bf16.msra.mxu0 %v3370_v55  ;;  %v848_v26 = vadd.f32 %v3813_v45, %v847_v23  ;;  %v940_v38 = vmax.f32 %v856_v28, 0.0 }
 0x1f8   : > { %v3026_v25 = vpop.f32.mrf.mxu1  ;;  %3135 = vmatprep.subr.bf16.mxu0 %v3371_v9 }
 0x1f9   : > { %v859_v27 = vadd.f32 %v3026_v25, %v3813_v45  ;;  %3055 = vmatprep.mubr.msk.bf16.mxu0 %vm1038_vm1, %v1010_v35  ;;  %v938_v36 = vmax.f32 %v848_v26, 0.0 }
 0x1fa   : > { %v850_v29 = vpop.f32.mrf.mxu1  ;;  %3056 = vmatmul.mubr.msk.bf16.gmra.mxu0 %vm1038_vm1, %v1011_v24 }
 0x1fb   : > { %v851_v30 = vadd.f32 %v3813_v45, %v850_v29  ;;  %3136 = vmatpush3.bf16.msra.mxu0 %v3371_v9  ;;  %v941_v31 = vmax.f32 %v859_v27, 0.0 }
 0x1fc   : > { %v3029_v33 = vpop.f32.mrf.mxu1 }
 0x1fd   : > { %v939_v34 = vmax.f32 %v851_v30, 0.0  ;;  %v1013_v41 = vpack.c.bf16 %v941_v31, %v940_v38  ;;  %v872_v47 = vadd.f32 %v3029_v33, %v3813_v45  ;;  %v3372_v30 = vld [vmem:[%s4212_s2 + $0xb0] sm:$0xff]   ;;  %v3375_v38 = vld [vmem:[%s4212_s2 + $0xf8] sm:$0xff]  }
 0x1fe   : > { %v863_v39 = vpop.f32.mrf.mxu1  ;;  %3137 = vmatprep.subr.bf16.mxu0 %v3372_v30 }
 0x1ff   : > { %v1012_v40 = vpack.c.bf16 %v939_v34, %v938_v36  ;;  %v864_v43 = vadd.f32 %v3813_v45, %v863_v39  ;;  %v944_v56 = vmax.f32 %v872_v47, 0.0  ;;  %3138 = vmatpush3.bf16.msra.mxu0 %v3372_v30  ;;  %v3374_v36 = vld [vmem:[%s4212_s2 + $0x100] sm:$0xff]  }
 0x200   : > { %v3030_v42 = vpop.f32.mrf.mxu1 }
 0x201   : > { %v875_v44 = vadd.f32 %v3030_v42, %v3813_v45  ;;  %3059 = vmatprep.mubr.msk.bf16.mxu0 %vm1038_vm1, %v1012_v40  ;;  %v942_v53 = vmax.f32 %v864_v43, 0.0  ;;  %v3376_v40 = vld [vmem:[%s4212_s2 + $0xf0] sm:$0xff]   ;;  %v3377_v42 = vld [vmem:[%s4212_s2 + $0xe8] sm:$0xff]  }
 0x202   : > { %v866_v48 = vpop.f32.mrf.mxu1  ;;  %3060 = vmatmul.mubr.msk.bf16.gmra.mxu0 %vm1038_vm1, %v1013_v41 }
 0x203   : > { %v867_v49 = vadd.f32 %v3813_v45, %v866_v48  ;;  %v945_v50 = vmax.f32 %v875_v44, 0.0 }
 0x204   : > { %v3033_v52 = vpop.f32.mrf.mxu1 }
 0x205   : > { %v943_v54 = vmax.f32 %v867_v49, 0.0  ;;  %v1015_v51 = vpack.c.bf16 %v945_v50, %v944_v56  ;;  %v888_v62 = vadd.f32 %v3033_v52, %v3813_v45 }
 0x206   : > { %v879_v57 = vpop.f32.mrf.mxu1 }
 0x207   : > { %v1014_v58 = vpack.c.bf16 %v943_v54, %v942_v53  ;;  %v880_v60 = vadd.f32 %v3813_v45, %v879_v57  ;;  %v948_v3 = vmax.f32 %v888_v62, 0.0 }
 0x208   : > { %v3034_v59 = vpop.f32.mrf.mxu1 }
 0x209   : > { %v891_v61 = vadd.f32 %v3034_v59, %v3813_v45  ;;  %3063 = vmatprep.mubr.msk.bf16.mxu0 %vm1038_vm1, %v1014_v58  ;;  %v946_v1 = vmax.f32 %v880_v60, 0.0 }
 0x20a   : > { %v882_v32 = vpop.f32.mrf.mxu1  ;;  %3064 = vmatmul.mubr.msk.bf16.gmra.mxu0 %vm1038_vm1, %v1015_v51 }
 0x20b   : > { %v883_v63 = vadd.f32 %v3813_v45, %v882_v32  ;;  %v949_v37 = vmax.f32 %v891_v61, 0.0  ;;  %v3906_v32 = vld [vmem:[%s4213_s3 + $0x2] ss:$0 sm:$0xff] }
 0x20c   : > { %v3037_v0 = vpop.f32.mrf.mxu1 }
 0x20d   : > { %v947_v2 = vmax.f32 %v883_v63, 0.0  ;;  %v1017_v6 = vpack.c.bf16 %v949_v37, %v948_v3  ;;  %v904_v11 = vadd.f32 %v3037_v0, %v3813_v45 }
 0x20e   : > { %v895_v4 = vpop.f32.mrf.mxu1 }
 0x20f   : > { %v1016_v5 = vpack.c.bf16 %v947_v2, %v946_v1  ;;  %v896_v8 = vadd.f32 %v3813_v45, %v895_v4  ;;  %v952_v16 = vmax.f32 %v904_v11, 0.0 }
 0x210   : > { %v3038_v7 = vpop.f32.mrf.mxu1 }
 0x211   : > { %v907_v10 = vadd.f32 %v3038_v7, %v3813_v45  ;;  %3067 = vmatprep.mubr.msk.bf16.mxu0 %vm1038_vm1, %v1016_v5  ;;  %v950_v14 = vmax.f32 %v896_v8, 0.0 }
 0x212   : > { %v898_v12 = vpop.f32.mrf.mxu1  ;;  %3068 = vmatmul.mubr.msk.bf16.gmra.mxu0 %vm1038_vm1, %v1017_v6 }
 0x213   : > { %v899_v46 = vadd.f32 %v3813_v45, %v898_v12  ;;  %v953_v55 = vmax.f32 %v907_v10, 0.0 }
 0x214   : > { %v3041_v13 = vpop.f32.mrf.mxu1 }
 0x215   : > { %v951_v15 = vmax.f32 %v899_v46, 0.0  ;;  %v1019_v19 = vpack.c.bf16 %v953_v55, %v952_v16  ;;  %v920_v22 = vadd.f32 %v3041_v13, %v3813_v45 }
 0x216   : > { %v911_v17 = vpop.f32.mrf.mxu1 }
 0x217   : > { %v1018_v18 = vpack.c.bf16 %v951_v15, %v950_v14  ;;  %v912_v20 = vadd.f32 %v3813_v45, %v911_v17  ;;  %v956_v27 = vmax.f32 %v920_v22, 0.0 }
 0x218   : > { %v3042_v9 = vpop.f32.mrf.mxu1 }
 0x219   : > { %v923_v21 = vadd.f32 %v3042_v9, %v3813_v45  ;;  %3071 = vmatprep.mubr.msk.bf16.mxu0 %vm1038_vm1, %v1018_v18  ;;  %v954_v25 = vmax.f32 %v912_v20, 0.0 }
 0x21a   : > { %v914_v23 = vpop.f32.mrf.mxu1  ;;  %3072 = vmatmul.mubr.msk.bf16.gmra.mxu0 %vm1038_vm1, %v1019_v19 }
 0x21b   : > { %v915_v35 = vadd.f32 %v3813_v45, %v914_v23  ;;  %v957_v24 = vmax.f32 %v923_v21, 0.0  ;;  %v3373_v45 = vld [vmem:[%s4212_s2 + $0x108] sm:$0xff]  }
 0x21c   : > { %v3097_v31 = vpop.f32.mrf.mxu1  ;;  %3171 = vmatprep.subr.bf16.mxu1 %v3373_v45 }
 0x21d   : > { %v955_v26 = vmax.f32 %v915_v35, 0.0  ;;  %v1021_v29 = vpack.c.bf16 %v957_v24, %v956_v27  ;;  %3172 = vmatpush3.bf16.msra.mxu1 %v3373_v45 }
 0x21e   : > { %v1426_v33 = vpop.f32.mrf.mxu1  ;;  %3173 = vmatprep.subr.bf16.mxu1 %v3374_v36 }
 0x21f   : > { %v1020_v28 = vpack.c.bf16 %v955_v26, %v954_v25 }
 0x220   : > { %v3098_v34 = vpop.f32.mrf.mxu1 }
 0x221   : > { %3075 = vmatprep.mubr.msk.bf16.mxu0 %vm1038_vm1, %v1020_v28  ;;  %3174 = vmatpush3.bf16.msra.mxu1 %v3374_v36 }
 0x222   : > { %3076 = vmatmul.mubr.msk.bf16.gmra.mxu0 %vm1038_vm1, %v1021_v29  ;;  %v1429_v39 = vpop.f32.mrf.mxu1  ;;  %3175 = vmatprep.subr.bf16.mxu1 %v3375_v38 }
 0x224   : > { %v3101_v41 = vpop.f32.mrf.mxu1 }
 0x225   : > { %3176 = vmatpush3.bf16.msra.mxu1 %v3375_v38 }
 0x226   : > { %3177 = vmatprep.subr.bf16.mxu1 %v3376_v40  ;;  %v1442_v43 = vpop.f32.mrf.mxu1 }
 0x228   : > { %v3102_v44 = vpop.f32.mrf.mxu1 }
 0x229   : > { %3178 = vmatpush3.bf16.msra.mxu1 %v3376_v40 }
 0x22a   : > { %3179 = vmatprep.subr.bf16.mxu1 %v3377_v42  ;;  %v1445_v47 = vpop.f32.mrf.mxu1 }
 0x22c   : > { %v3105_v48 = vpop.f32.mrf.mxu1 }
 0x22d   : > { %3180 = vmatpush3.bf16.msra.mxu1 %v3377_v42 }
 0x22e   : > { %v1458_v49 = vpop.f32.mrf.mxu1 }
 0x230   : > { %v3106_v50 = vpop.f32.mrf.mxu1 }
 0x232   : > { %v1461_v52 = vpop.f32.mrf.mxu1 }
 0x234   : > { %v3893_v53 = vpop.f32.mrf.mxu1 }
 0x236   : > { %v3895_v54 = vpop.f32.mrf.mxu1 }
 0x238   : > { %v3897_v56 = vpop.f32.mrf.mxu1 }
 0x23a   : > { %v3899_v57 = vpop.f32.mrf.mxu1 }
 0x23c   : > { %v3901_v59 = vpop.f32.mrf.mxu1 }
 0x23e   : > { %v3908_v0 = vpop.f32.mrf.mxu1 }
 0x240   : > { %v3914_v10 = vpop.f32.mrf.mxu1 }
 0x242   : > { %v3916_v19 = vpop.f32.mrf.mxu1 }
 0x244   : > { %v3924_v26 = vpop.f32.mrf.mxu1 }
 0x2aa   : > { %v3049_v58 = vpop.f32.mrf.mxu0 }
 0x2ab   : > { %v1435_v61 = vadd.f32 %v3097_v31, %v3049_v58 }
 0x2ac   : > { %v1121_v51 = vpop.f32.mrf.mxu0 }
 0x2ad   : > { %v1427_v60 = vadd.f32 %v1426_v33, %v1121_v51  ;;  %v1560_v4 = vadd.f32 %v3906_v32, %v1435_v61 }
 0x2ae   : > { %v3050_v62 = vpop.f32.mrf.mxu0 }
 0x2af   : > { %v1438_v63 = vadd.f32 %v3098_v34, %v3050_v62  ;;  %v1558_v1 = vadd.f32 %v3906_v32, %v1427_v60  ;;  %v1592_v55 = vmax.f32 %v1560_v4, 0.0 }
 0x2b0   : > { %v1124_v37 = vpop.f32.mrf.mxu0 }
 0x2b1   : > { %v1561_v2 = vadd.f32 %v3906_v32, %v1438_v63  ;;  %v1430_v3 = vadd.f32 %v1429_v39, %v1124_v37  ;;  %v1590_v11 = vmax.f32 %v1558_v1, 0.0  ;;  %v1506_v39 = vpop.f32.mrf.mxu1 }
 0x2b2   : > { %v3053_v5 = vpop.f32.mrf.mxu0 }
 0x2b3   : > { %v1559_v6 = vadd.f32 %v3906_v32, %v1430_v3  ;;  %v1593_v7 = vmax.f32 %v1561_v2, 0.0  ;;  %v1451_v13 = vadd.f32 %v3101_v41, %v3053_v5 }
 0x2b4   : > { %v1137_v8 = vpop.f32.mrf.mxu0 }
 0x2b5   : > { %v1591_v12 = vmax.f32 %v1559_v6, 0.0  ;;  %v1443_v46 = vadd.f32 %v1442_v43, %v1137_v8  ;;  %v1623_v17 = vpack.c.bf16 %v1593_v7, %v1592_v55  ;;  %v1564_v22 = vadd.f32 %v3906_v32, %v1451_v13 }
 0x2b6   : > { %v3054_v14 = vpop.f32.mrf.mxu0 }
 0x2b7   : > { %v1622_v15 = vpack.c.bf16 %v1591_v12, %v1590_v11  ;;  %v1454_v16 = vadd.f32 %v3102_v44, %v3054_v14  ;;  %v1562_v9 = vadd.f32 %v3906_v32, %v1443_v46  ;;  %v1596_v30 = vmax.f32 %v1564_v22, 0.0 }
 0x2b8   : > { %v1140_v18 = vpop.f32.mrf.mxu0 }
 0x2b9   : > { %v1565_v20 = vadd.f32 %v3906_v32, %v1454_v16  ;;  %v1446_v21 = vadd.f32 %v1445_v47, %v1140_v18  ;;  %3139 = vmatprep.mubr.msk.bf16.mxu0 %vm406_vm0, %v1622_v15  ;;  %v1594_v27 = vmax.f32 %v1562_v9, 0.0 }
 0x2ba   : > { %v3057_v23 = vpop.f32.mrf.mxu0  ;;  %3140 = vmatmul.mubr.msk.bf16.vlgmr.msra.gmra.mxu0 %vm406_vm0, %v1623_v17 }
 0x2bb   : > { %v1563_v35 = vadd.f32 %v3906_v32, %v1446_v21  ;;  %v1597_v24 = vmax.f32 %v1565_v20, 0.0  ;;  %v1467_v31 = vadd.f32 %v3105_v48, %v3057_v23 }
 0x2bc   : > { %v1153_v25 = vpop.f32.mrf.mxu0 }
 0x2bd   : > { %v1595_v28 = vmax.f32 %v1563_v35, 0.0  ;;  %v1459_v29 = vadd.f32 %v1458_v49, %v1153_v25  ;;  %v1625_v34 = vpack.c.bf16 %v1597_v24, %v1596_v30  ;;  %v1568_v43 = vadd.f32 %v3906_v32, %v1467_v31 }
 0x2be   : > { %v3058_v33 = vpop.f32.mrf.mxu0 }
 0x2bf   : > { %v1624_v45 = vpack.c.bf16 %v1595_v28, %v1594_v27  ;;  %v1470_v36 = vadd.f32 %v3106_v50, %v3058_v33  ;;  %v1566_v40 = vadd.f32 %v3906_v32, %v1459_v29  ;;  %v3118_v50 = vpop.f32.mrf.mxu1  ;;  %v1600_v61 = vmax.f32 %v1568_v43, 0.0 }
 0x2c0   : > { %v1156_v38 = vpop.f32.mrf.mxu0 }
 0x2c1   : > { %v1569_v41 = vadd.f32 %v3906_v32, %v1470_v36  ;;  %v1462_v42 = vadd.f32 %v1461_v52, %v1156_v38  ;;  %3143 = vmatprep.mubr.msk.bf16.mxu0 %vm406_vm0, %v1624_v45  ;;  %v1598_v58 = vmax.f32 %v1566_v40, 0.0  ;;  %v1509_v3 = vpop.f32.mrf.mxu1 }
 0x2c2   : > { %v3061_v44 = vpop.f32.mrf.mxu0  ;;  %3144 = vmatmul.mubr.msk.bf16.gmra.mxu0 %vm406_vm0, %v1625_v34 }
 0x2c3   : > { %v1567_v47 = vadd.f32 %v3906_v32, %v1462_v42  ;;  %v1601_v48 = vmax.f32 %v1569_v41, 0.0  ;;  %v1483_v62 = vadd.f32 %v3893_v53, %v3061_v44  ;;  %v3121_v11 = vpop.f32.mrf.mxu1 }
 0x2c4   : > { %v1169_v49 = vpop.f32.mrf.mxu0 }
 0x2c5   : > { %v1599_v51 = vmax.f32 %v1567_v47, 0.0  ;;  %v1475_v60 = vadd.f32 %v3895_v54, %v1169_v49  ;;  %v1627_v1 = vpack.c.bf16 %v1601_v48, %v1600_v61  ;;  %v1572_v54 = vadd.f32 %v3906_v32, %v1483_v62  ;;  %v1522_v9 = vpop.f32.mrf.mxu1 }
 0x2c6   : > { %v3062_v52 = vpop.f32.mrf.mxu0 }
 0x2c7   : > { %v1626_v63 = vpack.c.bf16 %v1599_v51, %v1598_v58  ;;  %v1486_v37 = vadd.f32 %v3897_v56, %v3062_v52  ;;  %v1570_v4 = vadd.f32 %v3906_v32, %v1475_v60  ;;  %v1604_v13 = vmax.f32 %v1572_v54, 0.0  ;;  %v3122_v24 = vpop.f32.mrf.mxu1 }
 0x2c8   : > { %v1172_v2 = vpop.f32.mrf.mxu0 }
 0x2c9   : > { %v1573_v5 = vadd.f32 %v3906_v32, %v1486_v37  ;;  %v1478_v6 = vadd.f32 %v3899_v57, %v1172_v2  ;;  %3147 = vmatprep.mubr.msk.bf16.mxu0 %vm406_vm0, %v1626_v63  ;;  %v1602_v12 = vmax.f32 %v1570_v4, 0.0  ;;  %v1525_v34 = vpop.f32.mrf.mxu1 }
 0x2ca   : > { %v3065_v7 = vpop.f32.mrf.mxu0  ;;  %3148 = vmatmul.mubr.msk.bf16.gmra.mxu0 %vm406_vm0, %v1627_v1 }
 0x2cb   : > { %v1571_v53 = vadd.f32 %v3906_v32, %v1478_v6  ;;  %v1605_v8 = vmax.f32 %v1573_v5, 0.0  ;;  %v1499_v14 = vadd.f32 %v3901_v59, %v3065_v7  ;;  %v3125_v47 = vpop.f32.mrf.mxu1 }
 0x2cc   : > { %v1185_v56 = vpop.f32.mrf.mxu0 }
 0x2cd   : > { %v1603_v46 = vmax.f32 %v1571_v53, 0.0  ;;  %v1491_v55 = vadd.f32 %v3908_v0, %v1185_v56  ;;  %v1629_v17 = vpack.c.bf16 %v1605_v8, %v1604_v13  ;;  %v1576_v0 = vadd.f32 %v3906_v32, %v1499_v14  ;;  %v1538_v63 = vpop.f32.mrf.mxu1 }
 0x2ce   : > { %v3066_v57 = vpop.f32.mrf.mxu0 }
 0x2cf   : > { %v1628_v15 = vpack.c.bf16 %v1603_v46, %v1602_v12  ;;  %v1502_v16 = vadd.f32 %v3914_v10, %v3066_v57  ;;  %v1574_v20 = vadd.f32 %v3906_v32, %v1491_v55  ;;  %v1608_v29 = vmax.f32 %v1576_v0, 0.0  ;;  %v3126_v7 = vpop.f32.mrf.mxu1 }
 0x2d0   : > { %v1188_v18 = vpop.f32.mrf.mxu0 }
 0x2d1   : > { %v1577_v21 = vadd.f32 %v3906_v32, %v1502_v16  ;;  %v1494_v22 = vadd.f32 %v3916_v19, %v1188_v18  ;;  %3151 = vmatprep.mubr.msk.bf16.mxu0 %vm406_vm0, %v1628_v15  ;;  %v1606_v25 = vmax.f32 %v1574_v20, 0.0  ;;  %v1541_v15 = vpop.f32.mrf.mxu1 }
 0x2d2   : > { %v3069_v23 = vpop.f32.mrf.mxu0  ;;  %3152 = vmatmul.mubr.msk.bf16.gmra.mxu0 %vm406_vm0, %v1629_v17 }
 0x2d3   : > { %v1575_v59 = vadd.f32 %v3906_v32, %v1494_v22  ;;  %v1609_v35 = vmax.f32 %v1577_v21, 0.0  ;;  %v1515_v30 = vadd.f32 %v3924_v26, %v3069_v23 }
 0x2d4   : > { %v1201_v10 = vpop.f32.mrf.mxu0 }
 0x2d5   : > { %v1607_v27 = vmax.f32 %v1575_v59, 0.0  ;;  %v1507_v28 = vadd.f32 %v1506_v39, %v1201_v10  ;;  %v1631_v45 = vpack.c.bf16 %v1609_v35, %v1608_v29  ;;  %v1580_v42 = vadd.f32 %v3906_v32, %v1515_v30  ;;  %v3985_v30 = vld [vmem:[%s4213_s3 + $0x3] ss:$0 sm:$0xff] }
 0x2d6   : > { %v3070_v31 = vpop.f32.mrf.mxu0 }
 0x2d7   : > { %v1630_v19 = vpack.c.bf16 %v1607_v27, %v1606_v25  ;;  %v1518_v33 = vadd.f32 %v3118_v50, %v3070_v31  ;;  %v1578_v38 = vadd.f32 %v3906_v32, %v1507_v28  ;;  %v1612_v58 = vmax.f32 %v1580_v42, 0.0  ;;  %v3380_v25 = vld [vmem:[%s4212_s2 + $0x110] sm:$0xff]  }
 0x2d8   : > { %v1204_v36 = vpop.f32.mrf.mxu0 }
 0x2d9   : > { %v1581_v40 = vadd.f32 %v3906_v32, %v1518_v33  ;;  %v1510_v41 = vadd.f32 %v1509_v3, %v1204_v36  ;;  %3155 = vmatprep.mubr.msk.bf16.mxu0 %vm406_vm0, %v1630_v19  ;;  %v1610_v48 = vmax.f32 %v1578_v38, 0.0 }
 0x2da   : > { %v3073_v43 = vpop.f32.mrf.mxu0  ;;  %3156 = vmatmul.mubr.msk.bf16.gmra.mxu0 %vm406_vm0, %v1631_v45 }
 0x2db   : > { %v1579_v26 = vadd.f32 %v3906_v32, %v1510_v41  ;;  %v1613_v39 = vmax.f32 %v1581_v40, 0.0  ;;  %v1531_v51 = vadd.f32 %v3121_v11, %v3073_v43 }
 0x2dc   : > { %v1217_v44 = vpop.f32.mrf.mxu0 }
 0x2dd   : > { %v1611_v49 = vmax.f32 %v1579_v26, 0.0  ;;  %v1523_v50 = vadd.f32 %v1522_v9, %v1217_v44  ;;  %v1633_v52 = vpack.c.bf16 %v1613_v39, %v1612_v58  ;;  %v1584_v4 = vadd.f32 %v3906_v32, %v1531_v51 }
 0x2de   : > { %v3074_v60 = vpop.f32.mrf.mxu0 }
 0x2df   : > { %v1632_v61 = vpack.c.bf16 %v1611_v49, %v1610_v48  ;;  %v1534_v62 = vadd.f32 %v3122_v24, %v3074_v60  ;;  %v1582_v1 = vadd.f32 %v3906_v32, %v1523_v50  ;;  %v1616_v12 = vmax.f32 %v1584_v4, 0.0  ;;  %v3378_v24 = vld [vmem:[%s4212_s2 + $0xe0] sm:$0xff]  }
 0x2e0   : > { %v1220_v37 = vpop.f32.mrf.mxu0  ;;  %3181 = vmatprep.subr.bf16.mxu1 %v3378_v24 }
 0x2e1   : > { %v1585_v2 = vadd.f32 %v3906_v32, %v1534_v62  ;;  %v1526_v3 = vadd.f32 %v1525_v34, %v1220_v37  ;;  %3159 = vmatprep.mubr.msk.bf16.mxu0 %vm406_vm0, %v1632_v61  ;;  %v1614_v8 = vmax.f32 %v1582_v1, 0.0  ;;  %3182 = vmatpush3.bf16.msra.mxu1 %v3378_v24 }
 0x2e2   : > { %v3077_v5 = vpop.f32.mrf.mxu0  ;;  %3160 = vmatmul.mubr.msk.bf16.gmra.mxu0 %vm406_vm0, %v1633_v52 }
 0x2e3   : > { %v1583_v6 = vadd.f32 %v3906_v32, %v1526_v3  ;;  %v1617_v54 = vmax.f32 %v1585_v2, 0.0  ;;  %v1547_v46 = vadd.f32 %v3125_v47, %v3077_v5 }
 0x2e4   : > { %v1233_v53 = vpop.f32.mrf.mxu0 }
 0x2e5   : > { %v1615_v56 = vmax.f32 %v1583_v6, 0.0  ;;  %v1539_v11 = vadd.f32 %v1538_v63, %v1233_v53  ;;  %v1635_v57 = vpack.c.bf16 %v1617_v54, %v1616_v12  ;;  %v1588_v20 = vadd.f32 %v3906_v32, %v1547_v46 }
 0x2e6   : > { %v3078_v55 = vpop.f32.mrf.mxu0 }
 0x2e7   : > { %v1634_v13 = vpack.c.bf16 %v1615_v56, %v1614_v8  ;;  %v1550_v14 = vadd.f32 %v3126_v7, %v3078_v55  ;;  %v1586_v17 = vadd.f32 %v3906_v32, %v1539_v11  ;;  %v1620_v59 = vmax.f32 %v1588_v20, 0.0 }
 0x2e8   : > { %v1236_v16 = vpop.f32.mrf.mxu0 }
 0x2e9   : > { %v1589_v18 = vadd.f32 %v3906_v32, %v1550_v14  ;;  %v1542_v9 = vadd.f32 %v1541_v15, %v1236_v16  ;;  %3163 = vmatprep.mubr.msk.bf16.mxu0 %vm406_vm0, %v1634_v13  ;;  %v1618_v0 = vmax.f32 %v1586_v17, 0.0 }
 0x2ea   : > { %3164 = vmatmul.mubr.msk.bf16.gmra.mxu0 %vm406_vm0, %v1635_v57 }
 0x2eb   : > { %v1587_v21 = vadd.f32 %v3906_v32, %v1542_v9  ;;  %v1621_v22 = vmax.f32 %v1589_v18, 0.0  ;;  %v3379_v32 = vld [vmem:[%s4212_s2 + $0x118] sm:$0xff]  }
 0x2ec   : > { %3215 = vmatprep.subr.bf16.mxu0 %v3379_v32 }
 0x2ed   : > { %v1619_v23 = vmax.f32 %v1587_v21, 0.0  ;;  %v1637_v10 = vpack.c.bf16 %v1621_v22, %v1620_v59  ;;  %3216 = vmatpush3.bf16.msra.mxu0 %v3379_v32 }
 0x2ee   : > { %3217 = vmatprep.subr.bf16.mxu0 %v3380_v25 }
 0x2ef   : > { %v1636_v35 = vpack.c.bf16 %v1619_v23, %v1618_v0 }
 0x2f1   : > { %3167 = vmatprep.mubr.msk.bf16.mxu0 %vm406_vm0, %v1636_v35  ;;  %3218 = vmatpush3.bf16.msra.mxu0 %v3380_v25 }
 0x2f2   : > { %3168 = vmatmul.mubr.msk.bf16.gmra.mxu0 %vm406_vm0, %v1637_v10 }
 0x37a   : > { %v3141_v27 = vpop.f32.mrf.mxu0 }
 0x37b   : > { %v1782_v36 = vadd.f32 %v3141_v27, %v3985_v30 }
 0x37c   : > { %v1773_v28 = vpop.f32.mrf.mxu0 }
 0x37d   : > { %v1774_v33 = vadd.f32 %v3985_v30, %v1773_v28 }
 0x37e   : > { %v3142_v29 = vpop.f32.mrf.mxu0 }
 0x37f   : > { %v1785_v31 = vadd.f32 %v3142_v29, %v3985_v30 }
 0x380   : > { %v1776_v19 = vpop.f32.mrf.mxu0 }
 0x381   : > { %v1777_v45 = vadd.f32 %v3985_v30, %v1776_v19  ;;  %v1901_v40 = vpack.c.bf16 %v1785_v31, %v1782_v36 }
 0x382   : > { %v3145_v34 = vpop.f32.mrf.mxu0 }
 0x383   : > { %v1900_v38 = vpack.c.bf16 %v1777_v45, %v1774_v33  ;;  %v1798_v47 = vadd.f32 %v3145_v34, %v3985_v30 }
 0x384   : > { %v1789_v41 = vpop.f32.mrf.mxu0 }
 0x385   : > { %3183 = vmatprep.mubr.msk.bf16.mxu1 %vm406_vm0, %v1900_v38  ;;  %v1790_v39 = vadd.f32 %v3985_v30, %v1789_v41 }
 0x386   : > { %v3146_v42 = vpop.f32.mrf.mxu0  ;;  %3184 = vmatmul.mubr.msk.bf16.vlgmr.msra.gmra.mxu1 %vm406_vm0, %v1901_v40 }
 0x387   : > { %v1801_v43 = vadd.f32 %v3146_v42, %v3985_v30 }
 0x388   : > { %v1792_v26 = vpop.f32.mrf.mxu0 }
 0x389   : > { %v1793_v44 = vadd.f32 %v3985_v30, %v1792_v26  ;;  %v1903_v50 = vpack.c.bf16 %v1801_v43, %v1798_v47 }
 0x38a   : > { %v3149_v48 = vpop.f32.mrf.mxu0 }
 0x38b   : > { %v1902_v49 = vpack.c.bf16 %v1793_v44, %v1790_v39  ;;  %v1814_v63 = vadd.f32 %v3149_v48, %v3985_v30 }
 0x38c   : > { %v1805_v58 = vpop.f32.mrf.mxu0 }
 0x38d   : > { %3187 = vmatprep.mubr.msk.bf16.mxu1 %vm406_vm0, %v1902_v49  ;;  %v1806_v62 = vadd.f32 %v3985_v30, %v1805_v58  ;;  %v4038_v49 = vld [vmem:[%s4213_s3 + $0x4] ss:$0 sm:$0xff] }
 0x38e   : > { %v3150_v51 = vpop.f32.mrf.mxu0  ;;  %3188 = vmatmul.mubr.msk.bf16.gmra.mxu1 %vm406_vm0, %v1903_v50 }
 0x38f   : > { %v1817_v60 = vadd.f32 %v3150_v51, %v3985_v30 }
 0x390   : > { %v1808_v61 = vpop.f32.mrf.mxu0 }
 0x391   : > { %v1809_v52 = vadd.f32 %v3985_v30, %v1808_v61  ;;  %v1905_v2 = vpack.c.bf16 %v1817_v60, %v1814_v63 }
 0x392   : > { %v3153_v37 = vpop.f32.mrf.mxu0 }
 0x393   : > { %v1904_v1 = vpack.c.bf16 %v1809_v52, %v1806_v62  ;;  %v1830_v53 = vadd.f32 %v3153_v37, %v3985_v30 }
 0x394   : > { %v1821_v3 = vpop.f32.mrf.mxu0 }
 0x395   : > { %3191 = vmatprep.mubr.msk.bf16.mxu1 %vm406_vm0, %v1904_v1  ;;  %v1822_v54 = vadd.f32 %v3985_v30, %v1821_v3 }
 0x396   : > { %v3154_v4 = vpop.f32.mrf.mxu0  ;;  %3192 = vmatmul.mubr.msk.bf16.gmra.mxu1 %vm406_vm0, %v1905_v2 }
 0x397   : > { %v1833_v5 = vadd.f32 %v3154_v4, %v3985_v30 }
 0x398   : > { %v1824_v6 = vpop.f32.mrf.mxu0 }
 0x399   : > { %v1825_v7 = vadd.f32 %v3985_v30, %v1824_v6  ;;  %v1907_v11 = vpack.c.bf16 %v1833_v5, %v1830_v53 }
 0x39a   : > { %v3157_v8 = vpop.f32.mrf.mxu0 }
 0x39b   : > { %v1906_v56 = vpack.c.bf16 %v1825_v7, %v1822_v54  ;;  %v1846_v15 = vadd.f32 %v3157_v8, %v3985_v30 }
 0x39c   : > { %v1837_v12 = vpop.f32.mrf.mxu0 }
 0x39d   : > { %3195 = vmatprep.mubr.msk.bf16.mxu1 %vm406_vm0, %v1906_v56  ;;  %v1838_v14 = vadd.f32 %v3985_v30, %v1837_v12 }
 0x39e   : > { %v3158_v46 = vpop.f32.mrf.mxu0  ;;  %3196 = vmatmul.mubr.msk.bf16.gmra.mxu1 %vm406_vm0, %v1907_v11 }
 0x39f   : > { %v1849_v55 = vadd.f32 %v3158_v46, %v3985_v30 }
 0x3a0   : > { %v1840_v13 = vpop.f32.mrf.mxu0 }
 0x3a1   : > { %v1841_v57 = vadd.f32 %v3985_v30, %v1840_v13  ;;  %v1909_v18 = vpack.c.bf16 %v1849_v55, %v1846_v15 }
 0x3a2   : > { %v3161_v16 = vpop.f32.mrf.mxu0 }
 0x3a3   : > { %v1908_v17 = vpack.c.bf16 %v1841_v57, %v1838_v14  ;;  %v1862_v59 = vadd.f32 %v3161_v16, %v3985_v30 }
 0x3a4   : > { %v1853_v9 = vpop.f32.mrf.mxu0 }
 0x3a5   : > { %3199 = vmatprep.mubr.msk.bf16.mxu1 %vm406_vm0, %v1908_v17  ;;  %v1854_v0 = vadd.f32 %v3985_v30, %v1853_v9 }
 0x3a6   : > { %v3162_v20 = vpop.f32.mrf.mxu0  ;;  %3200 = vmatmul.mubr.msk.bf16.gmra.mxu1 %vm406_vm0, %v1909_v18 }
 0x3a7   : > { %v1865_v21 = vadd.f32 %v3162_v20, %v3985_v30 }
 0x3a8   : > { %v1856_v22 = vpop.f32.mrf.mxu0 }
 0x3a9   : > { %v1857_v23 = vadd.f32 %v3985_v30, %v1856_v22  ;;  %v1911_v24 = vpack.c.bf16 %v1865_v21, %v1862_v59 }
 0x3aa   : > { %v3165_v35 = vpop.f32.mrf.mxu0 }
 0x3ab   : > { %v1910_v10 = vpack.c.bf16 %v1857_v23, %v1854_v0  ;;  %v1878_v19 = vadd.f32 %v3165_v35, %v3985_v30 }
 0x3ac   : > { %v1869_v32 = vpop.f32.mrf.mxu0 }
 0x3ad   : > { %3203 = vmatprep.mubr.msk.bf16.mxu1 %vm406_vm0, %v1910_v10  ;;  %v1870_v29 = vadd.f32 %v3985_v30, %v1869_v32 }
 0x3ae   : > { %v3166_v25 = vpop.f32.mrf.mxu0  ;;  %3204 = vmatmul.mubr.msk.bf16.gmra.mxu1 %vm406_vm0, %v1911_v24 }
 0x3af   : > { %v1881_v27 = vadd.f32 %v3166_v25, %v3985_v30 }
 0x3b0   : > { %v1872_v28 = vpop.f32.mrf.mxu0 }
 0x3b1   : > { %v1873_v31 = vadd.f32 %v3985_v30, %v1872_v28  ;;  %v1913_v36 = vpack.c.bf16 %v1881_v27, %v1878_v19 }
 0x3b2   : > { %v3169_v33 = vpop.f32.mrf.mxu0 }
 0x3b3   : > { %v1912_v45 = vpack.c.bf16 %v1873_v31, %v1870_v29  ;;  %v1894_v26 = vadd.f32 %v3169_v33, %v3985_v30 }
 0x3b4   : > { %v1885_v34 = vpop.f32.mrf.mxu0 }
 0x3b5   : > { %3207 = vmatprep.mubr.msk.bf16.mxu1 %vm406_vm0, %v1912_v45  ;;  %v1886_v42 = vadd.f32 %v3985_v30, %v1885_v34 }
 0x3b6   : > { %v3170_v38 = vpop.f32.mrf.mxu0  ;;  %3208 = vmatmul.mubr.msk.bf16.gmra.mxu1 %vm406_vm0, %v1913_v36 }
 0x3b7   : > { %v1897_v40 = vadd.f32 %v3170_v38, %v3985_v30 }
 0x3b8   : > { %v1888_v41 = vpop.f32.mrf.mxu0 }
 0x3b9   : > { %v1889_v43 = vadd.f32 %v3985_v30, %v1888_v41  ;;  %v1915_v44 = vpack.c.bf16 %v1897_v40, %v1894_v26 }
 0x3bb   : > { %v1914_v39 = vpack.c.bf16 %v1889_v43, %v1886_v42 }
 0x3bd   : > { %3211 = vmatprep.mubr.msk.bf16.mxu1 %vm406_vm0, %v1914_v39 }
 0x3be   : > { %3212 = vmatmul.mubr.msk.bf16.gmra.mxu1 %vm406_vm0, %v1915_v44 }
 0x446   : > { %v3185_v47 = vpop.f32.mrf.mxu1 }
 0x447   : > { %v2060_v30 = vadd.f32 %v3185_v47, %v4038_v49 }
 0x448   : > { %v2051_v48 = vpop.f32.mrf.mxu1 }
 0x449   : > { %v2052_v58 = vadd.f32 %v4038_v49, %v2051_v48  ;;  %v2180_v1 = vmax.f32 %v2060_v30, 0.0 }
 0x44a   : > { %v3186_v50 = vpop.f32.mrf.mxu1 }
 0x44b   : > { %v2063_v51 = vadd.f32 %v3186_v50, %v4038_v49  ;;  %v2178_v63 = vmax.f32 %v2052_v58, 0.0 }
 0x44c   : > { %v2054_v60 = vpop.f32.mrf.mxu1 }
 0x44d   : > { %v2055_v61 = vadd.f32 %v4038_v49, %v2054_v60  ;;  %v2181_v62 = vmax.f32 %v2063_v51, 0.0 }
 0x44e   : > { %v3189_v52 = vpop.f32.mrf.mxu1 }
 0x44f   : > { %v2179_v37 = vmax.f32 %v2055_v61, 0.0  ;;  %v2211_v4 = vpack.c.bf16 %v2181_v62, %v2180_v1  ;;  %v2076_v7 = vadd.f32 %v3189_v52, %v4038_v49 }
 0x450   : > { %v2067_v2 = vpop.f32.mrf.mxu1 }
 0x451   : > { %v2210_v3 = vpack.c.bf16 %v2179_v37, %v2178_v63  ;;  %v2068_v6 = vadd.f32 %v4038_v49, %v2067_v2  ;;  %v2184_v55 = vmax.f32 %v2076_v7, 0.0 }
 0x452   : > { %v3190_v5 = vpop.f32.mrf.mxu1 }
 0x453   : > { %v2079_v54 = vadd.f32 %v3190_v5, %v4038_v49  ;;  %3219 = vmatprep.mubr.msk.bf16.mxu0 %vm1038_vm1, %v2210_v3  ;;  %v2182_v12 = vmax.f32 %v2068_v6, 0.0 }
 0x454   : > { %v2070_v53 = vpop.f32.mrf.mxu1  ;;  %3220 = vmatmul.mubr.msk.bf16.vlgmr.msra.gmra.mxu0 %vm1038_vm1, %v2211_v4 }
 0x455   : > { %v2071_v8 = vadd.f32 %v4038_v49, %v2070_v53  ;;  %v2185_v56 = vmax.f32 %v2079_v54, 0.0 }
 0x456   : > { %v3193_v11 = vpop.f32.mrf.mxu1 }
 0x457   : > { %v2183_v46 = vmax.f32 %v2071_v8, 0.0  ;;  %v2213_v57 = vpack.c.bf16 %v2185_v56, %v2184_v55  ;;  %v2092_v18 = vadd.f32 %v3193_v11, %v4038_v49 }
 0x458   : > { %v2083_v13 = vpop.f32.mrf.mxu1 }
 0x459   : > { %v2212_v14 = vpack.c.bf16 %v2183_v46, %v2182_v12  ;;  %v2084_v16 = vadd.f32 %v4038_v49, %v2083_v13  ;;  %v2188_v59 = vmax.f32 %v2092_v18, 0.0 }
 0x45a   : > { %v3194_v15 = vpop.f32.mrf.mxu1 }
 0x45b   : > { %v2095_v17 = vadd.f32 %v3194_v15, %v4038_v49  ;;  %3223 = vmatprep.mubr.msk.bf16.mxu0 %vm1038_vm1, %v2212_v14  ;;  %v2186_v0 = vmax.f32 %v2084_v16, 0.0 }
 0x45c   : > { %v2086_v9 = vpop.f32.mrf.mxu1  ;;  %3224 = vmatmul.mubr.msk.bf16.gmra.mxu0 %vm1038_vm1, %v2213_v57 }
 0x45d   : > { %v2087_v20 = vadd.f32 %v4038_v49, %v2086_v9  ;;  %v2189_v21 = vmax.f32 %v2095_v17, 0.0 }
 0x45e   : > { %v3197_v22 = vpop.f32.mrf.mxu1 }
 0x45f   : > { %v2187_v23 = vmax.f32 %v2087_v20, 0.0  ;;  %v2215_v24 = vpack.c.bf16 %v2189_v21, %v2188_v59  ;;  %v2108_v28 = vadd.f32 %v3197_v22, %v4038_v49 }
 0x460   : > { %v2099_v35 = vpop.f32.mrf.mxu1 }
 0x461   : > { %v2214_v10 = vpack.c.bf16 %v2187_v23, %v2186_v0  ;;  %v2100_v25 = vadd.f32 %v4038_v49, %v2099_v35  ;;  %v2192_v34 = vmax.f32 %v2108_v28, 0.0 }
 0x462   : > { %v3198_v32 = vpop.f32.mrf.mxu1 }
 0x463   : > { %v2111_v27 = vadd.f32 %v3198_v32, %v4038_v49  ;;  %3227 = vmatprep.mubr.msk.bf16.mxu0 %vm1038_vm1, %v2214_v10  ;;  %v2190_v45 = vmax.f32 %v2100_v25, 0.0 }
 0x464   : > { %v2102_v29 = vpop.f32.mrf.mxu1  ;;  %3228 = vmatmul.mubr.msk.bf16.gmra.mxu0 %vm1038_vm1, %v2215_v24 }
 0x465   : > { %v2103_v31 = vadd.f32 %v4038_v49, %v2102_v29  ;;  %v2193_v19 = vmax.f32 %v2111_v27, 0.0 }
 0x466   : > { %v3201_v33 = vpop.f32.mrf.mxu1 }
 0x467   : > { %v2191_v36 = vmax.f32 %v2103_v31, 0.0  ;;  %v2217_v41 = vpack.c.bf16 %v2193_v19, %v2192_v34  ;;  %v2124_v39 = vadd.f32 %v3201_v33, %v4038_v49  ;;  %v4091_v31 = vld [vmem:[%s4213_s3 + $0x5] ss:$0 sm:$0xff] }
 0x468   : > { %v2115_v38 = vpop.f32.mrf.mxu1 }
 0x469   : > { %v2216_v40 = vpack.c.bf16 %v2191_v36, %v2190_v45  ;;  %v2116_v43 = vadd.f32 %v4038_v49, %v2115_v38  ;;  %v2196_v30 = vmax.f32 %v2124_v39, 0.0 }
 0x46a   : > { %v3202_v42 = vpop.f32.mrf.mxu1 }
 0x46b   : > { %v2127_v26 = vadd.f32 %v3202_v42, %v4038_v49  ;;  %3231 = vmatprep.mubr.msk.bf16.mxu0 %vm1038_vm1, %v2216_v40  ;;  %v2194_v58 = vmax.f32 %v2116_v43, 0.0 }
 0x46c   : > { %v2118_v44 = vpop.f32.mrf.mxu1  ;;  %3232 = vmatmul.mubr.msk.bf16.gmra.mxu0 %vm1038_vm1, %v2217_v41 }
 0x46d   : > { %v2119_v47 = vadd.f32 %v4038_v49, %v2118_v44  ;;  %v2197_v48 = vmax.f32 %v2127_v26, 0.0 }
 0x46e   : > { %v3205_v50 = vpop.f32.mrf.mxu1 }
 0x46f   : > { %v2195_v51 = vmax.f32 %v2119_v47, 0.0  ;;  %v2219_v62 = vpack.c.bf16 %v2197_v48, %v2196_v30  ;;  %v2140_v1 = vadd.f32 %v3205_v50, %v4038_v49 }
 0x470   : > { %v2131_v60 = vpop.f32.mrf.mxu1 }
 0x471   : > { %v2218_v61 = vpack.c.bf16 %v2195_v51, %v2194_v58  ;;  %v2132_v63 = vadd.f32 %v4038_v49, %v2131_v60  ;;  %v2200_v7 = vmax.f32 %v2140_v1, 0.0 }
 0x472   : > { %v3206_v52 = vpop.f32.mrf.mxu1 }
 0x473   : > { %v2143_v37 = vadd.f32 %v3206_v52, %v4038_v49  ;;  %3235 = vmatprep.mubr.msk.bf16.mxu0 %vm1038_vm1, %v2218_v61  ;;  %v2198_v6 = vmax.f32 %v2132_v63, 0.0 }
 0x474   : > { %v2134_v2 = vpop.f32.mrf.mxu1  ;;  %3236 = vmatmul.mubr.msk.bf16.gmra.mxu0 %vm1038_vm1, %v2219_v62 }
 0x475   : > { %v2135_v3 = vadd.f32 %v4038_v49, %v2134_v2  ;;  %v2201_v4 = vmax.f32 %v2143_v37, 0.0 }
 0x476   : > { %v3209_v5 = vpop.f32.mrf.mxu1 }
 0x477   : > { %v2199_v54 = vmax.f32 %v2135_v3, 0.0  ;;  %v2221_v56 = vpack.c.bf16 %v2201_v4, %v2200_v7  ;;  %v2156_v55 = vadd.f32 %v3209_v5, %v4038_v49 }
 0x478   : > { %v2147_v53 = vpop.f32.mrf.mxu1 }
 0x479   : > { %v2220_v8 = vpack.c.bf16 %v2199_v54, %v2198_v6  ;;  %v2148_v12 = vadd.f32 %v4038_v49, %v2147_v53  ;;  %v2204_v18 = vmax.f32 %v2156_v55, 0.0 }
 0x47a   : > { %v3210_v11 = vpop.f32.mrf.mxu1 }
 0x47b   : > { %v2159_v46 = vadd.f32 %v3210_v11, %v4038_v49  ;;  %3239 = vmatprep.mubr.msk.bf16.mxu0 %vm1038_vm1, %v2220_v8  ;;  %v2202_v16 = vmax.f32 %v2148_v12, 0.0 }
 0x47c   : > { %v2150_v13 = vpop.f32.mrf.mxu1  ;;  %3240 = vmatmul.mubr.msk.bf16.gmra.mxu0 %vm1038_vm1, %v2221_v56 }
 0x47d   : > { %v2151_v14 = vadd.f32 %v4038_v49, %v2150_v13  ;;  %v2205_v57 = vmax.f32 %v2159_v46, 0.0 }
 0x47e   : > { %v3213_v15 = vpop.f32.mrf.mxu1 }
 0x47f   : > { %v2203_v17 = vmax.f32 %v2151_v14, 0.0  ;;  %v2223_v21 = vpack.c.bf16 %v2205_v57, %v2204_v18  ;;  %v2172_v59 = vadd.f32 %v3213_v15, %v4038_v49 }
 0x480   : > { %v2163_v9 = vpop.f32.mrf.mxu1 }
 0x481   : > { %v2222_v20 = vpack.c.bf16 %v2203_v17, %v2202_v16  ;;  %v2164_v0 = vadd.f32 %v4038_v49, %v2163_v9  ;;  %v2208_v27 = vmax.f32 %v2172_v59, 0.0 }
 0x482   : > { %v3214_v22 = vpop.f32.mrf.mxu1 }
 0x483   : > { %v2175_v23 = vadd.f32 %v3214_v22, %v4038_v49  ;;  %3243 = vmatprep.mubr.msk.bf16.mxu0 %vm1038_vm1, %v2222_v20  ;;  %v2206_v32 = vmax.f32 %v2164_v0, 0.0 }
 0x484   : > { %v2166_v35 = vpop.f32.mrf.mxu1  ;;  %3244 = vmatmul.mubr.msk.bf16.gmra.mxu0 %vm1038_vm1, %v2223_v21 }
 0x485   : > { %v2167_v10 = vadd.f32 %v4038_v49, %v2166_v35  ;;  %v2209_v24 = vmax.f32 %v2175_v23, 0.0 }
 0x487   : > { %v2207_v25 = vmax.f32 %v2167_v10, 0.0  ;;  %v2225_v29 = vpack.c.bf16 %v2209_v24, %v2208_v27 }
 0x489   : > { %v2224_v28 = vpack.c.bf16 %v2207_v25, %v2206_v32 }
 0x48b   : > { %3247 = vmatprep.mubr.msk.bf16.mxu0 %vm1038_vm1, %v2224_v28 }
 0x48c   : > { %3248 = vmatmul.mubr.msk.bf16.gmra.mxu0 %vm1038_vm1, %v2225_v29 }
 0x514   : > { %v3221_v19 = vpop.f32.mrf.mxu0 }
 0x515   : > { %v2338_v33 = vadd.f32 %v3221_v19, %v4091_v31 }
 0x516   : > { %v2329_v49 = vpop.f32.mrf.mxu0 }
 0x517   : > { %v2458_v45 = vmax.f32 %v2338_v33, 0.0  ;;  %v2330_v36 = vadd.f32 %v4091_v31, %v2329_v49 }
 0x518   : > { %v3222_v34 = vpop.f32.mrf.mxu0 }
 0x519   : > { %2490 = vst [vmem:[%s4096_s14 + $0x10] sm:$0xff] %v2458_v45  ;;  %v2456_v38 = vmax.f32 %v2330_v36, 0.0  ;;  %v2341_v40 = vadd.f32 %v3222_v34, %v4091_v31 }
 0x51a   : > { %v2332_v41 = vpop.f32.mrf.mxu0 }
 0x51b   : > { %2488 = vst [vmem:[%s4096_s14] sm:$0xff] %v2456_v38  ;;  %v2459_v42 = vmax.f32 %v2341_v40, 0.0  ;;  %v2333_v43 = vadd.f32 %v4091_v31, %v2332_v41 }
 0x51c   : > { %v3225_v26 = vpop.f32.mrf.mxu0 }
 0x51d   : > { %2491 = vst [vmem:[%s4096_s14 + $0x18] sm:$0xff] %v2459_v42  ;;  %v2457_v39 = vmax.f32 %v2333_v43, 0.0  ;;  %v2354_v44 = vadd.f32 %v3225_v26, %v4091_v31 }
 0x51e   : > { %v2345_v47 = vpop.f32.mrf.mxu0 }
 0x51f   : > { %2489 = vst [vmem:[%s4096_s14 + $0x8] sm:$0xff] %v2457_v39  ;;  %v2462_v48 = vmax.f32 %v2354_v44, 0.0  ;;  %v2346_v50 = vadd.f32 %v4091_v31, %v2345_v47 }
 0x520   : > { %v3226_v58 = vpop.f32.mrf.mxu0 }
 0x521   : > { %2494 = vst [vmem:[%s4096_s14 + $0x30] sm:$0xff] %v2462_v48  ;;  %v2460_v51 = vmax.f32 %v2346_v50, 0.0  ;;  %v2357_v30 = vadd.f32 %v3226_v58, %v4091_v31 }
 0x522   : > { %v2348_v60 = vpop.f32.mrf.mxu0 }
 0x523   : > { %2492 = vst [vmem:[%s4096_s14 + $0x20] sm:$0xff] %v2460_v51  ;;  %v2463_v61 = vmax.f32 %v2357_v30, 0.0  ;;  %v2349_v62 = vadd.f32 %v4091_v31, %v2348_v60 }
 0x524   : > { %v3229_v52 = vpop.f32.mrf.mxu0 }
 0x525   : > { %2495 = vst [vmem:[%s4096_s14 + $0x38] sm:$0xff] %v2463_v61  ;;  %v2461_v63 = vmax.f32 %v2349_v62, 0.0  ;;  %v2370_v37 = vadd.f32 %v3229_v52, %v4091_v31 }
 0x526   : > { %v2361_v1 = vpop.f32.mrf.mxu0 }
 0x527   : > { %2493 = vst [vmem:[%s4096_s14 + $0x28] sm:$0xff] %v2461_v63  ;;  %v2466_v2 = vmax.f32 %v2370_v37, 0.0  ;;  %v2362_v3 = vadd.f32 %v4091_v31, %v2361_v1 }
 0x528   : > { %v3230_v4 = vpop.f32.mrf.mxu0 }
 0x529   : > { %2498 = vst [vmem:[%s4096_s14 + $0x50] sm:$0xff] %v2466_v2  ;;  %v2464_v5 = vmax.f32 %v2362_v3, 0.0  ;;  %v2373_v6 = vadd.f32 %v3230_v4, %v4091_v31 }
 0x52a   : > { %v2364_v54 = vpop.f32.mrf.mxu0 }
 0x52b   : > { %2496 = vst [vmem:[%s4096_s14 + $0x40] sm:$0xff] %v2464_v5  ;;  %v2467_v7 = vmax.f32 %v2373_v6, 0.0  ;;  %v2365_v53 = vadd.f32 %v4091_v31, %v2364_v54 }
 0x52c   : > { %v3233_v8 = vpop.f32.mrf.mxu0 }
 0x52d   : > { %2499 = vst [vmem:[%s4096_s14 + $0x58] sm:$0xff] %v2467_v7  ;;  %v2465_v56 = vmax.f32 %v2365_v53, 0.0  ;;  %v2386_v11 = vadd.f32 %v3233_v8, %v4091_v31 }
 0x52e   : > { %v2377_v12 = vpop.f32.mrf.mxu0 }
 0x52f   : > { %2497 = vst [vmem:[%s4096_s14 + $0x48] sm:$0xff] %v2465_v56  ;;  %v2470_v46 = vmax.f32 %v2386_v11, 0.0  ;;  %v2378_v55 = vadd.f32 %v4091_v31, %v2377_v12 }
 0x530   : > { %v3234_v13 = vpop.f32.mrf.mxu0 }
 0x531   : > { %2502 = vst [vmem:[%s4096_s14 + $0x70] sm:$0xff] %v2470_v46  ;;  %v2468_v14 = vmax.f32 %v2378_v55, 0.0  ;;  %v2389_v57 = vadd.f32 %v3234_v13, %v4091_v31 }
 0x532   : > { %v2380_v15 = vpop.f32.mrf.mxu0 }
 0x533   : > { %2500 = vst [vmem:[%s4096_s14 + $0x60] sm:$0xff] %v2468_v14  ;;  %v2471_v16 = vmax.f32 %v2389_v57, 0.0  ;;  %v2381_v17 = vadd.f32 %v4091_v31, %v2380_v15 }
 0x534   : > { %v3237_v18 = vpop.f32.mrf.mxu0 }
 0x535   : > { %2503 = vst [vmem:[%s4096_s14 + $0x78] sm:$0xff] %v2471_v16  ;;  %v2469_v9 = vmax.f32 %v2381_v17, 0.0  ;;  %v2402_v20 = vadd.f32 %v3237_v18, %v4091_v31 }
 0x536   : > { %v2393_v21 = vpop.f32.mrf.mxu0 }
 0x537   : > { %2501 = vst [vmem:[%s4096_s14 + $0x68] sm:$0xff] %v2469_v9  ;;  %v2474_v22 = vmax.f32 %v2402_v20, 0.0  ;;  %v2394_v0 = vadd.f32 %v4091_v31, %v2393_v21 }
 0x538   : > { %v3238_v23 = vpop.f32.mrf.mxu0 }
 0x539   : > { %2506 = vst [vmem:[%s4096_s14 + $0x90] sm:$0xff] %v2474_v22  ;;  %v2472_v59 = vmax.f32 %v2394_v0, 0.0  ;;  %v2405_v35 = vadd.f32 %v3238_v23, %v4091_v31 }
 0x53a   : > { %v2396_v10 = vpop.f32.mrf.mxu0 }
 0x53b   : > { %2504 = vst [vmem:[%s4096_s14 + $0x80] sm:$0xff] %v2472_v59  ;;  %v2475_v24 = vmax.f32 %v2405_v35, 0.0  ;;  %v2397_v32 = vadd.f32 %v4091_v31, %v2396_v10 }
 0x53c   : > { %v3241_v25 = vpop.f32.mrf.mxu0 }
 0x53d   : > { %2507 = vst [vmem:[%s4096_s14 + $0x98] sm:$0xff] %v2475_v24  ;;  %v2473_v27 = vmax.f32 %v2397_v32, 0.0  ;;  %v2418_v28 = vadd.f32 %v3241_v25, %v4091_v31 }
 0x53e   : > { %v2409_v29 = vpop.f32.mrf.mxu0 }
 0x53f   : > { %2505 = vst [vmem:[%s4096_s14 + $0x88] sm:$0xff] %v2473_v27  ;;  %v2478_v19 = vmax.f32 %v2418_v28, 0.0  ;;  %v2410_v33 = vadd.f32 %v4091_v31, %v2409_v29 }
 0x540   : > { %v3242_v49 = vpop.f32.mrf.mxu0 }
 0x541   : > { %2510 = vst [vmem:[%s4096_s14 + $0xb0] sm:$0xff] %v2478_v19  ;;  %v2476_v45 = vmax.f32 %v2410_v33, 0.0  ;;  %v2421_v36 = vadd.f32 %v3242_v49, %v4091_v31 }
 0x542   : > { %v2412_v34 = vpop.f32.mrf.mxu0 }
 0x543   : > { %2508 = vst [vmem:[%s4096_s14 + $0xa0] sm:$0xff] %v2476_v45  ;;  %v2479_v38 = vmax.f32 %v2421_v36, 0.0  ;;  %v2413_v40 = vadd.f32 %v4091_v31, %v2412_v34 }
 0x544   : > { %v3245_v41 = vpop.f32.mrf.mxu0 }
 0x545   : > { %2511 = vst [vmem:[%s4096_s14 + $0xb8] sm:$0xff] %v2479_v38  ;;  %v2477_v42 = vmax.f32 %v2413_v40, 0.0  ;;  %v2434_v43 = vadd.f32 %v3245_v41, %v4091_v31 }
 0x546   : > { %v2425_v26 = vpop.f32.mrf.mxu0 }
 0x547   : > { %2509 = vst [vmem:[%s4096_s14 + $0xa8] sm:$0xff] %v2477_v42  ;;  %v2482_v39 = vmax.f32 %v2434_v43, 0.0  ;;  %v2426_v44 = vadd.f32 %v4091_v31, %v2425_v26 }
 0x548   : > { %v3246_v47 = vpop.f32.mrf.mxu0 }
 0x549   : > { %2514 = vst [vmem:[%s4096_s14 + $0xd0] sm:$0xff] %v2482_v39  ;;  %v2480_v48 = vmax.f32 %v2426_v44, 0.0  ;;  %v2437_v50 = vadd.f32 %v3246_v47, %v4091_v31 }
 0x54a   : > { %v2428_v58 = vpop.f32.mrf.mxu0 }
 0x54b   : > { %2512 = vst [vmem:[%s4096_s14 + $0xc0] sm:$0xff] %v2480_v48  ;;  %v2483_v51 = vmax.f32 %v2437_v50, 0.0  ;;  %v2429_v30 = vadd.f32 %v4091_v31, %v2428_v58 }
 0x54c   : > { %v3249_v60 = vpop.f32.mrf.mxu0 }
 0x54d   : > { %2515 = vst [vmem:[%s4096_s14 + $0xd8] sm:$0xff] %v2483_v51  ;;  %v2481_v61 = vmax.f32 %v2429_v30, 0.0  ;;  %v2450_v62 = vadd.f32 %v3249_v60, %v4091_v31 }
 0x54e   : > { %v2441_v52 = vpop.f32.mrf.mxu0 }
 0x54f   : > { %2513 = vst [vmem:[%s4096_s14 + $0xc8] sm:$0xff] %v2481_v61  ;;  %v2486_v63 = vmax.f32 %v2450_v62, 0.0  ;;  %v2442_v37 = vadd.f32 %v4091_v31, %v2441_v52 }
 0x550   : > { %v3250_v1 = vpop.f32.mrf.mxu0 }
 0x551   : > { %2518 = vst [vmem:[%s4096_s14 + $0xf0] sm:$0xff] %v2486_v63  ;;  %v2484_v2 = vmax.f32 %v2442_v37, 0.0  ;;  %v2453_v3 = vadd.f32 %v3250_v1, %v4091_v31 }
 0x552   : > { %v2444_v4 = vpop.f32.mrf.mxu0 }
 0x553   : > { %2516 = vst [vmem:[%s4096_s14 + $0xe0] sm:$0xff] %v2484_v2  ;;  %v2487_v5 = vmax.f32 %v2453_v3, 0.0  ;;  %v2445_v6 = vadd.f32 %v4091_v31, %v2444_v4 }
 0x555   : > { %2519 = vst [vmem:[%s4096_s14 + $0xf8] sm:$0xff] %v2487_v5  ;;  %v2485_v54 = vmax.f32 %v2445_v6, 0.0 }
 0x557   : > { %2517 = vst [vmem:[%s4096_s14 + $0xe8] sm:$0xff] %v2485_v54 }
 0x558   : > { %3422 = shalt.err (!%p3419_p0)
}
 0x559   : > { %s3423_s30 = scalar_lea.hbm %s4163_s11, 4096  ;;  %s3427_s22 = scalar_lea.hbm %s4214_s4, 8192 }
 0x55a   : > { %p3424_p2 = scmp.ne.s32.totalorder %s4163_s11, %s3423_s30  ;;  %p3428_p3 = scmp.lt.s32.totalorder %s4163_s11, %s4214_s4 }
 0x55b   : > { %p3429_p6 = scmp.lt.s32.totalorder %s3427_s22, %s3423_s30 }
 0x55c   : > { %p3425_p9 = pnand %p3424_p2, %p4223_p13 }
 0x55d   : > { %p3430_p11 = por %p3429_p6, %p3428_p3 }
 0x55e   : > { %p3426_p1 = pneg %p3425_p9 }
 0x560   : > { %p3431_p12 = pnand %p3430_p11, %p3426_p1 }
 0x562   : > { %3434 = shalt.err (!%p3431_p12)
}
 0x563   : > { %s3479_s14 = smov 128   ;;  %s3480_s20 = smov 8  }
 0x564   : > { %3265 = dma.vmem_to_hbm [thread:$0]  (%p4223_p13), %s4165_s8, 4096, %s4163_s11, %s2521_s19, %s3479_s14, %s3479_s14, %s3480_s20  }
 0x565 PF: > { %s2549_s10 = sand.u32 1, %s3461_s15   ;;  %p4224_p4 = scmp.ne.s32.totalorder %s4220_s28, 0 }
 0x566   : > { %p4225_p5 = scmp.ge.s32.totalorder %s3473_s18, 2  ;;  %s2550_s26 = scalar_lea.sflag [#allocation4], %s2549_s10 }
 0x568   : > { %p3272_p7 = pnand %p4225_p5, %p4224_p4 }
 0x56a   : > { %p3273_p8 = pneg %p3272_p7 }
 0x56c   : > { %3456 = dma.done.wait (%p3273_p8), %s2550_s26, 4096  }
 0x56d   : > { %3458 = vsyncadd (%p3273_p8), %s2550_s26, 4294963200  ;;  %p17_p10 = scmp.ge.s32.totalorder %s3531_s21, 4   ;;  %s4226_s15 = smov %s3465_s16 }
 0x56e   : > { %s4227_s16 = smov %s3469_s17  ;;  %s4228_s17 = smov %s3543_s24 }
 0x56f   : > { %s4229_s18 = smov %s3531_s21  ;;  %19 = sbr.rel (!%p17_p10) target bundleno = 5 (0x5), region = 84 }
 0x574   :  { %2555 = vsyncpa [#allocation3], 1 }
 0x575   :  { %2557 = vsyncpa [#allocation3 + $0x1], 1 }
 0x576   :  { %2558 = vsyncpa [#allocation4], 1 }
 0x577   :  { %2560 = vsyncpa [#allocation4 + $0x1], 1 }

// kernel: tpu_custom_call.1
= control target key start
LH: loop header
LB: loop body
LE: loop exit
PB: predicated region body
PF: predicated region fallthrough
CT: control target
= control target key end

     0   :  { %9 = vsyncpa [#allocation3], 0  ;;  %s4210_s0 = inlined_call_operand.hbm [shape: bf16[512,128], index: 0, kind: input, shape index: {}]   ;;  %s4211_s1 = inlined_call_operand.vmem [shape: bf16[512,96], index: 1, kind: input, shape index: {}]   ;;  %s4212_s2 = inlined_call_operand.vmem [shape: bf16[576,128], index: 2, kind: input, shape index: {}]   ;;  %s4213_s3 = inlined_call_operand.vmem [shape: f32[6,128], index: 3, kind: input, shape index: {}]   ;;  %s4214_s4 = inlined_call_operand.hbm [shape: f32[512,128], index: 4, kind: output, shape index: {}]  }
   0x1   :  { %11 = vsyncpa [#allocation3 + $0x1], 0 }
   0x2   :  { %12 = vsyncpa [#allocation4], 0 }
   0x3   :  { %14 = vsyncpa [#allocation4 + $0x1], 0  ;;  %s3506_s15 = smov 0   ;;  %s3508_s16 = smov 0  }
   0x4   :  { %s3510_s17 = smov 0   ;;  %s3512_s18 = smov 0  }
   0x5 LB: > { %s3527_s19 = sadd.s32 4294967295, %s3473_s18   ;;  %s2619_s20 = sadd.s32 4294967294, %s3473_s18   ;;  %s3473_s18 = sphi %s3512_s18, %s4229_s18   ;;  %s3469_s17 = sphi %s3510_s17, %s4228_s17   ;;  %s3465_s16 = sphi %s3508_s16, %s4227_s16   ;;  %s3461_s15 = sphi %s3506_s15, %s4226_s15  }
   0x6   : > { %s3531_s21 = sadd.s32 1, %s3473_s18   ;;  %s27_s22 = sadd.s32 1, %s3469_s17 }
   0x7   : > { %s24_s23 = ssub.s32 %s3473_s18, %s3531_s21  ;;  %p34_p0 = scmp.ne.s32.totalorder %s3469_s17, %s3465_s16 }
   0x8   : > { %p25_p1 = scmp.eq.s32.totalorder %s24_s23, 0  ;;  %p35_p2 = scmp.eq.s32.totalorder %s3473_s18, 0 }
   0x9   : > { %p40_p3 = scmp.ne.s32.totalorder %s3465_s16, %s3461_s15  ;;  %p41_p4 = scmp.eq.s32.totalorder %s3527_s19, 0 }
   0xa   : > { %s3543_s24 = scalar_select %p25_p1, %s3469_s17, %s27_s22  }
   0xb   : > { %p3545_p5 = por %p35_p2, %p34_p0  ;;  %p3549_p6 = por %p41_p4, %p40_p3 }
   0xc   : > { %p132_p7 = scmp.eq.s32.totalorder %s3527_s19, 1  ;;  %p138_p8 = scmp.eq.s32.totalorder %s2619_s20, 1 }
   0xd   : > { %s4218_s26 = scalar_select %p3549_p6, 1, 0 }
   0xe   : > { %p3275_p10 = scmp.lt.s32.totalorder %s3473_s18, 2  ;;  %p3556_p11 = por %p132_p7, %p34_p0 }
   0xf   : > { %p3560_p12 = por %p138_p8, %p40_p3  ;;  %s164_s29 = sand.u32 1, %s3469_s17  }
  0x10   : > { %s4219_s27 = scalar_select %p3556_p11, 1, 0 }
  0x11   : > { %s4220_s28 = scalar_select %p3560_p12, 1, 0 }
  0x12   : > { %s2805_s30 = sshll.u32 %s3473_s18, 11  ;;  %s2622_s5 = sshll.u32 %s164_s29, 7 }
  0x13   : > { %s3569_s8 = scalar_lea.hbm %s4210_s0, %s2805_s30  ;;  %s168_s9 = scalar_lea.vmem [#allocation2], %s2622_s5 }
  0x14   : > { %s175_s10 = sshll.u32 %s168_s9, 4  ;;  %p3573_p13 = pnand %p3275_p10, %p3545_p5  ;;  %s3577_s10 = int_to_ptr.vmem [resolvable:$true] %s175_s10 }
  0x15   : > { %s3579_s12 = scalar_lea.sflag [#allocation3], %s164_s29  ;;  %s3381_s13 = scalar_lea.hbm %s3569_s8, 2048 }
  0x16   : > { %p3382_p0 = scmp.ne.s32.totalorder %s3569_s8, %s3381_s13  ;;  %p3383_p1 = pneg %p3573_p13 }
  0x17   : > { %s3386_s22 = scalar_lea.hbm %s4210_s0, 4096  ;;  %p3387_p4 = scmp.lt.s32.totalorder %s3569_s8, %s4210_s0 }
  0x18   : > { %p3384_p2 = pnand %p3383_p1, %p3382_p0  ;;  %p3388_p5 = scmp.lt.s32.totalorder %s3386_s22, %s3381_s13 }
  0x1a   : > { %p3385_p3 = pneg %p3384_p2  ;;  %p3389_p7 = por %p3388_p5, %p3387_p4 }
  0x1c   : > { %p3390_p8 = pnand %p3389_p7, %p3385_p3 }
  0x1e   : > { %3393 = shalt.err (!%p3390_p8)
}
  0x1f   : > { %s3394_s29 = scalar_lea.vmem %s3577_s10, 2048  ;;  %s3475_s30 = smov [#allocation2]  }
  0x20   : > { %p3395_p10 = scmp.ne.s32.totalorder %s3577_s10, %s3394_s29  ;;  %s3399_s5 = sshll.u32 %s3475_s30, 4  ;;  %s3400_s5 = int_to_ptr.vmem [resolvable:$false] %s3399_s5 }
  0x21   : > { %s3401_s6 = scalar_lea.vmem %s3400_s5, 4096  ;;  %p3402_p2 = scmp.lt.s32.totalorder %s3577_s10, %s3400_s5 }
  0x22   : > { %p3397_p9 = pnand %p3395_p10, %p3383_p1  ;;  %p3403_p12 = scmp.lt.s32.totalorder %s3401_s6, %s3394_s29 }
  0x24   : > { %p3398_p0 = pneg %p3397_p9  ;;  %p3404_p11 = por %p3403_p12, %p3402_p2 }
  0x26   : > { %p3405_p6 = pnand %p3404_p11, %p3398_p0 }
  0x28   : > { %3408 = shalt.err (!%p3405_p6)
}
  0x29   : > { %s3476_s7 = smov 64   ;;  %s3477_s9 = smov 4  }
  0x2a   : > { %3270 = dma.hbm_to_vmem [thread:$0]  (!%p3573_p13), %s3569_s8, 2048, %s3577_s10, %s3579_s12, %s3476_s7, %s3476_s7, %s3477_s9  }
  0x2b   : > { %p2625_p9 = scmp.ge.s32.totalorder %s3473_s18, 1  ;;  %p192_p1 = scmp.lt.s32.totalorder %s3473_s18, 3 }
  0x2d   : > { %p193_p3 = pnand %p2625_p9, %p192_p1 }
  0x2e   : > { %s3603_s13 = sand.u32 (!%p193_p3), 1, %s3465_s16   ;;  %p4222_p6 = scmp.ne.s32.totalorder (!%p193_p3), %s4218_s26, 0 }
  0x2f   : > { %196 = sbr.rel (%p193_p3) target bundleno = 1381 (0x565), region = 36  ;;  %s2626_s14 = sshll.u32 (!%p193_p3), %s3603_s13, 7 }
  0x30   : > { %s199_s20 = scalar_lea.sflag (!%p193_p3), [#allocation3], %s3603_s13  ;;  %s3607_s22 = scalar_lea.vmem (!%p193_p3), [#allocation2], %s2626_s14 }
  0x34   : > { %3452 = dma.done.wait (%p4222_p6), %s199_s20, 2048  }
  0x35   : > { %3454 = vsyncadd (%p4222_p6), %s199_s20, 4294965248  ;;  %s2628_s8 = sshll.u32 %s3527_s19, 5  ;;  %v3313_v0 = vld [vmem:[%s4212_s2 + $0x28] sm:$0xff]   ;;  %v3314_v1 = vld [vmem:[%s4212_s2 + $0x20] sm:$0xff]   ;;  %vm406_vm0 = vcmask 785408   ;;  %vm1038_vm1 = vcmask 261120  }
  0x36   : > { %p234_p11 = scmp.lt.s32.totalorder %s2628_s8, 63  ;;  %2955 = vmatprep.subr.bf16.mxu0 %v3313_v0  ;;  %3251 = vmatprep.subr.bf16.mxu1 %v3313_v0  ;;  %v3315_v2 = vld [vmem:[%s4212_s2 + $0x18] sm:$0xff]   ;;  %v3316_v4 = vld [vmem:[%s4212_s2 + $0x10] sm:$0xff]   ;;  %v3317_v5 = vld [vmem:[%s4212_s2 + $0x8] sm:$0xff]   ;;  %s2627_s9 = sshll.u32 %s3603_s13, 8 }
  0x37   : > { %2956 = vmatpush3.bf16.msra.mxu0 %v3313_v0  ;;  %3257 = vmatpush3.bf16.msra.mxu1 %v3313_v0  ;;  %v3318_v7 = vld [vmem:[%s4212_s2] sm:$0xff]   ;;  %v3335_v11 = vld [vmem:[%s4212_s2 + $0x58] sm:$0xff]   ;;  %v3336_v13 = vld [vmem:[%s4212_s2 + $0x50] sm:$0xff]   ;;  %s4096_s14 = scalar_lea.vmem [#allocation5], %s2627_s9  ;;  %s2806_s20 = sshll.u32 %s3527_s19, 12 }
  0x38   : > { %s4231_s8 = smov (!%p234_p11, %s2628_s8), 63  ;;  %2957 = vmatprep.subr.bf16.mxu0 %v3314_v1  ;;  %3252 = vmatprep.subr.bf16.mxu1 %v3314_v1  ;;  %v3337_v14 = vld [vmem:[%s4212_s2 + $0x48] sm:$0xff]   ;;  %v3338_v19 = vld [vmem:[%s4212_s2 + $0x40] sm:$0xff]   ;;  %v3339_v26 = vld [vmem:[%s4212_s2 + $0x38] sm:$0xff]   ;;  %s4163_s11 = scalar_lea.hbm %s4214_s4, %s2806_s20 }
  0x39   : > { %s2629_s12 = sshll.u32 %s4231_s8, 2  ;;  %v3340_v27 = vld [vmem:[%s4212_s2 + $0x30] sm:$0xff]   ;;  %v3341_v28 = vld [vmem:[%s4212_s2 + $0x98] sm:$0xff]   ;;  %v3345_v29 = vld [vmem:[%s4212_s2 + $0xa8] sm:$0xff]   ;;  %s2534_s8 = sshll.u32 %s4096_s14, 4  ;;  %s4165_s8 = int_to_ptr.vmem [resolvable:$true] %s2534_s8 }
  0x3a   : > { %s3623_s26 = scalar_lea.vmem %s4211_s1, %s2629_s12  ;;  %v3348_v30 = vld [vmem:[%s4212_s2 + $0xa0] sm:$0xff]   ;;  %v3342_v56 = vld [vmem:[%s4212_s2 + $0x90] sm:$0xff]   ;;  %s2521_s19 = scalar_lea.sflag [#allocation4], %s3603_s13 }
  0x3b   : > { %v3319_v3 = vld [vmem:[%s3623_s26] sm:$0xff]   ;;  %2958 = vmatpush3.bf16.msra.mxu0 %v3314_v1  ;;  %3258 = vmatpush3.bf16.msra.mxu1 %v3314_v1  ;;  %v3320_v8 = vld [vmem:[%s3623_s26 + $0x8] sm:$0xff]   ;;  %v3321_v9 = vld [vmem:[%s3623_s26 + $0x10] sm:$0xff]   ;;  %s3409_s12 = scalar_lea.vmem %s4165_s8, 4096  ;;  %p4223_p13 = scmp.ne.s32.totalorder %s4219_s27, 0 }
  0x3c   : > { %2959 = vmatprep.subr.bf16.mxu0 %v3315_v2  ;;  %2967 = vmatprep.mubr.msk.bf16.mxu0 %vm406_vm0, %v3319_v3  ;;  %v3327_v6 = vld [vmem:[%s3623_s26 + $0x40] sm:$0xff]   ;;  %v3328_v10 = vld [vmem:[%s3623_s26 + $0x48] sm:$0xff]   ;;  %v3329_v12 = vld [vmem:[%s3623_s26 + $0x50] sm:$0xff]   ;;  %p3410_p12 = scmp.ne.s32.totalorder %s4165_s8, %s3409_s12  ;;  %s3478_s23 = smov [#allocation5]  }
  0x3d   : > { %3253 = vmatprep.subr.bf16.mxu1 %v3315_v2  ;;  %2983 = vmatprep.mubr.msk.bf16.mxu1 %vm406_vm0, %v3327_v6  ;;  %v3322_v15 = vld [vmem:[%s3623_s26 + $0x18] sm:$0xff]   ;;  %v3323_v17 = vld [vmem:[%s3623_s26 + $0x20] sm:$0xff]   ;;  %v3324_v20 = vld [vmem:[%s3623_s26 + $0x28] sm:$0xff]   ;;  %s3413_s25 = sshll.u32 %s3478_s23, 4  ;;  %s3414_s25 = int_to_ptr.vmem [resolvable:$false] %s3413_s25 }
  0x3e   : > { %v3330_v16 = vld [vmem:[%s3623_s26 + $0x58] sm:$0xff]   ;;  %v3331_v18 = vld [vmem:[%s3623_s26 + $0x60] sm:$0xff]   ;;  %v3332_v21 = vld [vmem:[%s3623_s26 + $0x68] sm:$0xff]   ;;  %p3411_p4 = pnand %p3410_p12, %p4223_p13  ;;  %s3415_s29 = scalar_lea.vmem %s3414_s25, 8192 }
  0x3f   : > { %2960 = vmatpush3.bf16.msra.mxu0 %v3315_v2  ;;  %3259 = vmatpush3.bf16.msra.mxu1 %v3315_v2  ;;  %v3325_v22 = vld [vmem:[%s3623_s26 + $0x30] sm:$0xff]   ;;  %v3326_v24 = vld [vmem:[%s3623_s26 + $0x38] sm:$0xff]   ;;  %v3703_v35 = vld [vmem:[%s4213_s3] ss:$0 sm:$0xff]  ;;  %p3416_p7 = scmp.lt.s32.totalorder %s4165_s8, %s3414_s25  ;;  %p3417_p8 = scmp.lt.s32.totalorder %s3415_s29, %s3409_s12 }
  0x40   : > { %2961 = vmatprep.subr.bf16.mxu0 %v3316_v4  ;;  %3254 = vmatprep.subr.bf16.mxu1 %v3316_v4  ;;  %v3333_v23 = vld [vmem:[%s3623_s26 + $0x70] sm:$0xff]   ;;  %v3334_v25 = vld [vmem:[%s3623_s26 + $0x78] sm:$0xff]   ;;  %v3343_v1 = vld [vmem:[%s4212_s2 + $0x88] sm:$0xff]   ;;  %p3412_p5 = pneg %p3411_p4 }
  0x41   : > { %p3418_p10 = por %p3417_p8, %p3416_p7 }
  0x43   : > { %2962 = vmatpush3.bf16.msra.mxu0 %v3316_v4  ;;  %3260 = vmatpush3.bf16.msra.mxu1 %v3316_v4  ;;  %p3419_p0 = pnand %p3418_p10, %p3412_p5 }
  0x44   : > { %2963 = vmatprep.subr.bf16.mxu0 %v3317_v5  ;;  %3255 = vmatprep.subr.bf16.mxu1 %v3317_v5 }
  0x47   : > { %2964 = vmatpush3.bf16.msra.mxu0 %v3317_v5  ;;  %3261 = vmatpush3.bf16.msra.mxu1 %v3317_v5 }
  0x48   : > { %2965 = vmatprep.subr.bf16.mxu0 %v3318_v7  ;;  %3256 = vmatprep.subr.bf16.mxu1 %v3318_v7 }
  0x4b   : > { %2966 = vmatpush3.bf16.msra.mxu0 %v3318_v7  ;;  %3262 = vmatpush3.bf16.msra.mxu1 %v3318_v7 }
  0x4c   : > { %2999 = vmatprep.subr.bf16.mxu1 %v3335_v11  ;;  %3043 = vmatprep.subr.bf16.mxu0 %v3345_v29 }
  0x4e   : > { %2968 = vmatmul.mubr.msk.bf16.vlgmr.msra.gmra.mxu0 %vm406_vm0, %v3320_v8  ;;  %2984 = vmatmul.mubr.msk.bf16.vlgmr.msra.gmra.mxu1 %vm406_vm0, %v3328_v10  ;;  %v3344_v10 = vld [vmem:[%s4212_s2 + $0x80] sm:$0xff]  }
  0x4f   : > { %2971 = vmatprep.mubr.msk.bf16.mxu0 %vm406_vm0, %v3321_v9  ;;  %2987 = vmatprep.mubr.msk.bf16.mxu1 %vm406_vm0, %v3329_v12 }
  0x50   : > { %3000 = vmatpush3.bf16.msra.mxu1 %v3335_v11  ;;  %3044 = vmatpush3.bf16.msra.mxu0 %v3345_v29 }
  0x51   : > { %3001 = vmatprep.subr.bf16.mxu1 %v3336_v13  ;;  %3045 = vmatprep.subr.bf16.mxu0 %v3348_v30 }
  0x54   : > { %3002 = vmatpush3.bf16.msra.mxu1 %v3336_v13  ;;  %3046 = vmatpush3.bf16.msra.mxu0 %v3348_v30  ;;  %v3347_v30 = vld [vmem:[%s4212_s2 + $0x70] sm:$0xff]  }
  0x55   : > { %3003 = vmatprep.subr.bf16.mxu1 %v3337_v14 }
  0x56   : > { %2972 = vmatmul.mubr.msk.bf16.gmra.mxu0 %vm406_vm0, %v3322_v15  ;;  %2988 = vmatmul.mubr.msk.bf16.gmra.mxu1 %vm406_vm0, %v3330_v16 }
  0x57   : > { %2975 = vmatprep.mubr.msk.bf16.mxu0 %vm406_vm0, %v3323_v17  ;;  %2991 = vmatprep.mubr.msk.bf16.mxu1 %vm406_vm0, %v3331_v18 }
  0x58   : > { %3004 = vmatpush3.bf16.msra.mxu1 %v3337_v14 }
  0x59   : > { %3005 = vmatprep.subr.bf16.mxu1 %v3338_v19 }
  0x5c   : > { %3006 = vmatpush3.bf16.msra.mxu1 %v3338_v19  ;;  %v3346_v19 = vld [vmem:[%s4212_s2 + $0x78] sm:$0xff]  }
  0x5d   : > { %3007 = vmatprep.subr.bf16.mxu1 %v3339_v26 }
  0x5e   : > { %2976 = vmatmul.mubr.msk.bf16.gmra.mxu0 %vm406_vm0, %v3324_v20  ;;  %2992 = vmatmul.mubr.msk.bf16.gmra.mxu1 %vm406_vm0, %v3332_v21 }
  0x5f   : > { %2979 = vmatprep.mubr.msk.bf16.mxu0 %vm406_vm0, %v3325_v22  ;;  %2995 = vmatprep.mubr.msk.bf16.mxu1 %vm406_vm0, %v3333_v23 }
  0x60   : > { %3008 = vmatpush3.bf16.msra.mxu1 %v3339_v26 }
  0x61   : > { %3009 = vmatprep.subr.bf16.mxu1 %v3340_v27 }
  0x64   : > { %3010 = vmatpush3.bf16.msra.mxu1 %v3340_v27 }
  0x65   : > { %3079 = vmatprep.subr.bf16.mxu1 %v3341_v28 }
  0x66   : > { %2980 = vmatmul.mubr.msk.bf16.gmra.mxu0 %vm406_vm0, %v3326_v24  ;;  %2996 = vmatmul.mubr.msk.bf16.gmra.mxu1 %vm406_vm0, %v3334_v25 }
 0x10e   : > { %v2969_v31 = vpop.f32.mrf.mxu0  ;;  %v3696_v32 = vpop.f32.mrf.mxu1 }
 0x10f   : > { %v498_v40 = vadd.f32 %v2969_v31, %v3703_v35 }
 0x110   : > { %v489_v33 = vpop.f32.mrf.mxu0  ;;  %v3698_v34 = vpop.f32.mrf.mxu1 }
 0x111   : > { %v490_v38 = vadd.f32 %v3703_v35, %v489_v33  ;;  %v618_v49 = vmax.f32 %v498_v40, 0.0  ;;  %v554_v25 = vadd.f32 %v3703_v35, %v3698_v34 }
 0x112   : > { %v2970_v36 = vpop.f32.mrf.mxu0  ;;  %v3705_v37 = vpop.f32.mrf.mxu1 }
 0x113   : > { %v501_v39 = vadd.f32 %v2970_v36, %v3703_v35  ;;  %v616_v47 = vmax.f32 %v490_v38, 0.0  ;;  %v632_v38 = vmax.f32 %v554_v25, 0.0  ;;  %v3353_v25 = vld [vmem:[%s3607_s22 + $0x10] sm:$0xff]  }
 0x114   : > { %v492_v41 = vpop.f32.mrf.mxu0  ;;  %v556_v42 = vpop.f32.mrf.mxu1 }
 0x115   : > { %v493_v43 = vadd.f32 %v3703_v35, %v492_v41  ;;  %v619_v44 = vmax.f32 %v501_v39, 0.0  ;;  %v557_v26 = vadd.f32 %v3703_v35, %v556_v42 }
 0x116   : > { %v2973_v45 = vpop.f32.mrf.mxu0  ;;  %v3711_v46 = vpop.f32.mrf.mxu1 }
 0x117   : > { %v617_v48 = vmax.f32 %v493_v43, 0.0  ;;  %v649_v53 = vpack.c.bf16 %v619_v44, %v618_v49  ;;  %v514_v59 = vadd.f32 %v2973_v45, %v3703_v35  ;;  %v633_v40 = vmax.f32 %v557_v26, 0.0  ;;  %v3349_v43 = vld [vmem:[%s4212_s2 + $0x68] sm:$0xff]   ;;  %v3354_v26 = vld [vmem:[%s3607_s22 + $0x18] sm:$0xff]  }
 0x118   : > { %v505_v50 = vpop.f32.mrf.mxu0  ;;  %v3713_v51 = vpop.f32.mrf.mxu1 }
 0x119   : > { %v648_v52 = vpack.c.bf16 %v617_v48, %v616_v47  ;;  %v506_v57 = vadd.f32 %v3703_v35, %v505_v50  ;;  %v622_v4 = vmax.f32 %v514_v59, 0.0  ;;  %v656_v49 = vpack.c.bf16 %v633_v40, %v632_v38  ;;  %v3363_v38 = vld [vmem:[%s3607_s22 + $0x60] sm:$0xff]   ;;  %v3365_v40 = vld [vmem:[%s3607_s22 + $0x70] sm:$0xff]  }
 0x11a   : > { %v2974_v54 = vpop.f32.mrf.mxu0  ;;  %v3715_v55 = vpop.f32.mrf.mxu1  ;;  %v570_v50 = vadd.f32 %v3703_v35, %v3713_v51 }
 0x11b   : > { %v517_v58 = vadd.f32 %v2974_v54, %v3703_v35  ;;  %3011 = vmatprep.mubr.msk.bf16.mxu1 %vm406_vm0, %v648_v52  ;;  %v620_v2 = vmax.f32 %v506_v57, 0.0 }
 0x11c   : > { %v508_v60 = vpop.f32.mrf.mxu0  ;;  %3012 = vmatmul.mubr.msk.bf16.vlgmr.msra.gmra.mxu1 %vm406_vm0, %v649_v53  ;;  %v572_v0 = vpop.f32.mrf.mxu1  ;;  %v562_v53 = vadd.f32 %v3696_v32, %v3703_v35 }
 0x11d   : > { %v509_v61 = vadd.f32 %v3703_v35, %v508_v60  ;;  %3080 = vmatpush3.bf16.msra.mxu1 %v3341_v28  ;;  %v623_v62 = vmax.f32 %v517_v58, 0.0  ;;  %v573_v52 = vadd.f32 %v3703_v35, %v572_v0  ;;  %v636_v58 = vmax.f32 %v570_v50, 0.0 }
 0x11e   : > { %v2977_v63 = vpop.f32.mrf.mxu0  ;;  %3081 = vmatprep.subr.bf16.mxu1 %v3342_v56  ;;  %v3729_v9 = vpop.f32.mrf.mxu1  ;;  %v634_v59 = vmax.f32 %v562_v53, 0.0  ;;  %v578_v0 = vadd.f32 %v3711_v46, %v3703_v35 }
 0x11f   : > { %v621_v3 = vmax.f32 %v509_v61, 0.0  ;;  %v651_v7 = vpack.c.bf16 %v623_v62, %v622_v4  ;;  %v530_v13 = vadd.f32 %v2977_v63, %v3703_v35  ;;  %v637_v51 = vmax.f32 %v573_v52, 0.0 }
 0x120   : > { %v521_v5 = vpop.f32.mrf.mxu0  ;;  %v585_v18 = vpop.f32.mrf.mxu1  ;;  %v594_v46 = vadd.f32 %v3729_v9, %v3703_v35 }
 0x121   : > { %v650_v6 = vpack.c.bf16 %v621_v3, %v620_v2  ;;  %3082 = vmatpush3.bf16.msra.mxu1 %v3342_v56  ;;  %v522_v11 = vadd.f32 %v3703_v35, %v521_v5  ;;  %v626_v22 = vmax.f32 %v530_v13, 0.0  ;;  %v565_v56 = vadd.f32 %v3705_v37, %v3703_v35 }
 0x122   : > { %v2978_v8 = vpop.f32.mrf.mxu0  ;;  %3083 = vmatprep.subr.bf16.mxu1 %v3343_v1  ;;  %v2994_v29 = vpop.f32.mrf.mxu1  ;;  %v658_v62 = vpack.c.bf16 %v637_v51, %v636_v58  ;;  %v586_v32 = vadd.f32 %v3703_v35, %v585_v18  ;;  %v638_v5 = vmax.f32 %v578_v0, 0.0 }
 0x123   : > { %v533_v12 = vadd.f32 %v2978_v8, %v3703_v35  ;;  %3015 = vmatprep.mubr.msk.bf16.mxu1 %vm406_vm0, %v650_v6  ;;  %v624_v20 = vmax.f32 %v522_v11, 0.0  ;;  %v635_v60 = vmax.f32 %v565_v56, 0.0 }
 0x124   : > { %v524_v14 = vpop.f32.mrf.mxu0  ;;  %3016 = vmatmul.mubr.msk.bf16.gmra.mxu1 %vm406_vm0, %v651_v7  ;;  %v588_v42 = vpop.f32.mrf.mxu1  ;;  %v640_v3 = vmax.f32 %v586_v32, 0.0  ;;  %v3368_v32 = vld [vmem:[%s4212_s2 + $0xd0] sm:$0xff]  }
 0x125   : > { %v525_v15 = vadd.f32 %v3703_v35, %v524_v14  ;;  %3084 = vmatpush3.bf16.msra.mxu1 %v3343_v1  ;;  %v627_v16 = vmax.f32 %v533_v12, 0.0  ;;  %v589_v63 = vadd.f32 %v3703_v35, %v588_v42  ;;  %v657_v37 = vpack.c.bf16 %v635_v60, %v634_v59  ;;  %v3367_v42 = vld [vmem:[%s4212_s2 + $0xd8] sm:$0xff]  }
 0x126   : > { %v2981_v17 = vpop.f32.mrf.mxu0  ;;  %3085 = vmatprep.subr.bf16.mxu1 %v3344_v10  ;;  %v2997_v57 = vpop.f32.mrf.mxu1  ;;  %v581_v1 = vadd.f32 %v3715_v55, %v3703_v35  ;;  %v597_v55 = vadd.f32 %v2994_v29, %v3703_v35  ;;  %v3357_v29 = vld [vmem:[%s3607_s22 + $0x30] sm:$0xff]   ;;  %3127 = vmatprep.subr.bf16.mxu0 %v3367_v42 }
 0x127   : > { %v625_v21 = vmax.f32 %v525_v15, 0.0  ;;  %v653_v27 = vpack.c.bf16 %v627_v16, %v626_v22  ;;  %v546_v36 = vadd.f32 %v2981_v17, %v3703_v35  ;;  %v641_v4 = vmax.f32 %v589_v63, 0.0 }
 0x128   : > { %v537_v23 = vpop.f32.mrf.mxu0  ;;  %v601_v61 = vpop.f32.mrf.mxu1  ;;  %v639_v6 = vmax.f32 %v581_v1, 0.0  ;;  %v642_v15 = vmax.f32 %v594_v46, 0.0  ;;  %v643_v16 = vmax.f32 %v597_v55, 0.0  ;;  %v3370_v55 = vld [vmem:[%s4212_s2 + $0xc0] sm:$0xff]  }
 0x129   : > { %v652_v24 = vpack.c.bf16 %v625_v21, %v624_v20  ;;  %3086 = vmatpush3.bf16.msra.mxu1 %v3344_v10  ;;  %v538_v31 = vadd.f32 %v3703_v35, %v537_v23  ;;  %v630_v47 = vmax.f32 %v546_v36, 0.0  ;;  %v660_v8 = vpack.c.bf16 %v641_v4, %v640_v3  ;;  %v3350_v23 = vld [vmem:[%s4212_s2 + $0x60] sm:$0xff]   ;;  %v3361_v36 = vld [vmem:[%s3607_s22 + $0x50] sm:$0xff]  }
 0x12a   : > { %v2982_v28 = vpop.f32.mrf.mxu0  ;;  %3087 = vmatprep.subr.bf16.mxu1 %v3346_v19  ;;  %v2998_v2 = vpop.f32.mrf.mxu1  ;;  %v602_v10 = vadd.f32 %v3703_v35, %v601_v61  ;;  %v659_v12 = vpack.c.bf16 %v639_v6, %v638_v5  ;;  %v661_v18 = vpack.c.bf16 %v643_v16, %v642_v15  ;;  %v3369_v5 = vld [vmem:[%s4212_s2 + $0xc8] sm:$0xff]  }
 0x12b   : > { %v549_v33 = vadd.f32 %v2982_v28, %v3703_v35  ;;  %3019 = vmatprep.mubr.msk.bf16.mxu1 %vm406_vm0, %v652_v24  ;;  %v628_v44 = vmax.f32 %v538_v31, 0.0  ;;  %v613_v9 = vadd.f32 %v2998_v2, %v3703_v35  ;;  %v3352_v24 = vld [vmem:[%s3607_s22 + $0x8] sm:$0xff]   ;;  %v3359_v31 = vld [vmem:[%s3607_s22 + $0x40] sm:$0xff]  }
 0x12c   : > { %v540_v34 = vpop.f32.mrf.mxu0  ;;  %3020 = vmatmul.mubr.msk.bf16.gmra.mxu1 %vm406_vm0, %v653_v27  ;;  %v604_v7 = vpop.f32.mrf.mxu1  ;;  %v644_v13 = vmax.f32 %v602_v10, 0.0  ;;  %v3355_v27 = vld [vmem:[%s3607_s22 + $0x20] sm:$0xff]   ;;  %v3356_v28 = vld [vmem:[%s3607_s22 + $0x28] sm:$0xff]  }
 0x12d   : > { %v541_v39 = vadd.f32 %v3703_v35, %v540_v34  ;;  %3088 = vmatpush3.bf16.msra.mxu1 %v3346_v19  ;;  %v631_v41 = vmax.f32 %v549_v33, 0.0  ;;  %v605_v11 = vadd.f32 %v3703_v35, %v604_v7  ;;  %v610_v19 = vadd.f32 %v2997_v57, %v3703_v35  ;;  %v3351_v35 = vld [vmem:[%s3607_s22] sm:$0xff]   ;;  %v3360_v33 = vld [vmem:[%s3607_s22 + $0x48] sm:$0xff]   ;;  %v3362_v34 = vld [vmem:[%s3607_s22 + $0x58] sm:$0xff]  }
 0x12e   : > { %3089 = vmatprep.subr.bf16.mxu1 %v3347_v30  ;;  %v647_v21 = vmax.f32 %v613_v9, 0.0  ;;  %v3371_v9 = vld [vmem:[%s4212_s2 + $0xb8] sm:$0xff]  }
 0x12f   : > { %v629_v45 = vmax.f32 %v541_v39, 0.0  ;;  %v655_v54 = vpack.c.bf16 %v631_v41, %v630_v47  ;;  %v645_v14 = vmax.f32 %v605_v11, 0.0  ;;  %v646_v20 = vmax.f32 %v610_v19, 0.0  ;;  %v3364_v39 = vld [vmem:[%s3607_s22 + $0x68] sm:$0xff]   ;;  %v3366_v41 = vld [vmem:[%s3607_s22 + $0x78] sm:$0xff]  }
 0x131   : > { %v654_v48 = vpack.c.bf16 %v629_v45, %v628_v44  ;;  %3090 = vmatpush3.bf16.msra.mxu1 %v3347_v30  ;;  %v662_v17 = vpack.c.bf16 %v645_v14, %v644_v13  ;;  %v663_v22 = vpack.c.bf16 %v647_v21, %v646_v20  ;;  %v3358_v30 = vld [vmem:[%s3607_s22 + $0x38] sm:$0xff]   ;;  %v3813_v45 = vld [vmem:[%s4213_s3 + $0x1] ss:$0 sm:$0xff] }
 0x132   : > { %3091 = vmatprep.subr.bf16.mxu1 %v3349_v43 }
 0x133   : > { %3023 = vmatprep.mubr.msk.bf16.mxu1 %vm406_vm0, %v654_v48 }
 0x134   : > { %3024 = vmatmul.mubr.msk.bf16.gmra.mxu1 %vm406_vm0, %v655_v54 }
 0x135   : > { %3027 = vmatprep.mubr.msk.bf16.mxu1 %vm406_vm0, %v656_v49  ;;  %3092 = vmatpush3.bf16.msra.mxu1 %v3349_v43 }
 0x136   : > { %3093 = vmatprep.subr.bf16.mxu1 %v3350_v23 }
 0x139   : > { %3094 = vmatpush3.bf16.msra.mxu1 %v3350_v23 }
 0x13c   : > { %3028 = vmatmul.mubr.msk.bf16.gmra.mxu1 %vm406_vm0, %v657_v37 }
 0x13d   : > { %3031 = vmatprep.mubr.msk.bf16.mxu1 %vm406_vm0, %v658_v62 }
 0x144   : > { %3032 = vmatmul.mubr.msk.bf16.gmra.mxu1 %vm406_vm0, %v659_v12 }
 0x145   : > { %3035 = vmatprep.mubr.msk.bf16.mxu1 %vm406_vm0, %v660_v8 }
 0x14c   : > { %3036 = vmatmul.mubr.msk.bf16.gmra.mxu1 %vm406_vm0, %v661_v18 }
 0x14d   : > { %3039 = vmatprep.mubr.msk.bf16.mxu1 %vm406_vm0, %v662_v17 }
 0x154   : > { %3040 = vmatmul.mubr.msk.bf16.gmra.mxu1 %vm406_vm0, %v663_v22 }
 0x155   : > { %3095 = vmatprep.mubr.bf16.mxu1 %v3351_v35 }
 0x15c   : > { %3096 = vmatmul.mubr.bf16.vlgmr.msra.gmra.mxu1 %v3352_v24 }
 0x15d   : > { %3099 = vmatprep.mubr.bf16.mxu1 %v3353_v25 }
 0x164   : > { %3100 = vmatmul.mubr.bf16.gmra.mxu1 %v3354_v26 }
 0x165   : > { %3103 = vmatprep.mubr.bf16.mxu1 %v3355_v27 }
 0x16c   : > { %3104 = vmatmul.mubr.bf16.gmra.mxu1 %v3356_v28 }
 0x16d   : > { %3107 = vmatprep.mubr.bf16.mxu1 %v3357_v29 }
 0x174   : > { %3108 = vmatmul.mubr.bf16.gmra.mxu1 %v3358_v30 }
 0x175   : > { %3111 = vmatprep.mubr.bf16.mxu1 %v3359_v31 }
 0x17c   : > { %3112 = vmatmul.mubr.bf16.gmra.mxu1 %v3360_v33 }
 0x17d   : > { %3115 = vmatprep.mubr.bf16.mxu1 %v3361_v36 }
 0x184   : > { %3116 = vmatmul.mubr.bf16.gmra.mxu1 %v3362_v34 }
 0x185   : > { %3119 = vmatprep.mubr.bf16.mxu1 %v3363_v38 }
 0x18c   : > { %3120 = vmatmul.mubr.bf16.gmra.mxu1 %v3364_v39 }
 0x18d   : > { %3123 = vmatprep.mubr.bf16.mxu1 %v3365_v40 }
 0x194   : > { %3124 = vmatmul.mubr.bf16.gmra.mxu1 %v3366_v41 }
 0x1dc   : > { %v3013_v43 = vpop.f32.mrf.mxu1 }
 0x1dd   : > { %v808_v50 = vadd.f32 %v3013_v43, %v3813_v45 }
 0x1de   : > { %v799_v44 = vpop.f32.mrf.mxu1 }
 0x1df   : > { %v800_v48 = vadd.f32 %v3813_v45, %v799_v44  ;;  %v928_v51 = vmax.f32 %v808_v50, 0.0 }
 0x1e0   : > { %v3014_v47 = vpop.f32.mrf.mxu1 }
 0x1e1   : > { %v811_v49 = vadd.f32 %v3014_v47, %v3813_v45  ;;  %v926_v57 = vmax.f32 %v800_v48, 0.0 }
 0x1e2   : > { %v802_v52 = vpop.f32.mrf.mxu1 }
 0x1e3   : > { %v803_v53 = vadd.f32 %v3813_v45, %v802_v52  ;;  %v929_v54 = vmax.f32 %v811_v49, 0.0 }
 0x1e4   : > { %v3017_v56 = vpop.f32.mrf.mxu1 }
 0x1e5   : > { %v927_v58 = vmax.f32 %v803_v53, 0.0  ;;  %v1007_v61 = vpack.c.bf16 %v929_v54, %v928_v51  ;;  %v824_v0 = vadd.f32 %v3017_v56, %v3813_v45 }
 0x1e6   : > { %v815_v59 = vpop.f32.mrf.mxu1 }
 0x1e7   : > { %v1006_v60 = vpack.c.bf16 %v927_v58, %v926_v57  ;;  %v816_v63 = vadd.f32 %v3813_v45, %v815_v59  ;;  %v932_v8 = vmax.f32 %v824_v0, 0.0 }
 0x1e8   : > { %v3018_v62 = vpop.f32.mrf.mxu1 }
 0x1e9   : > { %v827_v37 = vadd.f32 %v3018_v62, %v3813_v45  ;;  %3047 = vmatprep.mubr.msk.bf16.mxu0 %vm1038_vm1, %v1006_v60  ;;  %v930_v6 = vmax.f32 %v816_v63, 0.0 }
 0x1ea   : > { %v818_v1 = vpop.f32.mrf.mxu1  ;;  %3048 = vmatmul.mubr.msk.bf16.vlgmr.msra.gmra.mxu0 %vm1038_vm1, %v1007_v61 }
 0x1eb   : > { %v819_v2 = vadd.f32 %v3813_v45, %v818_v1  ;;  %3128 = vmatpush3.bf16.msra.mxu0 %v3367_v42  ;;  %v933_v3 = vmax.f32 %v827_v37, 0.0 }
 0x1ec   : > { %v3021_v4 = vpop.f32.mrf.mxu1  ;;  %3129 = vmatprep.subr.bf16.mxu0 %v3368_v32 }
 0x1ed   : > { %v931_v7 = vmax.f32 %v819_v2, 0.0  ;;  %v1009_v12 = vpack.c.bf16 %v933_v3, %v932_v8  ;;  %v840_v15 = vadd.f32 %v3021_v4, %v3813_v45 }
 0x1ee   : > { %v831_v10 = vpop.f32.mrf.mxu1 }
 0x1ef   : > { %v1008_v11 = vpack.c.bf16 %v931_v7, %v930_v6  ;;  %3130 = vmatpush3.bf16.msra.mxu0 %v3368_v32  ;;  %v832_v13 = vadd.f32 %v3813_v45, %v831_v10  ;;  %v936_v22 = vmax.f32 %v840_v15, 0.0 }
 0x1f0   : > { %v3022_v46 = vpop.f32.mrf.mxu1  ;;  %3131 = vmatprep.subr.bf16.mxu0 %v3369_v5 }
 0x1f1   : > { %v843_v14 = vadd.f32 %v3022_v46, %v3813_v45  ;;  %3051 = vmatprep.mubr.msk.bf16.mxu0 %vm1038_vm1, %v1008_v11  ;;  %v934_v20 = vmax.f32 %v832_v13, 0.0 }
 0x1f2   : > { %v834_v16 = vpop.f32.mrf.mxu1  ;;  %3052 = vmatmul.mubr.msk.bf16.gmra.mxu0 %vm1038_vm1, %v1009_v12 }
 0x1f3   : > { %v835_v17 = vadd.f32 %v3813_v45, %v834_v16  ;;  %3132 = vmatpush3.bf16.msra.mxu0 %v3369_v5  ;;  %v937_v18 = vmax.f32 %v843_v14, 0.0 }
 0x1f4   : > { %v3025_v19 = vpop.f32.mrf.mxu1  ;;  %3133 = vmatprep.subr.bf16.mxu0 %v3370_v55 }
 0x1f5   : > { %v935_v21 = vmax.f32 %v835_v17, 0.0  ;;  %v1011_v24 = vpack.c.bf16 %v937_v18, %v936_v22  ;;  %v856_v28 = vadd.f32 %v3025_v19, %v3813_v45 }
 0x1f6   : > { %v847_v23 = vpop.f32.mrf.mxu1 }
 0x1f7   : > { %v1010_v35 = vpack.c.bf16 %v935_v21, %v934_v20  ;;  %3134 = vmatpush3.bf16.msra.mxu0 %v3370_v55  ;;  %v848_v26 = vadd.f32 %v3813_v45, %v847_v23  ;;  %v940_v38 = vmax.f32 %v856_v28, 0.0 }
 0x1f8   : > { %v3026_v25 = vpop.f32.mrf.mxu1  ;;  %3135 = vmatprep.subr.bf16.mxu0 %v3371_v9 }
 0x1f9   : > { %v859_v27 = vadd.f32 %v3026_v25, %v3813_v45  ;;  %3055 = vmatprep.mubr.msk.bf16.mxu0 %vm1038_vm1, %v1010_v35  ;;  %v938_v36 = vmax.f32 %v848_v26, 0.0 }
 0x1fa   : > { %v850_v29 = vpop.f32.mrf.mxu1  ;;  %3056 = vmatmul.mubr.msk.bf16.gmra.mxu0 %vm1038_vm1, %v1011_v24 }
 0x1fb   : > { %v851_v30 = vadd.f32 %v3813_v45, %v850_v29  ;;  %3136 = vmatpush3.bf16.msra.mxu0 %v3371_v9  ;;  %v941_v31 = vmax.f32 %v859_v27, 0.0 }
 0x1fc   : > { %v3029_v33 = vpop.f32.mrf.mxu1 }
 0x1fd   : > { %v939_v34 = vmax.f32 %v851_v30, 0.0  ;;  %v1013_v41 = vpack.c.bf16 %v941_v31, %v940_v38  ;;  %v872_v47 = vadd.f32 %v3029_v33, %v3813_v45  ;;  %v3372_v30 = vld [vmem:[%s4212_s2 + $0xb0] sm:$0xff]   ;;  %v3375_v38 = vld [vmem:[%s4212_s2 + $0xf8] sm:$0xff]  }
 0x1fe   : > { %v863_v39 = vpop.f32.mrf.mxu1  ;;  %3137 = vmatprep.subr.bf16.mxu0 %v3372_v30 }
 0x1ff   : > { %v1012_v40 = vpack.c.bf16 %v939_v34, %v938_v36  ;;  %v864_v43 = vadd.f32 %v3813_v45, %v863_v39  ;;  %v944_v56 = vmax.f32 %v872_v47, 0.0  ;;  %3138 = vmatpush3.bf16.msra.mxu0 %v3372_v30  ;;  %v3374_v36 = vld [vmem:[%s4212_s2 + $0x100] sm:$0xff]  }
 0x200   : > { %v3030_v42 = vpop.f32.mrf.mxu1 }
 0x201   : > { %v875_v44 = vadd.f32 %v3030_v42, %v3813_v45  ;;  %3059 = vmatprep.mubr.msk.bf16.mxu0 %vm1038_vm1, %v1012_v40  ;;  %v942_v53 = vmax.f32 %v864_v43, 0.0  ;;  %v3376_v40 = vld [vmem:[%s4212_s2 + $0xf0] sm:$0xff]   ;;  %v3377_v42 = vld [vmem:[%s4212_s2 + $0xe8] sm:$0xff]  }
 0x202   : > { %v866_v48 = vpop.f32.mrf.mxu1  ;;  %3060 = vmatmul.mubr.msk.bf16.gmra.mxu0 %vm1038_vm1, %v1013_v41 }
 0x203   : > { %v867_v49 = vadd.f32 %v3813_v45, %v866_v48  ;;  %v945_v50 = vmax.f32 %v875_v44, 0.0 }
 0x204   : > { %v3033_v52 = vpop.f32.mrf.mxu1 }
 0x205   : > { %v943_v54 = vmax.f32 %v867_v49, 0.0  ;;  %v1015_v51 = vpack.c.bf16 %v945_v50, %v944_v56  ;;  %v888_v62 = vadd.f32 %v3033_v52, %v3813_v45 }
 0x206   : > { %v879_v57 = vpop.f32.mrf.mxu1 }
 0x207   : > { %v1014_v58 = vpack.c.bf16 %v943_v54, %v942_v53  ;;  %v880_v60 = vadd.f32 %v3813_v45, %v879_v57  ;;  %v948_v3 = vmax.f32 %v888_v62, 0.0 }
 0x208   : > { %v3034_v59 = vpop.f32.mrf.mxu1 }
 0x209   : > { %v891_v61 = vadd.f32 %v3034_v59, %v3813_v45  ;;  %3063 = vmatprep.mubr.msk.bf16.mxu0 %vm1038_vm1, %v1014_v58  ;;  %v946_v1 = vmax.f32 %v880_v60, 0.0 }
 0x20a   : > { %v882_v32 = vpop.f32.mrf.mxu1  ;;  %3064 = vmatmul.mubr.msk.bf16.gmra.mxu0 %vm1038_vm1, %v1015_v51 }
 0x20b   : > { %v883_v63 = vadd.f32 %v3813_v45, %v882_v32  ;;  %v949_v37 = vmax.f32 %v891_v61, 0.0  ;;  %v3906_v32 = vld [vmem:[%s4213_s3 + $0x2] ss:$0 sm:$0xff] }
 0x20c   : > { %v3037_v0 = vpop.f32.mrf.mxu1 }
 0x20d   : > { %v947_v2 = vmax.f32 %v883_v63, 0.0  ;;  %v1017_v6 = vpack.c.bf16 %v949_v37, %v948_v3  ;;  %v904_v11 = vadd.f32 %v3037_v0, %v3813_v45 }
 0x20e   : > { %v895_v4 = vpop.f32.mrf.mxu1 }
 0x20f   : > { %v1016_v5 = vpack.c.bf16 %v947_v2, %v946_v1  ;;  %v896_v8 = vadd.f32 %v3813_v45, %v895_v4  ;;  %v952_v16 = vmax.f32 %v904_v11, 0.0 }
 0x210   : > { %v3038_v7 = vpop.f32.mrf.mxu1 }
 0x211   : > { %v907_v10 = vadd.f32 %v3038_v7, %v3813_v45  ;;  %3067 = vmatprep.mubr.msk.bf16.mxu0 %vm1038_vm1, %v1016_v5  ;;  %v950_v14 = vmax.f32 %v896_v8, 0.0 }
 0x212   : > { %v898_v12 = vpop.f32.mrf.mxu1  ;;  %3068 = vmatmul.mubr.msk.bf16.gmra.mxu0 %vm1038_vm1, %v1017_v6 }
 0x213   : > { %v899_v46 = vadd.f32 %v3813_v45, %v898_v12  ;;  %v953_v55 = vmax.f32 %v907_v10, 0.0 }
 0x214   : > { %v3041_v13 = vpop.f32.mrf.mxu1 }
 0x215   : > { %v951_v15 = vmax.f32 %v899_v46, 0.0  ;;  %v1019_v19 = vpack.c.bf16 %v953_v55, %v952_v16  ;;  %v920_v22 = vadd.f32 %v3041_v13, %v3813_v45 }
 0x216   : > { %v911_v17 = vpop.f32.mrf.mxu1 }
 0x217   : > { %v1018_v18 = vpack.c.bf16 %v951_v15, %v950_v14  ;;  %v912_v20 = vadd.f32 %v3813_v45, %v911_v17  ;;  %v956_v27 = vmax.f32 %v920_v22, 0.0 }
 0x218   : > { %v3042_v9 = vpop.f32.mrf.mxu1 }
 0x219   : > { %v923_v21 = vadd.f32 %v3042_v9, %v3813_v45  ;;  %3071 = vmatprep.mubr.msk.bf16.mxu0 %vm1038_vm1, %v1018_v18  ;;  %v954_v25 = vmax.f32 %v912_v20, 0.0 }
 0x21a   : > { %v914_v23 = vpop.f32.mrf.mxu1  ;;  %3072 = vmatmul.mubr.msk.bf16.gmra.mxu0 %vm1038_vm1, %v1019_v19 }
 0x21b   : > { %v915_v35 = vadd.f32 %v3813_v45, %v914_v23  ;;  %v957_v24 = vmax.f32 %v923_v21, 0.0  ;;  %v3373_v45 = vld [vmem:[%s4212_s2 + $0x108] sm:$0xff]  }
 0x21c   : > { %v3097_v31 = vpop.f32.mrf.mxu1  ;;  %3171 = vmatprep.subr.bf16.mxu1 %v3373_v45 }
 0x21d   : > { %v955_v26 = vmax.f32 %v915_v35, 0.0  ;;  %v1021_v29 = vpack.c.bf16 %v957_v24, %v956_v27  ;;  %3172 = vmatpush3.bf16.msra.mxu1 %v3373_v45 }
 0x21e   : > { %v1426_v33 = vpop.f32.mrf.mxu1  ;;  %3173 = vmatprep.subr.bf16.mxu1 %v3374_v36 }
 0x21f   : > { %v1020_v28 = vpack.c.bf16 %v955_v26, %v954_v25 }
 0x220   : > { %v3098_v34 = vpop.f32.mrf.mxu1 }
 0x221   : > { %3075 = vmatprep.mubr.msk.bf16.mxu0 %vm1038_vm1, %v1020_v28  ;;  %3174 = vmatpush3.bf16.msra.mxu1 %v3374_v36 }
 0x222   : > { %3076 = vmatmul.mubr.msk.bf16.gmra.mxu0 %vm1038_vm1, %v1021_v29  ;;  %v1429_v39 = vpop.f32.mrf.mxu1  ;;  %3175 = vmatprep.subr.bf16.mxu1 %v3375_v38 }
 0x224   : > { %v3101_v41 = vpop.f32.mrf.mxu1 }
 0x225   : > { %3176 = vmatpush3.bf16.msra.mxu1 %v3375_v38 }
 0x226   : > { %3177 = vmatprep.subr.bf16.mxu1 %v3376_v40  ;;  %v1442_v43 = vpop.f32.mrf.mxu1 }
 0x228   : > { %v3102_v44 = vpop.f32.mrf.mxu1 }
 0x229   : > { %3178 = vmatpush3.bf16.msra.mxu1 %v3376_v40 }
 0x22a   : > { %3179 = vmatprep.subr.bf16.mxu1 %v3377_v42  ;;  %v1445_v47 = vpop.f32.mrf.mxu1 }
 0x22c   : > { %v3105_v48 = vpop.f32.mrf.mxu1 }
 0x22d   : > { %3180 = vmatpush3.bf16.msra.mxu1 %v3377_v42 }
 0x22e   : > { %v1458_v49 = vpop.f32.mrf.mxu1 }
 0x230   : > { %v3106_v50 = vpop.f32.mrf.mxu1 }
 0x232   : > { %v1461_v52 = vpop.f32.mrf.mxu1 }
 0x234   : > { %v3893_v53 = vpop.f32.mrf.mxu1 }
 0x236   : > { %v3895_v54 = vpop.f32.mrf.mxu1 }
 0x238   : > { %v3897_v56 = vpop.f32.mrf.mxu1 }
 0x23a   : > { %v3899_v57 = vpop.f32.mrf.mxu1 }
 0x23c   : > { %v3901_v59 = vpop.f32.mrf.mxu1 }
 0x23e   : > { %v3908_v0 = vpop.f32.mrf.mxu1 }
 0x240   : > { %v3914_v10 = vpop.f32.mrf.mxu1 }
 0x242   : > { %v3916_v19 = vpop.f32.mrf.mxu1 }
 0x244   : > { %v3924_v26 = vpop.f32.mrf.mxu1 }
 0x2aa   : > { %v3049_v58 = vpop.f32.mrf.mxu0 }
 0x2ab   : > { %v1435_v61 = vadd.f32 %v3097_v31, %v3049_v58 }
 0x2ac   : > { %v1121_v51 = vpop.f32.mrf.mxu0 }
 0x2ad   : > { %v1427_v60 = vadd.f32 %v1426_v33, %v1121_v51  ;;  %v1560_v4 = vadd.f32 %v3906_v32, %v1435_v61 }
 0x2ae   : > { %v3050_v62 = vpop.f32.mrf.mxu0 }
 0x2af   : > { %v1438_v63 = vadd.f32 %v3098_v34, %v3050_v62  ;;  %v1558_v1 = vadd.f32 %v3906_v32, %v1427_v60  ;;  %v1592_v55 = vmax.f32 %v1560_v4, 0.0 }
 0x2b0   : > { %v1124_v37 = vpop.f32.mrf.mxu0 }
 0x2b1   : > { %v1561_v2 = vadd.f32 %v3906_v32, %v1438_v63  ;;  %v1430_v3 = vadd.f32 %v1429_v39, %v1124_v37  ;;  %v1590_v11 = vmax.f32 %v1558_v1, 0.0  ;;  %v1506_v39 = vpop.f32.mrf.mxu1 }
 0x2b2   : > { %v3053_v5 = vpop.f32.mrf.mxu0 }
 0x2b3   : > { %v1559_v6 = vadd.f32 %v3906_v32, %v1430_v3  ;;  %v1593_v7 = vmax.f32 %v1561_v2, 0.0  ;;  %v1451_v13 = vadd.f32 %v3101_v41, %v3053_v5 }
 0x2b4   : > { %v1137_v8 = vpop.f32.mrf.mxu0 }
 0x2b5   : > { %v1591_v12 = vmax.f32 %v1559_v6, 0.0  ;;  %v1443_v46 = vadd.f32 %v1442_v43, %v1137_v8  ;;  %v1623_v17 = vpack.c.bf16 %v1593_v7, %v1592_v55  ;;  %v1564_v22 = vadd.f32 %v3906_v32, %v1451_v13 }
 0x2b6   : > { %v3054_v14 = vpop.f32.mrf.mxu0 }
 0x2b7   : > { %v1622_v15 = vpack.c.bf16 %v1591_v12, %v1590_v11  ;;  %v1454_v16 = vadd.f32 %v3102_v44, %v3054_v14  ;;  %v1562_v9 = vadd.f32 %v3906_v32, %v1443_v46  ;;  %v1596_v30 = vmax.f32 %v1564_v22, 0.0 }
 0x2b8   : > { %v1140_v18 = vpop.f32.mrf.mxu0 }
 0x2b9   : > { %v1565_v20 = vadd.f32 %v3906_v32, %v1454_v16  ;;  %v1446_v21 = vadd.f32 %v1445_v47, %v1140_v18  ;;  %3139 = vmatprep.mubr.msk.bf16.mxu0 %vm406_vm0, %v1622_v15  ;;  %v1594_v27 = vmax.f32 %v1562_v9, 0.0 }
 0x2ba   : > { %v3057_v23 = vpop.f32.mrf.mxu0  ;;  %3140 = vmatmul.mubr.msk.bf16.vlgmr.msra.gmra.mxu0 %vm406_vm0, %v1623_v17 }
 0x2bb   : > { %v1563_v35 = vadd.f32 %v3906_v32, %v1446_v21  ;;  %v1597_v24 = vmax.f32 %v1565_v20, 0.0  ;;  %v1467_v31 = vadd.f32 %v3105_v48, %v3057_v23 }
 0x2bc   : > { %v1153_v25 = vpop.f32.mrf.mxu0 }
 0x2bd   : > { %v1595_v28 = vmax.f32 %v1563_v35, 0.0  ;;  %v1459_v29 = vadd.f32 %v1458_v49, %v1153_v25  ;;  %v1625_v34 = vpack.c.bf16 %v1597_v24, %v1596_v30  ;;  %v1568_v43 = vadd.f32 %v3906_v32, %v1467_v31 }
 0x2be   : > { %v3058_v33 = vpop.f32.mrf.mxu0 }
 0x2bf   : > { %v1624_v45 = vpack.c.bf16 %v1595_v28, %v1594_v27  ;;  %v1470_v36 = vadd.f32 %v3106_v50, %v3058_v33  ;;  %v1566_v40 = vadd.f32 %v3906_v32, %v1459_v29  ;;  %v3118_v50 = vpop.f32.mrf.mxu1  ;;  %v1600_v61 = vmax.f32 %v1568_v43, 0.0 }
 0x2c0   : > { %v1156_v38 = vpop.f32.mrf.mxu0 }
 0x2c1   : > { %v1569_v41 = vadd.f32 %v3906_v32, %v1470_v36  ;;  %v1462_v42 = vadd.f32 %v1461_v52, %v1156_v38  ;;  %3143 = vmatprep.mubr.msk.bf16.mxu0 %vm406_vm0, %v1624_v45  ;;  %v1598_v58 = vmax.f32 %v1566_v40, 0.0  ;;  %v1509_v3 = vpop.f32.mrf.mxu1 }
 0x2c2   : > { %v3061_v44 = vpop.f32.mrf.mxu0  ;;  %3144 = vmatmul.mubr.msk.bf16.gmra.mxu0 %vm406_vm0, %v1625_v34 }
 0x2c3   : > { %v1567_v47 = vadd.f32 %v3906_v32, %v1462_v42  ;;  %v1601_v48 = vmax.f32 %v1569_v41, 0.0  ;;  %v1483_v62 = vadd.f32 %v3893_v53, %v3061_v44  ;;  %v3121_v11 = vpop.f32.mrf.mxu1 }
 0x2c4   : > { %v1169_v49 = vpop.f32.mrf.mxu0 }
 0x2c5   : > { %v1599_v51 = vmax.f32 %v1567_v47, 0.0  ;;  %v1475_v60 = vadd.f32 %v3895_v54, %v1169_v49  ;;  %v1627_v1 = vpack.c.bf16 %v1601_v48, %v1600_v61  ;;  %v1572_v54 = vadd.f32 %v3906_v32, %v1483_v62  ;;  %v1522_v9 = vpop.f32.mrf.mxu1 }
 0x2c6   : > { %v3062_v52 = vpop.f32.mrf.mxu0 }
 0x2c7   : > { %v1626_v63 = vpack.c.bf16 %v1599_v51, %v1598_v58  ;;  %v1486_v37 = vadd.f32 %v3897_v56, %v3062_v52  ;;  %v1570_v4 = vadd.f32 %v3906_v32, %v1475_v60  ;;  %v1604_v13 = vmax.f32 %v1572_v54, 0.0  ;;  %v3122_v24 = vpop.f32.mrf.mxu1 }
 0x2c8   : > { %v1172_v2 = vpop.f32.mrf.mxu0 }
 0x2c9   : > { %v1573_v5 = vadd.f32 %v3906_v32, %v1486_v37  ;;  %v1478_v6 = vadd.f32 %v3899_v57, %v1172_v2  ;;  %3147 = vmatprep.mubr.msk.bf16.mxu0 %vm406_vm0, %v1626_v63  ;;  %v1602_v12 = vmax.f32 %v1570_v4, 0.0  ;;  %v1525_v34 = vpop.f32.mrf.mxu1 }
 0x2ca   : > { %v3065_v7 = vpop.f32.mrf.mxu0  ;;  %3148 = vmatmul.mubr.msk.bf16.gmra.mxu0 %vm406_vm0, %v1627_v1 }
 0x2cb   : > { %v1571_v53 = vadd.f32 %v3906_v32, %v1478_v6  ;;  %v1605_v8 = vmax.f32 %v1573_v5, 0.0  ;;  %v1499_v14 = vadd.f32 %v3901_v59, %v3065_v7  ;;  %v3125_v47 = vpop.f32.mrf.mxu1 }
 0x2cc   : > { %v1185_v56 = vpop.f32.mrf.mxu0 }
 0x2cd   : > { %v1603_v46 = vmax.f32 %v1571_v53, 0.0  ;;  %v1491_v55 = vadd.f32 %v3908_v0, %v1185_v56  ;;  %v1629_v17 = vpack.c.bf16 %v1605_v8, %v1604_v13  ;;  %v1576_v0 = vadd.f32 %v3906_v32, %v1499_v14  ;;  %v1538_v63 = vpop.f32.mrf.mxu1 }
 0x2ce   : > { %v3066_v57 = vpop.f32.mrf.mxu0 }
 0x2cf   : > { %v1628_v15 = vpack.c.bf16 %v1603_v46, %v1602_v12  ;;  %v1502_v16 = vadd.f32 %v3914_v10, %v3066_v57  ;;  %v1574_v20 = vadd.f32 %v3906_v32, %v1491_v55  ;;  %v1608_v29 = vmax.f32 %v1576_v0, 0.0  ;;  %v3126_v7 = vpop.f32.mrf.mxu1 }
 0x2d0   : > { %v1188_v18 = vpop.f32.mrf.mxu0 }
 0x2d1   : > { %v1577_v21 = vadd.f32 %v3906_v32, %v1502_v16  ;;  %v1494_v22 = vadd.f32 %v3916_v19, %v1188_v18  ;;  %3151 = vmatprep.mubr.msk.bf16.mxu0 %vm406_vm0, %v1628_v15  ;;  %v1606_v25 = vmax.f32 %v1574_v20, 0.0  ;;  %v1541_v15 = vpop.f32.mrf.mxu1 }
 0x2d2   : > { %v3069_v23 = vpop.f32.mrf.mxu0  ;;  %3152 = vmatmul.mubr.msk.bf16.gmra.mxu0 %vm406_vm0, %v1629_v17 }
 0x2d3   : > { %v1575_v59 = vadd.f32 %v3906_v32, %v1494_v22  ;;  %v1609_v35 = vmax.f32 %v1577_v21, 0.0  ;;  %v1515_v30 = vadd.f32 %v3924_v26, %v3069_v23 }
 0x2d4   : > { %v1201_v10 = vpop.f32.mrf.mxu0 }
 0x2d5   : > { %v1607_v27 = vmax.f32 %v1575_v59, 0.0  ;;  %v1507_v28 = vadd.f32 %v1506_v39, %v1201_v10  ;;  %v1631_v45 = vpack.c.bf16 %v1609_v35, %v1608_v29  ;;  %v1580_v42 = vadd.f32 %v3906_v32, %v1515_v30  ;;  %v3985_v30 = vld [vmem:[%s4213_s3 + $0x3] ss:$0 sm:$0xff] }
 0x2d6   : > { %v3070_v31 = vpop.f32.mrf.mxu0 }
 0x2d7   : > { %v1630_v19 = vpack.c.bf16 %v1607_v27, %v1606_v25  ;;  %v1518_v33 = vadd.f32 %v3118_v50, %v3070_v31  ;;  %v1578_v38 = vadd.f32 %v3906_v32, %v1507_v28  ;;  %v1612_v58 = vmax.f32 %v1580_v42, 0.0  ;;  %v3380_v25 = vld [vmem:[%s4212_s2 + $0x110] sm:$0xff]  }
 0x2d8   : > { %v1204_v36 = vpop.f32.mrf.mxu0 }
 0x2d9   : > { %v1581_v40 = vadd.f32 %v3906_v32, %v1518_v33  ;;  %v1510_v41 = vadd.f32 %v1509_v3, %v1204_v36  ;;  %3155 = vmatprep.mubr.msk.bf16.mxu0 %vm406_vm0, %v1630_v19  ;;  %v1610_v48 = vmax.f32 %v1578_v38, 0.0 }
 0x2da   : > { %v3073_v43 = vpop.f32.mrf.mxu0  ;;  %3156 = vmatmul.mubr.msk.bf16.gmra.mxu0 %vm406_vm0, %v1631_v45 }
 0x2db   : > { %v1579_v26 = vadd.f32 %v3906_v32, %v1510_v41  ;;  %v1613_v39 = vmax.f32 %v1581_v40, 0.0  ;;  %v1531_v51 = vadd.f32 %v3121_v11, %v3073_v43 }
 0x2dc   : > { %v1217_v44 = vpop.f32.mrf.mxu0 }
 0x2dd   : > { %v1611_v49 = vmax.f32 %v1579_v26, 0.0  ;;  %v1523_v50 = vadd.f32 %v1522_v9, %v1217_v44  ;;  %v1633_v52 = vpack.c.bf16 %v1613_v39, %v1612_v58  ;;  %v1584_v4 = vadd.f32 %v3906_v32, %v1531_v51 }
 0x2de   : > { %v3074_v60 = vpop.f32.mrf.mxu0 }
 0x2df   : > { %v1632_v61 = vpack.c.bf16 %v1611_v49, %v1610_v48  ;;  %v1534_v62 = vadd.f32 %v3122_v24, %v3074_v60  ;;  %v1582_v1 = vadd.f32 %v3906_v32, %v1523_v50  ;;  %v1616_v12 = vmax.f32 %v1584_v4, 0.0  ;;  %v3378_v24 = vld [vmem:[%s4212_s2 + $0xe0] sm:$0xff]  }
 0x2e0   : > { %v1220_v37 = vpop.f32.mrf.mxu0  ;;  %3181 = vmatprep.subr.bf16.mxu1 %v3378_v24 }
 0x2e1   : > { %v1585_v2 = vadd.f32 %v3906_v32, %v1534_v62  ;;  %v1526_v3 = vadd.f32 %v1525_v34, %v1220_v37  ;;  %3159 = vmatprep.mubr.msk.bf16.mxu0 %vm406_vm0, %v1632_v61  ;;  %v1614_v8 = vmax.f32 %v1582_v1, 0.0  ;;  %3182 = vmatpush3.bf16.msra.mxu1 %v3378_v24 }
 0x2e2   : > { %v3077_v5 = vpop.f32.mrf.mxu0  ;;  %3160 = vmatmul.mubr.msk.bf16.gmra.mxu0 %vm406_vm0, %v1633_v52 }
 0x2e3   : > { %v1583_v6 = vadd.f32 %v3906_v32, %v1526_v3  ;;  %v1617_v54 = vmax.f32 %v1585_v2, 0.0  ;;  %v1547_v46 = vadd.f32 %v3125_v47, %v3077_v5 }
 0x2e4   : > { %v1233_v53 = vpop.f32.mrf.mxu0 }
 0x2e5   : > { %v1615_v56 = vmax.f32 %v1583_v6, 0.0  ;;  %v1539_v11 = vadd.f32 %v1538_v63, %v1233_v53  ;;  %v1635_v57 = vpack.c.bf16 %v1617_v54, %v1616_v12  ;;  %v1588_v20 = vadd.f32 %v3906_v32, %v1547_v46 }
 0x2e6   : > { %v3078_v55 = vpop.f32.mrf.mxu0 }
 0x2e7   : > { %v1634_v13 = vpack.c.bf16 %v1615_v56, %v1614_v8  ;;  %v1550_v14 = vadd.f32 %v3126_v7, %v3078_v55  ;;  %v1586_v17 = vadd.f32 %v3906_v32, %v1539_v11  ;;  %v1620_v59 = vmax.f32 %v1588_v20, 0.0 }
 0x2e8   : > { %v1236_v16 = vpop.f32.mrf.mxu0 }
 0x2e9   : > { %v1589_v18 = vadd.f32 %v3906_v32, %v1550_v14  ;;  %v1542_v9 = vadd.f32 %v1541_v15, %v1236_v16  ;;  %3163 = vmatprep.mubr.msk.bf16.mxu0 %vm406_vm0, %v1634_v13  ;;  %v1618_v0 = vmax.f32 %v1586_v17, 0.0 }
 0x2ea   : > { %3164 = vmatmul.mubr.msk.bf16.gmra.mxu0 %vm406_vm0, %v1635_v57 }
 0x2eb   : > { %v1587_v21 = vadd.f32 %v3906_v32, %v1542_v9  ;;  %v1621_v22 = vmax.f32 %v1589_v18, 0.0  ;;  %v3379_v32 = vld [vmem:[%s4212_s2 + $0x118] sm:$0xff]  }
 0x2ec   : > { %3215 = vmatprep.subr.bf16.mxu0 %v3379_v32 }
 0x2ed   : > { %v1619_v23 = vmax.f32 %v1587_v21, 0.0  ;;  %v1637_v10 = vpack.c.bf16 %v1621_v22, %v1620_v59  ;;  %3216 = vmatpush3.bf16.msra.mxu0 %v3379_v32 }
 0x2ee   : > { %3217 = vmatprep.subr.bf16.mxu0 %v3380_v25 }
 0x2ef   : > { %v1636_v35 = vpack.c.bf16 %v1619_v23, %v1618_v0 }
 0x2f1   : > { %3167 = vmatprep.mubr.msk.bf16.mxu0 %vm406_vm0, %v1636_v35  ;;  %3218 = vmatpush3.bf16.msra.mxu0 %v3380_v25 }
 0x2f2   : > { %3168 = vmatmul.mubr.msk.bf16.gmra.mxu0 %vm406_vm0, %v1637_v10 }
 0x37a   : > { %v3141_v27 = vpop.f32.mrf.mxu0 }
 0x37b   : > { %v1782_v36 = vadd.f32 %v3141_v27, %v3985_v30 }
 0x37c   : > { %v1773_v28 = vpop.f32.mrf.mxu0 }
 0x37d   : > { %v1774_v33 = vadd.f32 %v3985_v30, %v1773_v28 }
 0x37e   : > { %v3142_v29 = vpop.f32.mrf.mxu0 }
 0x37f   : > { %v1785_v31 = vadd.f32 %v3142_v29, %v3985_v30 }
 0x380   : > { %v1776_v19 = vpop.f32.mrf.mxu0 }
 0x381   : > { %v1777_v45 = vadd.f32 %v3985_v30, %v1776_v19  ;;  %v1901_v40 = vpack.c.bf16 %v1785_v31, %v1782_v36 }
 0x382   : > { %v3145_v34 = vpop.f32.mrf.mxu0 }
 0x383   : > { %v1900_v38 = vpack.c.bf16 %v1777_v45, %v1774_v33  ;;  %v1798_v47 = vadd.f32 %v3145_v34, %v3985_v30 }
 0x384   : > { %v1789_v41 = vpop.f32.mrf.mxu0 }
 0x385   : > { %3183 = vmatprep.mubr.msk.bf16.mxu1 %vm406_vm0, %v1900_v38  ;;  %v1790_v39 = vadd.f32 %v3985_v30, %v1789_v41 }
 0x386   : > { %v3146_v42 = vpop.f32.mrf.mxu0  ;;  %3184 = vmatmul.mubr.msk.bf16.vlgmr.msra.gmra.mxu1 %vm406_vm0, %v1901_v40 }
 0x387   : > { %v1801_v43 = vadd.f32 %v3146_v42, %v3985_v30 }
 0x388   : > { %v1792_v26 = vpop.f32.mrf.mxu0 }
 0x389   : > { %v1793_v44 = vadd.f32 %v3985_v30, %v1792_v26  ;;  %v1903_v50 = vpack.c.bf16 %v1801_v43, %v1798_v47 }
 0x38a   : > { %v3149_v48 = vpop.f32.mrf.mxu0 }
 0x38b   : > { %v1902_v49 = vpack.c.bf16 %v1793_v44, %v1790_v39  ;;  %v1814_v63 = vadd.f32 %v3149_v48, %v3985_v30 }
 0x38c   : > { %v1805_v58 = vpop.f32.mrf.mxu0 }
 0x38d   : > { %3187 = vmatprep.mubr.msk.bf16.mxu1 %vm406_vm0, %v1902_v49  ;;  %v1806_v62 = vadd.f32 %v3985_v30, %v1805_v58  ;;  %v4038_v49 = vld [vmem:[%s4213_s3 + $0x4] ss:$0 sm:$0xff] }
 0x38e   : > { %v3150_v51 = vpop.f32.mrf.mxu0  ;;  %3188 = vmatmul.mubr.msk.bf16.gmra.mxu1 %vm406_vm0, %v1903_v50 }
 0x38f   : > { %v1817_v60 = vadd.f32 %v3150_v51, %v3985_v30 }
 0x390   : > { %v1808_v61 = vpop.f32.mrf.mxu0 }
 0x391   : > { %v1809_v52 = vadd.f32 %v3985_v30, %v1808_v61  ;;  %v1905_v2 = vpack.c.bf16 %v1817_v60, %v1814_v63 }
 0x392   : > { %v3153_v37 = vpop.f32.mrf.mxu0 }
 0x393   : > { %v1904_v1 = vpack.c.bf16 %v1809_v52, %v1806_v62  ;;  %v1830_v53 = vadd.f32 %v3153_v37, %v3985_v30 }
 0x394   : > { %v1821_v3 = vpop.f32.mrf.mxu0 }
 0x395   : > { %3191 = vmatprep.mubr.msk.bf16.mxu1 %vm406_vm0, %v1904_v1  ;;  %v1822_v54 = vadd.f32 %v3985_v30, %v1821_v3 }
 0x396   : > { %v3154_v4 = vpop.f32.mrf.mxu0  ;;  %3192 = vmatmul.mubr.msk.bf16.gmra.mxu1 %vm406_vm0, %v1905_v2 }
 0x397   : > { %v1833_v5 = vadd.f32 %v3154_v4, %v3985_v30 }
 0x398   : > { %v1824_v6 = vpop.f32.mrf.mxu0 }
 0x399   : > { %v1825_v7 = vadd.f32 %v3985_v30, %v1824_v6  ;;  %v1907_v11 = vpack.c.bf16 %v1833_v5, %v1830_v53 }
 0x39a   : > { %v3157_v8 = vpop.f32.mrf.mxu0 }
 0x39b   : > { %v1906_v56 = vpack.c.bf16 %v1825_v7, %v1822_v54  ;;  %v1846_v15 = vadd.f32 %v3157_v8, %v3985_v30 }
 0x39c   : > { %v1837_v12 = vpop.f32.mrf.mxu0 }
 0x39d   : > { %3195 = vmatprep.mubr.msk.bf16.mxu1 %vm406_vm0, %v1906_v56  ;;  %v1838_v14 = vadd.f32 %v3985_v30, %v1837_v12 }
 0x39e   : > { %v3158_v46 = vpop.f32.mrf.mxu0  ;;  %3196 = vmatmul.mubr.msk.bf16.gmra.mxu1 %vm406_vm0, %v1907_v11 }
 0x39f   : > { %v1849_v55 = vadd.f32 %v3158_v46, %v3985_v30 }
 0x3a0   : > { %v1840_v13 = vpop.f32.mrf.mxu0 }
 0x3a1   : > { %v1841_v57 = vadd.f32 %v3985_v30, %v1840_v13  ;;  %v1909_v18 = vpack.c.bf16 %v1849_v55, %v1846_v15 }
 0x3a2   : > { %v3161_v16 = vpop.f32.mrf.mxu0 }
 0x3a3   : > { %v1908_v17 = vpack.c.bf16 %v1841_v57, %v1838_v14  ;;  %v1862_v59 = vadd.f32 %v3161_v16, %v3985_v30 }
 0x3a4   : > { %v1853_v9 = vpop.f32.mrf.mxu0 }
 0x3a5   : > { %3199 = vmatprep.mubr.msk.bf16.mxu1 %vm406_vm0, %v1908_v17  ;;  %v1854_v0 = vadd.f32 %v3985_v30, %v1853_v9 }
 0x3a6   : > { %v3162_v20 = vpop.f32.mrf.mxu0  ;;  %3200 = vmatmul.mubr.msk.bf16.gmra.mxu1 %vm406_vm0, %v1909_v18 }
 0x3a7   : > { %v1865_v21 = vadd.f32 %v3162_v20, %v3985_v30 }
 0x3a8   : > { %v1856_v22 = vpop.f32.mrf.mxu0 }
 0x3a9   : > { %v1857_v23 = vadd.f32 %v3985_v30, %v1856_v22  ;;  %v1911_v24 = vpack.c.bf16 %v1865_v21, %v1862_v59 }
 0x3aa   : > { %v3165_v35 = vpop.f32.mrf.mxu0 }
 0x3ab   : > { %v1910_v10 = vpack.c.bf16 %v1857_v23, %v1854_v0  ;;  %v1878_v19 = vadd.f32 %v3165_v35, %v3985_v30 }
 0x3ac   : > { %v1869_v32 = vpop.f32.mrf.mxu0 }
 0x3ad   : > { %3203 = vmatprep.mubr.msk.bf16.mxu1 %vm406_vm0, %v1910_v10  ;;  %v1870_v29 = vadd.f32 %v3985_v30, %v1869_v32 }
 0x3ae   : > { %v3166_v25 = vpop.f32.mrf.mxu0  ;;  %3204 = vmatmul.mubr.msk.bf16.gmra.mxu1 %vm406_vm0, %v1911_v24 }
 0x3af   : > { %v1881_v27 = vadd.f32 %v3166_v25, %v3985_v30 }
 0x3b0   : > { %v1872_v28 = vpop.f32.mrf.mxu0 }
 0x3b1   : > { %v1873_v31 = vadd.f32 %v3985_v30, %v1872_v28  ;;  %v1913_v36 = vpack.c.bf16 %v1881_v27, %v1878_v19 }
 0x3b2   : > { %v3169_v33 = vpop.f32.mrf.mxu0 }
 0x3b3   : > { %v1912_v45 = vpack.c.bf16 %v1873_v31, %v1870_v29  ;;  %v1894_v26 = vadd.f32 %v3169_v33, %v3985_v30 }
 0x3b4   : > { %v1885_v34 = vpop.f32.mrf.mxu0 }
 0x3b5   : > { %3207 = vmatprep.mubr.msk.bf16.mxu1 %vm406_vm0, %v1912_v45  ;;  %v1886_v42 = vadd.f32 %v3985_v30, %v1885_v34 }
 0x3b6   : > { %v3170_v38 = vpop.f32.mrf.mxu0  ;;  %3208 = vmatmul.mubr.msk.bf16.gmra.mxu1 %vm406_vm0, %v1913_v36 }
 0x3b7   : > { %v1897_v40 = vadd.f32 %v3170_v38, %v3985_v30 }
 0x3b8   : > { %v1888_v41 = vpop.f32.mrf.mxu0 }
 0x3b9   : > { %v1889_v43 = vadd.f32 %v3985_v30, %v1888_v41  ;;  %v1915_v44 = vpack.c.bf16 %v1897_v40, %v1894_v26 }
 0x3bb   : > { %v1914_v39 = vpack.c.bf16 %v1889_v43, %v1886_v42 }
 0x3bd   : > { %3211 = vmatprep.mubr.msk.bf16.mxu1 %vm406_vm0, %v1914_v39 }
 0x3be   : > { %3212 = vmatmul.mubr.msk.bf16.gmra.mxu1 %vm406_vm0, %v1915_v44 }
 0x446   : > { %v3185_v47 = vpop.f32.mrf.mxu1 }
 0x447   : > { %v2060_v30 = vadd.f32 %v3185_v47, %v4038_v49 }
 0x448   : > { %v2051_v48 = vpop.f32.mrf.mxu1 }
 0x449   : > { %v2052_v58 = vadd.f32 %v4038_v49, %v2051_v48  ;;  %v2180_v1 = vmax.f32 %v2060_v30, 0.0 }
 0x44a   : > { %v3186_v50 = vpop.f32.mrf.mxu1 }
 0x44b   : > { %v2063_v51 = vadd.f32 %v3186_v50, %v4038_v49  ;;  %v2178_v63 = vmax.f32 %v2052_v58, 0.0 }
 0x44c   : > { %v2054_v60 = vpop.f32.mrf.mxu1 }
 0x44d   : > { %v2055_v61 = vadd.f32 %v4038_v49, %v2054_v60  ;;  %v2181_v62 = vmax.f32 %v2063_v51, 0.0 }
 0x44e   : > { %v3189_v52 = vpop.f32.mrf.mxu1 }
 0x44f   : > { %v2179_v37 = vmax.f32 %v2055_v61, 0.0  ;;  %v2211_v4 = vpack.c.bf16 %v2181_v62, %v2180_v1  ;;  %v2076_v7 = vadd.f32 %v3189_v52, %v4038_v49 }
 0x450   : > { %v2067_v2 = vpop.f32.mrf.mxu1 }
 0x451   : > { %v2210_v3 = vpack.c.bf16 %v2179_v37, %v2178_v63  ;;  %v2068_v6 = vadd.f32 %v4038_v49, %v2067_v2  ;;  %v2184_v55 = vmax.f32 %v2076_v7, 0.0 }
 0x452   : > { %v3190_v5 = vpop.f32.mrf.mxu1 }
 0x453   : > { %v2079_v54 = vadd.f32 %v3190_v5, %v4038_v49  ;;  %3219 = vmatprep.mubr.msk.bf16.mxu0 %vm1038_vm1, %v2210_v3  ;;  %v2182_v12 = vmax.f32 %v2068_v6, 0.0 }
 0x454   : > { %v2070_v53 = vpop.f32.mrf.mxu1  ;;  %3220 = vmatmul.mubr.msk.bf16.vlgmr.msra.gmra.mxu0 %vm1038_vm1, %v2211_v4 }
 0x455   : > { %v2071_v8 = vadd.f32 %v4038_v49, %v2070_v53  ;;  %v2185_v56 = vmax.f32 %v2079_v54, 0.0 }
 0x456   : > { %v3193_v11 = vpop.f32.mrf.mxu1 }
 0x457   : > { %v2183_v46 = vmax.f32 %v2071_v8, 0.0  ;;  %v2213_v57 = vpack.c.bf16 %v2185_v56, %v2184_v55  ;;  %v2092_v18 = vadd.f32 %v3193_v11, %v4038_v49 }
 0x458   : > { %v2083_v13 = vpop.f32.mrf.mxu1 }
 0x459   : > { %v2212_v14 = vpack.c.bf16 %v2183_v46, %v2182_v12  ;;  %v2084_v16 = vadd.f32 %v4038_v49, %v2083_v13  ;;  %v2188_v59 = vmax.f32 %v2092_v18, 0.0 }
 0x45a   : > { %v3194_v15 = vpop.f32.mrf.mxu1 }
 0x45b   : > { %v2095_v17 = vadd.f32 %v3194_v15, %v4038_v49  ;;  %3223 = vmatprep.mubr.msk.bf16.mxu0 %vm1038_vm1, %v2212_v14  ;;  %v2186_v0 = vmax.f32 %v2084_v16, 0.0 }
 0x45c   : > { %v2086_v9 = vpop.f32.mrf.mxu1  ;;  %3224 = vmatmul.mubr.msk.bf16.gmra.mxu0 %vm1038_vm1, %v2213_v57 }
 0x45d   : > { %v2087_v20 = vadd.f32 %v4038_v49, %v2086_v9  ;;  %v2189_v21 = vmax.f32 %v2095_v17, 0.0 }
 0x45e   : > { %v3197_v22 = vpop.f32.mrf.mxu1 }
 0x45f   : > { %v2187_v23 = vmax.f32 %v2087_v20, 0.0  ;;  %v2215_v24 = vpack.c.bf16 %v2189_v21, %v2188_v59  ;;  %v2108_v28 = vadd.f32 %v3197_v22, %v4038_v49 }
 0x460   : > { %v2099_v35 = vpop.f32.mrf.mxu1 }
 0x461   : > { %v2214_v10 = vpack.c.bf16 %v2187_v23, %v2186_v0  ;;  %v2100_v25 = vadd.f32 %v4038_v49, %v2099_v35  ;;  %v2192_v34 = vmax.f32 %v2108_v28, 0.0 }
 0x462   : > { %v3198_v32 = vpop.f32.mrf.mxu1 }
 0x463   : > { %v2111_v27 = vadd.f32 %v3198_v32, %v4038_v49  ;;  %3227 = vmatprep.mubr.msk.bf16.mxu0 %vm1038_vm1, %v2214_v10  ;;  %v2190_v45 = vmax.f32 %v2100_v25, 0.0 }
 0x464   : > { %v2102_v29 = vpop.f32.mrf.mxu1  ;;  %3228 = vmatmul.mubr.msk.bf16.gmra.mxu0 %vm1038_vm1, %v2215_v24 }
 0x465   : > { %v2103_v31 = vadd.f32 %v4038_v49, %v2102_v29  ;;  %v2193_v19 = vmax.f32 %v2111_v27, 0.0 }
 0x466   : > { %v3201_v33 = vpop.f32.mrf.mxu1 }
 0x467   : > { %v2191_v36 = vmax.f32 %v2103_v31, 0.0  ;;  %v2217_v41 = vpack.c.bf16 %v2193_v19, %v2192_v34  ;;  %v2124_v39 = vadd.f32 %v3201_v33, %v4038_v49  ;;  %v4091_v31 = vld [vmem:[%s4213_s3 + $0x5] ss:$0 sm:$0xff] }
 0x468   : > { %v2115_v38 = vpop.f32.mrf.mxu1 }
 0x469   : > { %v2216_v40 = vpack.c.bf16 %v2191_v36, %v2190_v45  ;;  %v2116_v43 = vadd.f32 %v4038_v49, %v2115_v38  ;;  %v2196_v30 = vmax.f32 %v2124_v39, 0.0 }
 0x46a   : > { %v3202_v42 = vpop.f32.mrf.mxu1 }
 0x46b   : > { %v2127_v26 = vadd.f32 %v3202_v42, %v4038_v49  ;;  %3231 = vmatprep.mubr.msk.bf16.mxu0 %vm1038_vm1, %v2216_v40  ;;  %v2194_v58 = vmax.f32 %v2116_v43, 0.0 }
 0x46c   : > { %v2118_v44 = vpop.f32.mrf.mxu1  ;;  %3232 = vmatmul.mubr.msk.bf16.gmra.mxu0 %vm1038_vm1, %v2217_v41 }
 0x46d   : > { %v2119_v47 = vadd.f32 %v4038_v49, %v2118_v44  ;;  %v2197_v48 = vmax.f32 %v2127_v26, 0.0 }
 0x46e   : > { %v3205_v50 = vpop.f32.mrf.mxu1 }
 0x46f   : > { %v2195_v51 = vmax.f32 %v2119_v47, 0.0  ;;  %v2219_v62 = vpack.c.bf16 %v2197_v48, %v2196_v30  ;;  %v2140_v1 = vadd.f32 %v3205_v50, %v4038_v49 }
 0x470   : > { %v2131_v60 = vpop.f32.mrf.mxu1 }
 0x471   : > { %v2218_v61 = vpack.c.bf16 %v2195_v51, %v2194_v58  ;;  %v2132_v63 = vadd.f32 %v4038_v49, %v2131_v60  ;;  %v2200_v7 = vmax.f32 %v2140_v1, 0.0 }
 0x472   : > { %v3206_v52 = vpop.f32.mrf.mxu1 }
 0x473   : > { %v2143_v37 = vadd.f32 %v3206_v52, %v4038_v49  ;;  %3235 = vmatprep.mubr.msk.bf16.mxu0 %vm1038_vm1, %v2218_v61  ;;  %v2198_v6 = vmax.f32 %v2132_v63, 0.0 }
 0x474   : > { %v2134_v2 = vpop.f32.mrf.mxu1  ;;  %3236 = vmatmul.mubr.msk.bf16.gmra.mxu0 %vm1038_vm1, %v2219_v62 }
 0x475   : > { %v2135_v3 = vadd.f32 %v4038_v49, %v2134_v2  ;;  %v2201_v4 = vmax.f32 %v2143_v37, 0.0 }
 0x476   : > { %v3209_v5 = vpop.f32.mrf.mxu1 }
 0x477   : > { %v2199_v54 = vmax.f32 %v2135_v3, 0.0  ;;  %v2221_v56 = vpack.c.bf16 %v2201_v4, %v2200_v7  ;;  %v2156_v55 = vadd.f32 %v3209_v5, %v4038_v49 }
 0x478   : > { %v2147_v53 = vpop.f32.mrf.mxu1 }
 0x479   : > { %v2220_v8 = vpack.c.bf16 %v2199_v54, %v2198_v6  ;;  %v2148_v12 = vadd.f32 %v4038_v49, %v2147_v53  ;;  %v2204_v18 = vmax.f32 %v2156_v55, 0.0 }
 0x47a   : > { %v3210_v11 = vpop.f32.mrf.mxu1 }
 0x47b   : > { %v2159_v46 = vadd.f32 %v3210_v11, %v4038_v49  ;;  %3239 = vmatprep.mubr.msk.bf16.mxu0 %vm1038_vm1, %v2220_v8  ;;  %v2202_v16 = vmax.f32 %v2148_v12, 0.0 }
 0x47c   : > { %v2150_v13 = vpop.f32.mrf.mxu1  ;;  %3240 = vmatmul.mubr.msk.bf16.gmra.mxu0 %vm1038_vm1, %v2221_v56 }
 0x47d   : > { %v2151_v14 = vadd.f32 %v4038_v49, %v2150_v13  ;;  %v2205_v57 = vmax.f32 %v2159_v46, 0.0 }
 0x47e   : > { %v3213_v15 = vpop.f32.mrf.mxu1 }
 0x47f   : > { %v2203_v17 = vmax.f32 %v2151_v14, 0.0  ;;  %v2223_v21 = vpack.c.bf16 %v2205_v57, %v2204_v18  ;;  %v2172_v59 = vadd.f32 %v3213_v15, %v4038_v49 }
 0x480   : > { %v2163_v9 = vpop.f32.mrf.mxu1 }
 0x481   : > { %v2222_v20 = vpack.c.bf16 %v2203_v17, %v2202_v16  ;;  %v2164_v0 = vadd.f32 %v4038_v49, %v2163_v9  ;;  %v2208_v27 = vmax.f32 %v2172_v59, 0.0 }
 0x482   : > { %v3214_v22 = vpop.f32.mrf.mxu1 }
 0x483   : > { %v2175_v23 = vadd.f32 %v3214_v22, %v4038_v49  ;;  %3243 = vmatprep.mubr.msk.bf16.mxu0 %vm1038_vm1, %v2222_v20  ;;  %v2206_v32 = vmax.f32 %v2164_v0, 0.0 }
 0x484   : > { %v2166_v35 = vpop.f32.mrf.mxu1  ;;  %3244 = vmatmul.mubr.msk.bf16.gmra.mxu0 %vm1038_vm1, %v2223_v21 }
 0x485   : > { %v2167_v10 = vadd.f32 %v4038_v49, %v2166_v35  ;;  %v2209_v24 = vmax.f32 %v2175_v23, 0.0 }
 0x487   : > { %v2207_v25 = vmax.f32 %v2167_v10, 0.0  ;;  %v2225_v29 = vpack.c.bf16 %v2209_v24, %v2208_v27 }
 0x489   : > { %v2224_v28 = vpack.c.bf16 %v2207_v25, %v2206_v32 }
 0x48b   : > { %3247 = vmatprep.mubr.msk.bf16.mxu0 %vm1038_vm1, %v2224_v28 }
 0x48c   : > { %3248 = vmatmul.mubr.msk.bf16.gmra.mxu0 %vm1038_vm1, %v2225_v29 }
 0x514   : > { %v3221_v19 = vpop.f32.mrf.mxu0 }
 0x515   : > { %v2338_v33 = vadd.f32 %v3221_v19, %v4091_v31 }
 0x516   : > { %v2329_v49 = vpop.f32.mrf.mxu0 }
 0x517   : > { %v2458_v45 = vmax.f32 %v2338_v33, 0.0  ;;  %v2330_v36 = vadd.f32 %v4091_v31, %v2329_v49 }
 0x518   : > { %v3222_v34 = vpop.f32.mrf.mxu0 }
 0x519   : > { %2490 = vst [vmem:[%s4096_s14 + $0x10] sm:$0xff] %v2458_v45  ;;  %v2456_v38 = vmax.f32 %v2330_v36, 0.0  ;;  %v2341_v40 = vadd.f32 %v3222_v34, %v4091_v31 }
 0x51a   : > { %v2332_v41 = vpop.f32.mrf.mxu0 }
 0x51b   : > { %2488 = vst [vmem:[%s4096_s14] sm:$0xff] %v2456_v38  ;;  %v2459_v42 = vmax.f32 %v2341_v40, 0.0  ;;  %v2333_v43 = vadd.f32 %v4091_v31, %v2332_v41 }
 0x51c   : > { %v3225_v26 = vpop.f32.mrf.mxu0 }
 0x51d   : > { %2491 = vst [vmem:[%s4096_s14 + $0x18] sm:$0xff] %v2459_v42  ;;  %v2457_v39 = vmax.f32 %v2333_v43, 0.0  ;;  %v2354_v44 = vadd.f32 %v3225_v26, %v4091_v31 }
 0x51e   : > { %v2345_v47 = vpop.f32.mrf.mxu0 }
 0x51f   : > { %2489 = vst [vmem:[%s4096_s14 + $0x8] sm:$0xff] %v2457_v39  ;;  %v2462_v48 = vmax.f32 %v2354_v44, 0.0  ;;  %v2346_v50 = vadd.f32 %v4091_v31, %v2345_v47 }
 0x520   : > { %v3226_v58 = vpop.f32.mrf.mxu0 }
 0x521   : > { %2494 = vst [vmem:[%s4096_s14 + $0x30] sm:$0xff] %v2462_v48  ;;  %v2460_v51 = vmax.f32 %v2346_v50, 0.0  ;;  %v2357_v30 = vadd.f32 %v3226_v58, %v4091_v31 }
 0x522   : > { %v2348_v60 = vpop.f32.mrf.mxu0 }
 0x523   : > { %2492 = vst [vmem:[%s4096_s14 + $0x20] sm:$0xff] %v2460_v51  ;;  %v2463_v61 = vmax.f32 %v2357_v30, 0.0  ;;  %v2349_v62 = vadd.f32 %v4091_v31, %v2348_v60 }
 0x524   : > { %v3229_v52 = vpop.f32.mrf.mxu0 }
 0x525   : > { %2495 = vst [vmem:[%s4096_s14 + $0x38] sm:$0xff] %v2463_v61  ;;  %v2461_v63 = vmax.f32 %v2349_v62, 0.0  ;;  %v2370_v37 = vadd.f32 %v3229_v52, %v4091_v31 }
 0x526   : > { %v2361_v1 = vpop.f32.mrf.mxu0 }
 0x527   : > { %2493 = vst [vmem:[%s4096_s14 + $0x28] sm:$0xff] %v2461_v63  ;;  %v2466_v2 = vmax.f32 %v2370_v37, 0.0  ;;  %v2362_v3 = vadd.f32 %v4091_v31, %v2361_v1 }
 0x528   : > { %v3230_v4 = vpop.f32.mrf.mxu0 }
 0x529   : > { %2498 = vst [vmem:[%s4096_s14 + $0x50] sm:$0xff] %v2466_v2  ;;  %v2464_v5 = vmax.f32 %v2362_v3, 0.0  ;;  %v2373_v6 = vadd.f32 %v3230_v4, %v4091_v31 }
 0x52a   : > { %v2364_v54 = vpop.f32.mrf.mxu0 }
 0x52b   : > { %2496 = vst [vmem:[%s4096_s14 + $0x40] sm:$0xff] %v2464_v5  ;;  %v2467_v7 = vmax.f32 %v2373_v6, 0.0  ;;  %v2365_v53 = vadd.f32 %v4091_v31, %v2364_v54 }
 0x52c   : > { %v3233_v8 = vpop.f32.mrf.mxu0 }
 0x52d   : > { %2499 = vst [vmem:[%s4096_s14 + $0x58] sm:$0xff] %v2467_v7  ;;  %v2465_v56 = vmax.f32 %v2365_v53, 0.0  ;;  %v2386_v11 = vadd.f32 %v3233_v8, %v4091_v31 }
 0x52e   : > { %v2377_v12 = vpop.f32.mrf.mxu0 }
 0x52f   : > { %2497 = vst [vmem:[%s4096_s14 + $0x48] sm:$0xff] %v2465_v56  ;;  %v2470_v46 = vmax.f32 %v2386_v11, 0.0  ;;  %v2378_v55 = vadd.f32 %v4091_v31, %v2377_v12 }
 0x530   : > { %v3234_v13 = vpop.f32.mrf.mxu0 }
 0x531   : > { %2502 = vst [vmem:[%s4096_s14 + $0x70] sm:$0xff] %v2470_v46  ;;  %v2468_v14 = vmax.f32 %v2378_v55, 0.0  ;;  %v2389_v57 = vadd.f32 %v3234_v13, %v4091_v31 }
 0x532   : > { %v2380_v15 = vpop.f32.mrf.mxu0 }
 0x533   : > { %2500 = vst [vmem:[%s4096_s14 + $0x60] sm:$0xff] %v2468_v14  ;;  %v2471_v16 = vmax.f32 %v2389_v57, 0.0  ;;  %v2381_v17 = vadd.f32 %v4091_v31, %v2380_v15 }
 0x534   : > { %v3237_v18 = vpop.f32.mrf.mxu0 }
 0x535   : > { %2503 = vst [vmem:[%s4096_s14 + $0x78] sm:$0xff] %v2471_v16  ;;  %v2469_v9 = vmax.f32 %v2381_v17, 0.0  ;;  %v2402_v20 = vadd.f32 %v3237_v18, %v4091_v31 }
 0x536   : > { %v2393_v21 = vpop.f32.mrf.mxu0 }
 0x537   : > { %2501 = vst [vmem:[%s4096_s14 + $0x68] sm:$0xff] %v2469_v9  ;;  %v2474_v22 = vmax.f32 %v2402_v20, 0.0  ;;  %v2394_v0 = vadd.f32 %v4091_v31, %v2393_v21 }
 0x538   : > { %v3238_v23 = vpop.f32.mrf.mxu0 }
 0x539   : > { %2506 = vst [vmem:[%s4096_s14 + $0x90] sm:$0xff] %v2474_v22  ;;  %v2472_v59 = vmax.f32 %v2394_v0, 0.0  ;;  %v2405_v35 = vadd.f32 %v3238_v23, %v4091_v31 }
 0x53a   : > { %v2396_v10 = vpop.f32.mrf.mxu0 }
 0x53b   : > { %2504 = vst [vmem:[%s4096_s14 + $0x80] sm:$0xff] %v2472_v59  ;;  %v2475_v24 = vmax.f32 %v2405_v35, 0.0  ;;  %v2397_v32 = vadd.f32 %v4091_v31, %v2396_v10 }
 0x53c   : > { %v3241_v25 = vpop.f32.mrf.mxu0 }
 0x53d   : > { %2507 = vst [vmem:[%s4096_s14 + $0x98] sm:$0xff] %v2475_v24  ;;  %v2473_v27 = vmax.f32 %v2397_v32, 0.0  ;;  %v2418_v28 = vadd.f32 %v3241_v25, %v4091_v31 }
 0x53e   : > { %v2409_v29 = vpop.f32.mrf.mxu0 }
 0x53f   : > { %2505 = vst [vmem:[%s4096_s14 + $0x88] sm:$0xff] %v2473_v27  ;;  %v2478_v19 = vmax.f32 %v2418_v28, 0.0  ;;  %v2410_v33 = vadd.f32 %v4091_v31, %v2409_v29 }
 0x540   : > { %v3242_v49 = vpop.f32.mrf.mxu0 }
 0x541   : > { %2510 = vst [vmem:[%s4096_s14 + $0xb0] sm:$0xff] %v2478_v19  ;;  %v2476_v45 = vmax.f32 %v2410_v33, 0.0  ;;  %v2421_v36 = vadd.f32 %v3242_v49, %v4091_v31 }
 0x542   : > { %v2412_v34 = vpop.f32.mrf.mxu0 }
 0x543   : > { %2508 = vst [vmem:[%s4096_s14 + $0xa0] sm:$0xff] %v2476_v45  ;;  %v2479_v38 = vmax.f32 %v2421_v36, 0.0  ;;  %v2413_v40 = vadd.f32 %v4091_v31, %v2412_v34 }
 0x544   : > { %v3245_v41 = vpop.f32.mrf.mxu0 }
 0x545   : > { %2511 = vst [vmem:[%s4096_s14 + $0xb8] sm:$0xff] %v2479_v38  ;;  %v2477_v42 = vmax.f32 %v2413_v40, 0.0  ;;  %v2434_v43 = vadd.f32 %v3245_v41, %v4091_v31 }
 0x546   : > { %v2425_v26 = vpop.f32.mrf.mxu0 }
 0x547   : > { %2509 = vst [vmem:[%s4096_s14 + $0xa8] sm:$0xff] %v2477_v42  ;;  %v2482_v39 = vmax.f32 %v2434_v43, 0.0  ;;  %v2426_v44 = vadd.f32 %v4091_v31, %v2425_v26 }
 0x548   : > { %v3246_v47 = vpop.f32.mrf.mxu0 }
 0x549   : > { %2514 = vst [vmem:[%s4096_s14 + $0xd0] sm:$0xff] %v2482_v39  ;;  %v2480_v48 = vmax.f32 %v2426_v44, 0.0  ;;  %v2437_v50 = vadd.f32 %v3246_v47, %v4091_v31 }
 0x54a   : > { %v2428_v58 = vpop.f32.mrf.mxu0 }
 0x54b   : > { %2512 = vst [vmem:[%s4096_s14 + $0xc0] sm:$0xff] %v2480_v48  ;;  %v2483_v51 = vmax.f32 %v2437_v50, 0.0  ;;  %v2429_v30 = vadd.f32 %v4091_v31, %v2428_v58 }
 0x54c   : > { %v3249_v60 = vpop.f32.mrf.mxu0 }
 0x54d   : > { %2515 = vst [vmem:[%s4096_s14 + $0xd8] sm:$0xff] %v2483_v51  ;;  %v2481_v61 = vmax.f32 %v2429_v30, 0.0  ;;  %v2450_v62 = vadd.f32 %v3249_v60, %v4091_v31 }
 0x54e   : > { %v2441_v52 = vpop.f32.mrf.mxu0 }
 0x54f   : > { %2513 = vst [vmem:[%s4096_s14 + $0xc8] sm:$0xff] %v2481_v61  ;;  %v2486_v63 = vmax.f32 %v2450_v62, 0.0  ;;  %v2442_v37 = vadd.f32 %v4091_v31, %v2441_v52 }
 0x550   : > { %v3250_v1 = vpop.f32.mrf.mxu0 }
 0x551   : > { %2518 = vst [vmem:[%s4096_s14 + $0xf0] sm:$0xff] %v2486_v63  ;;  %v2484_v2 = vmax.f32 %v2442_v37, 0.0  ;;  %v2453_v3 = vadd.f32 %v3250_v1, %v4091_v31 }
 0x552   : > { %v2444_v4 = vpop.f32.mrf.mxu0 }
 0x553   : > { %2516 = vst [vmem:[%s4096_s14 + $0xe0] sm:$0xff] %v2484_v2  ;;  %v2487_v5 = vmax.f32 %v2453_v3, 0.0  ;;  %v2445_v6 = vadd.f32 %v4091_v31, %v2444_v4 }
 0x555   : > { %2519 = vst [vmem:[%s4096_s14 + $0xf8] sm:$0xff] %v2487_v5  ;;  %v2485_v54 = vmax.f32 %v2445_v6, 0.0 }
 0x557   : > { %2517 = vst [vmem:[%s4096_s14 + $0xe8] sm:$0xff] %v2485_v54 }
 0x558   : > { %3422 = shalt.err (!%p3419_p0)
}
 0x559   : > { %s3423_s30 = scalar_lea.hbm %s4163_s11, 4096  ;;  %s3427_s22 = scalar_lea.hbm %s4214_s4, 8192 }
 0x55a   : > { %p3424_p2 = scmp.ne.s32.totalorder %s4163_s11, %s3423_s30  ;;  %p3428_p3 = scmp.lt.s32.totalorder %s4163_s11, %s4214_s4 }
 0x55b   : > { %p3429_p6 = scmp.lt.s32.totalorder %s3427_s22, %s3423_s30 }
 0x55c   : > { %p3425_p9 = pnand %p3424_p2, %p4223_p13 }
 0x55d   : > { %p3430_p11 = por %p3429_p6, %p3428_p3 }
 0x55e   : > { %p3426_p1 = pneg %p3425_p9 }
 0x560   : > { %p3431_p12 = pnand %p3430_p11, %p3426_p1 }
 0x562   : > { %3434 = shalt.err (!%p3431_p12)
}
 0x563   : > { %s3479_s14 = smov 128   ;;  %s3480_s20 = smov 8  }
 0x564   : > { %3265 = dma.vmem_to_hbm [thread:$0]  (%p4223_p13), %s4165_s8, 4096, %s4163_s11, %s2521_s19, %s3479_s14, %s3479_s14, %s3480_s20  }
 0x565 PF: > { %s2549_s10 = sand.u32 1, %s3461_s15   ;;  %p4224_p4 = scmp.ne.s32.totalorder %s4220_s28, 0 }
 0x566   : > { %p4225_p5 = scmp.ge.s32.totalorder %s3473_s18, 2  ;;  %s2550_s26 = scalar_lea.sflag [#allocation4], %s2549_s10 }
 0x568   : > { %p3272_p7 = pnand %p4225_p5, %p4224_p4 }
 0x56a   : > { %p3273_p8 = pneg %p3272_p7 }
 0x56c   : > { %3456 = dma.done.wait (%p3273_p8), %s2550_s26, 4096  }
 0x56d   : > { %3458 = vsyncadd (%p3273_p8), %s2550_s26, 4294963200  ;;  %p17_p10 = scmp.ge.s32.totalorder %s3531_s21, 4   ;;  %s4226_s15 = smov %s3465_s16 }
 0x56e   : > { %s4227_s16 = smov %s3469_s17  ;;  %s4228_s17 = smov %s3543_s24 }
 0x56f   : > { %s4229_s18 = smov %s3531_s21  ;;  %19 = sbr.rel (!%p17_p10) target bundleno = 5 (0x5), region = 84 }
 0x574   :  { %2555 = vsyncpa [#allocation3], 1 }
 0x575   :  { %2557 = vsyncpa [#allocation3 + $0x1], 1 }
 0x576   :  { %2558 = vsyncpa [#allocation4], 1 }
 0x577   :  { %2560 = vsyncpa [#allocation4 + $0x1], 1 }

</bundles_post_ra>
